<compile_context>
chip_gen: v6e
topology: v6e:2x2x1
jax: 0.10.0
libtpu: 0.0.40
codegen_flags: <defaults>
</compile_context>

<pallas_src>
import math
from functools import partial

import jax
import jax.numpy as jnp
from jax.experimental import pallas as pl
from jax.experimental.pallas import tpu as pltpu

LN_EPS = 1e-5


def _round_up(n, m):
    return pl.cdiv(n, m) * m


def _layer_norm(x, gamma, beta):
    mu = jnp.mean(x, axis=-1, keepdims=True)
    var = jnp.mean(jnp.square(x - mu), axis=-1, keepdims=True)
    return (x - mu) * jax.lax.rsqrt(var + LN_EPS) * gamma + beta


# ---------------------------------------------------------------------------
# Kernel 1: fused LN1 + multi-head causal self-attention + out-proj + residual
# ---------------------------------------------------------------------------
def attn_kernel(x_ref, g1_ref, be1_ref, wqkv_ref, wp_ref, bp_ref, o_ref, *,
                n_head):
    T, C = x_ref.shape
    hs = C // n_head
    scale = 1.0 / math.sqrt(hs)

    x = x_ref[...]                                     # (T, C) f32
    xn = _layer_norm(x, g1_ref[...], be1_ref[...])     # (T, C) f32
    xb = xn.astype(jnp.bfloat16)                       # bf16 MXU input

    # One lane-dense projection for all heads' Q, K, V: (T, C) @ (C, 3C).
    qkv = jnp.dot(xb, wqkv_ref[...], preferred_element_type=jnp.float32)
    q_all = qkv[:, :C]
    k_all = qkv[:, C:2 * C]
    v_all = qkv[:, 2 * C:]

    row = jax.lax.broadcasted_iota(jnp.int32, (T, T), 0)
    col = jax.lax.broadcasted_iota(jnp.int32, (T, T), 1)
    causal = row >= col

    head_outs = []
    for h in range(n_head):                            # static unroll over heads
        q = q_all[:, h * hs:(h + 1) * hs].astype(jnp.bfloat16)
        k = k_all[:, h * hs:(h + 1) * hs].astype(jnp.bfloat16)
        v = v_all[:, h * hs:(h + 1) * hs].astype(jnp.bfloat16)
        # scores = q @ k^T * hs^-0.5 (contract last dims, no explicit transpose)
        s = jax.lax.dot_general(
            q, k, dimension_numbers=(((1,), (1,)), ((), ())),
            preferred_element_type=jnp.float32) * scale          # (T, T)
        s = jnp.where(causal, s, -1e30)                # causal mask
        m = jnp.max(s, axis=-1, keepdims=True)
        p = jnp.exp(s - m)
        p = p * pl.reciprocal(jnp.sum(p, axis=-1, keepdims=True), approx=True)
        # TODO(synk): training-mode attention dropout via pltpu.prng_*; eval = identity.
        head_outs.append(
            jnp.dot(p.astype(jnp.bfloat16), v,
                    preferred_element_type=jnp.float32).astype(jnp.bfloat16))
    att = jnp.concatenate(head_outs, axis=-1)          # (T, C) bf16
    # One dense output projection for all heads: (T, C) @ (C, C).
    proj = jnp.dot(att, wp_ref[...], preferred_element_type=jnp.float32)
    # TODO(synk): training-mode projection dropout; eval = identity.
    o_ref[...] = (x + proj + bp_ref[...]).astype(o_ref.dtype)


def attention(x, p, n_head):
    B, T, C = x.shape

    weight_bytes = (C * 3 * C + C * C) * 2 + 3 * C * 4
    cost = pl.CostEstimate(
        flops=int(B * (8 * T * C * C + 4 * T * T * C)),
        transcendentals=int(B * n_head * T * T),
        bytes_accessed=int(2 * B * T * C * 4 + weight_bytes))
    work_bytes = 2 * T * C * 4 + 3 * T * C * 4 + 3 * T * T * 4 + weight_bytes
    vmem = int(min(64 * 2**20, max(32 * 2**20, 4 * work_bytes)))

    return pl.pallas_call(
        partial(attn_kernel, n_head=n_head),
        out_shape=jax.ShapeDtypeStruct((B, T, C), x.dtype),
        grid_spec=pltpu.PrefetchScalarGridSpec(
            num_scalar_prefetch=0,
            grid=(B,),
            in_specs=[
                pl.BlockSpec((None, T, C), lambda b: (b, 0, 0)),   # x
                pl.BlockSpec((1, C), lambda b: (0, 0)),            # ln1 gamma
                pl.BlockSpec((1, C), lambda b: (0, 0)),            # ln1 beta
                pl.BlockSpec((C, 3 * C), lambda b: (0, 0)),        # Wqkv (bf16)
                pl.BlockSpec((C, C), lambda b: (0, 0)),            # Wproj (bf16)
                pl.BlockSpec((1, C), lambda b: (0, 0)),            # bproj
            ],
            out_specs=pl.BlockSpec((None, T, C), lambda b: (b, 0, 0)),
        ),
        compiler_params=pltpu.CompilerParams(
            dimension_semantics=("parallel",),        # batch shards over TCs on v7x
            vmem_limit_bytes=vmem),
        cost_estimate=cost,
    )(x, p["g1"].reshape(1, C), p["be1"].reshape(1, C),
      p["wqkv"], p["wp"], p["bp"].reshape(1, C))


# ---------------------------------------------------------------------------
# Kernel 2: fused LN2 + Linear(C->H) + ReLU + Linear(H->C) + residual,
#           hidden dim H streamed as a reduction axis with f32 accumulator.
# ---------------------------------------------------------------------------
def ffwd_kernel(x_ref, g2_ref, be2_ref, w1_ref, b1_ref, w2_ref, b2_ref,
                o_ref, xn_sc, acc_sc):
    hi = pl.program_id(1)

    @pl.when(hi == 0)
    def _():
        xn = _layer_norm(x_ref[...], g2_ref[...], be2_ref[...])
        xn_sc[...] = xn.astype(xn_sc.dtype)            # bf16 LN(x), computed once
        acc_sc[...] = jnp.zeros_like(acc_sc)

    h = jnp.dot(xn_sc[...], w1_ref[...],
                preferred_element_type=jnp.float32) + b1_ref[...]
    h = jnp.maximum(h, 0.0)                            # ReLU on (TM, TH) slab only
    acc_sc[...] += jnp.dot(h.astype(w2_ref.dtype), w2_ref[...],
                           preferred_element_type=jnp.float32)

    @pl.when(hi == pl.num_programs(1) - 1)
    def _():
        # TODO(synk): training-mode dropout (mask * 1/(1-p) via pltpu.prng_*); eval = identity.
        o_ref[...] = (x_ref[...] + acc_sc[...] + b2_ref[...]).astype(o_ref.dtype)


def feed_forward(x, p, *, row_tile=256, hidden_tile=512):
    B, T, C = x.shape
    H = p["w1"].shape[1]
    M = B * T
    x2d = x.reshape(M, C)

    tm = min(row_tile, _round_up(M, 8))
    Mp = _round_up(M, tm)
    if Mp != M:                                        # ragged tail: pad, slice later
        x2d = jnp.pad(x2d, ((0, Mp - M), (0, 0)))
    th = hidden_tile if H % hidden_tile == 0 else H

    weight_bytes = (C * H + H * C) * 2 + (H + 3 * C) * 4
    cost = pl.CostEstimate(
        flops=int(4 * Mp * C * H),
        transcendentals=0,
        bytes_accessed=int(2 * Mp * C * 4 + weight_bytes))
    # double-buffered per-step working set + scratches, generous headroom
    est = 2 * (2 * tm * C * 4 + C * th * 2 + th * C * 2 + th * 4 + 4 * C * 4) \
          + tm * C * (2 + 4)
    vmem = int(min(64 * 2**20, max(32 * 2**20, 2 * est)))

    out = pl.pallas_call(
        ffwd_kernel,
        out_shape=jax.ShapeDtypeStruct((Mp, C), x.dtype),
        grid_spec=pltpu.PrefetchScalarGridSpec(
            num_scalar_prefetch=0,
            grid=(Mp // tm, H // th),
            in_specs=[
                pl.BlockSpec((tm, C), lambda i, h: (i, 0)),   # x rows (invariant in h)
                pl.BlockSpec((1, C), lambda i, h: (0, 0)),    # ln2 gamma
                pl.BlockSpec((1, C), lambda i, h: (0, 0)),    # ln2 beta
                pl.BlockSpec((C, th), lambda i, h: (0, h)),   # W1 tile (bf16, streamed)
                pl.BlockSpec((1, th), lambda i, h: (0, h)),   # b1 tile
                pl.BlockSpec((th, C), lambda i, h: (h, 0)),   # W2 tile (bf16, streamed)
                pl.BlockSpec((1, C), lambda i, h: (0, 0)),    # b2
            ],
            out_specs=pl.BlockSpec((tm, C), lambda i, h: (i, 0)),
            scratch_shapes=[pltpu.VMEM((tm, C), jnp.bfloat16),   # LN(x) cache
                            pltpu.VMEM((tm, C), jnp.float32)],   # f32 accumulator
        ),
        compiler_params=pltpu.CompilerParams(
            dimension_semantics=("parallel", "arbitrary"),
            vmem_limit_bytes=vmem),
        cost_estimate=cost,
    )(x2d, p["g2"].reshape(1, C), p["be2"].reshape(1, C),
      p["w1"], p["b1"].reshape(1, H), p["w2"], p["b2"].reshape(1, C))
    return out[:M].reshape(B, T, C)


def transformer_block(x, params, n_head, *, row_tile=256, hidden_tile=512):
    y = attention(x, params, n_head)               # x + sa(ln1(x))
    return feed_forward(y, params, row_tile=row_tile, hidden_tile=hidden_tile)


# ---------------------------------------------------------------------------
# Parameters (weights stored as (in, out), i.e. PyTorch weight.T; matmul
# weights stored bf16, biases / LN params f32).
# Wqkv columns are [Q heads | K heads | V heads], head-major within each block,
# so per-head nn.Linear(C, hs, bias=False) semantics are preserved exactly.
# ---------------------------------------------------------------------------
def init_params(key, n_embd, n_head):
    C = n_embd
    H = 4 * C
    ks = jax.random.split(key, 11)
    bc = 1.0 / math.sqrt(C)
    bh = 1.0 / math.sqrt(H)
    u = lambda k, shape, b: jax.random.uniform(k, shape, jnp.float32, -b, b)
    return dict(
        # randomized LN affine params (PyTorch default is ones/zeros) to exercise the path
        g1=1.0 + 0.1 * jax.random.normal(ks[0], (C,), jnp.float32),
        be1=0.1 * jax.random.normal(ks[1], (C,), jnp.float32),
        wqkv=u(ks[2], (C, 3 * C), bc).astype(jnp.bfloat16),
        wp=u(ks[3], (C, C), bc).astype(jnp.bfloat16),
        bp=u(ks[4], (C,), bc),
        g2=1.0 + 0.1 * jax.random.normal(ks[5], (C,), jnp.float32),
        be2=0.1 * jax.random.normal(ks[6], (C,), jnp.float32),
        w1=u(ks[7], (C, H), bc).astype(jnp.bfloat16),
        b1=u(ks[8], (H,), bc),
        w2=u(ks[9], (H, C), bh).astype(jnp.bfloat16),
        b2=u(ks[10], (C,), bh),
    )


# ---------------------------------------------------------------------------
# Pure-JAX reference (f32 math on the bf16-rounded weights), mirrors the
# PyTorch Block.forward in eval mode.
# ---------------------------------------------------------------------------
def ref_block(x, p, n_head):
    f32 = jnp.float32
    B, T, C = x.shape
    hs = C // n_head

    def ln(z, g, b):
        mu = z.mean(-1, keepdims=True)
        var = ((z - mu) ** 2).mean(-1, keepdims=True)
        return (z - mu) * jax.lax.rsqrt(var + LN_EPS) * g + b

    xn = ln(x, p["g1"], p["be1"])
    qkv = xn @ p["wqkv"].astype(f32)               # (B, T, 3C)
    q, k, v = jnp.split(qkv, 3, axis=-1)
    tril = jnp.tril(jnp.ones((T, T), bool))
    outs = []
    for h in range(n_head):
        qh = q[..., h * hs:(h + 1) * hs]
        kh = k[..., h * hs:(h + 1) * hs]
        vh = v[..., h * hs:(h + 1) * hs]
        s = jnp.einsum("btd,bsd->bts", qh, kh) * (hs ** -0.5)
        s = jnp.where(tril, s, -jnp.inf)
        a = jax.nn.softmax(s, axis=-1)
        outs.append(jnp.einsum("bts,bsd->btd", a, vh))
    att = jnp.concatenate(outs, axis=-1)
    x = x + att @ p["wp"].astype(f32) + p["bp"]
    xn2 = ln(x, p["g2"], p["be2"])
    hid = jnp.maximum(xn2 @ p["w1"].astype(f32) + p["b1"], 0.0)
    y = hid @ p["w2"].astype(f32) + p["b2"]
    return x + y


if __name__ == "__main__":
    # Small config, lane-dense: batch=2, block_size(T)=128, n_embd=128, n_head=4
    B, T, C, n_head = 2, 128, 128, 4
    key = jax.random.PRNGKey(0)
    kx, kp = jax.random.split(key)
    x = jax.random.normal(kx, (B, T, C), jnp.float32)
    params = init_params(kp, C, n_head)

    out = transformer_block(x, params, n_head)
    out = jax.block_until_ready(out)

    ref = ref_block(x, params, n_head)
    assert out.shape == (B, T, C)
    err = float(jnp.max(jnp.abs(out - ref)))
    assert jnp.allclose(out, ref, atol=5e-2, rtol=5e-2), f"max abs err {err}"

    print("KERNEL_OK")
</pallas_src>

<mosaic_0001>
module attributes {stable_mosaic.version = 11 : i64} {
  func.func @attn_kernel(%arg0: i32, %arg1: memref<1x128x128xf32, #tpu.memory_space<vmem>>, %arg2: memref<1x128xf32, #tpu.memory_space<vmem>>, %arg3: memref<1x128xf32, #tpu.memory_space<vmem>>, %arg4: memref<128x384xbf16, #tpu.memory_space<vmem>>, %arg5: memref<128x128xbf16, #tpu.memory_space<vmem>>, %arg6: memref<1x128xf32, #tpu.memory_space<vmem>>, %arg7: memref<1x128x128xf32, #tpu.memory_space<vmem>>) attributes {dimension_semantics = [#tpu.dimension_semantics<parallel>], iteration_bounds = array<i64: 2>, scalar_prefetch = 0 : i64, scratch_operands = 0 : i64, tpu.core_type = #tpu.core_type<tc>, window_params = [{transform_indices = @transform_0, window_bounds = array<i64: 1, 128, 128>}, {pipeline_mode = #tpu.pipeline_mode<synchronous>, transform_indices = @transform_1, window_bounds = array<i64: 1, 128>}, {pipeline_mode = #tpu.pipeline_mode<synchronous>, transform_indices = @transform_2, window_bounds = array<i64: 1, 128>}, {pipeline_mode = #tpu.pipeline_mode<synchronous>, transform_indices = @transform_3, window_bounds = array<i64: 128, 384>}, {pipeline_mode = #tpu.pipeline_mode<synchronous>, transform_indices = @transform_4, window_bounds = array<i64: 128, 128>}, {pipeline_mode = #tpu.pipeline_mode<synchronous>, transform_indices = @transform_5, window_bounds = array<i64: 1, 128>}, {transform_indices = @transform_6, window_bounds = array<i64: 1, 128, 128>}]} {
    %c0 = arith.constant 0 : index
    %c0_0 = arith.constant 0 : index
    %c0_1 = arith.constant 0 : index
    %0 = vector.load %arg1[%c0, %c0_0, %c0_1] : memref<1x128x128xf32, #tpu.memory_space<vmem>>, vector<1x128x128xf32>
    %1 = vector.shape_cast %0 : vector<1x128x128xf32> to vector<128x128xf32>
    %c0_2 = arith.constant 0 : index
    %c0_3 = arith.constant 0 : index
    %2 = vector.load %arg2[%c0_2, %c0_3] : memref<1x128xf32, #tpu.memory_space<vmem>>, vector<1x128xf32>
    %c0_4 = arith.constant 0 : index
    %c0_5 = arith.constant 0 : index
    %3 = vector.load %arg3[%c0_4, %c0_5] : memref<1x128xf32, #tpu.memory_space<vmem>>, vector<1x128xf32>
    %cst = arith.constant dense<0.000000e+00> : vector<128xf32>
    %4 = vector.multi_reduction <add>, %1, %cst [1] : vector<128x128xf32> to vector<128xf32>
    %5 = vector.shape_cast %4 : vector<128xf32> to vector<128x1xf32>
    %cst_6 = arith.constant 1.280000e+02 : f32
    %6 = vector.broadcast %cst_6 : f32 to vector<128x1xf32>
    %7 = arith.divf %5, %6 : vector<128x1xf32>
    %8 = vector.broadcast %7 : vector<128x1xf32> to vector<128x128xf32>
    %9 = arith.subf %1, %8 : vector<128x128xf32>
    %10 = arith.mulf %9, %9 : vector<128x128xf32>
    %cst_7 = arith.constant dense<0.000000e+00> : vector<128xf32>
    %11 = vector.multi_reduction <add>, %10, %cst_7 [1] : vector<128x128xf32> to vector<128xf32>
    %12 = vector.shape_cast %11 : vector<128xf32> to vector<128x1xf32>
    %cst_8 = arith.constant 1.280000e+02 : f32
    %13 = vector.broadcast %cst_8 : f32 to vector<128x1xf32>
    %14 = arith.divf %12, %13 : vector<128x1xf32>
    %15 = vector.broadcast %7 : vector<128x1xf32> to vector<128x128xf32>
    %16 = arith.subf %1, %15 : vector<128x128xf32>
    %cst_9 = arith.constant 9.99999974E-6 : f32
    %17 = vector.broadcast %cst_9 : f32 to vector<128x1xf32>
    %18 = arith.addf %14, %17 : vector<128x1xf32>
    %19 = math.rsqrt %18 : vector<128x1xf32>
    %20 = vector.broadcast %19 : vector<128x1xf32> to vector<128x128xf32>
    %21 = arith.mulf %16, %20 : vector<128x128xf32>
    %22 = vector.broadcast %2 : vector<1x128xf32> to vector<128x128xf32>
    %23 = arith.mulf %21, %22 : vector<128x128xf32>
    %24 = vector.broadcast %3 : vector<1x128xf32> to vector<128x128xf32>
    %25 = arith.addf %23, %24 : vector<128x128xf32>
    %26 = arith.truncf %25 : vector<128x128xf32> to vector<128x128xbf16>
    %c0_10 = arith.constant 0 : index
    %c0_11 = arith.constant 0 : index
    %27 = vector.load %arg4[%c0_10, %c0_11] : memref<128x384xbf16, #tpu.memory_space<vmem>>, vector<128x384xbf16>
    %cst_12 = arith.constant dense<0.000000e+00> : vector<128x384xf32>
    %28 = tpu.matmul %26, %27, %cst_12 {dimension_numbers = #tpu.dot_dimension_numbers<[1], [0], [0], [1], [0, 0, 1, 1], [], []>} : vector<128x128xbf16>, vector<128x384xbf16>, vector<128x384xf32> -> vector<128x384xf32>
    %29 = vector.extract_strided_slice %28 {offsets = [0, 0], sizes = [128, 128], strides = [1, 1]} : vector<128x384xf32> to vector<128x128xf32>
    %30 = vector.extract_strided_slice %28 {offsets = [0, 128], sizes = [128, 128], strides = [1, 1]} : vector<128x384xf32> to vector<128x128xf32>
    %31 = vector.extract_strided_slice %28 {offsets = [0, 256], sizes = [128, 128], strides = [1, 1]} : vector<128x384xf32> to vector<128x128xf32>
    %32 = tpu.iota {dimensions = array<i32: 0>} : vector<128x128xi32>
    %33 = tpu.iota {dimensions = array<i32: 1>} : vector<128x128xi32>
    %34 = arith.cmpi sge, %32, %33 : vector<128x128xi32>
    %35 = vector.extract_strided_slice %29 {offsets = [0, 0], sizes = [128, 32], strides = [1, 1]} : vector<128x128xf32> to vector<128x32xf32>
    %36 = arith.truncf %35 : vector<128x32xf32> to vector<128x32xbf16>
    %37 = vector.extract_strided_slice %30 {offsets = [0, 0], sizes = [128, 32], strides = [1, 1]} : vector<128x128xf32> to vector<128x32xf32>
    %38 = arith.truncf %37 : vector<128x32xf32> to vector<128x32xbf16>
    %39 = vector.extract_strided_slice %31 {offsets = [0, 0], sizes = [128, 32], strides = [1, 1]} : vector<128x128xf32> to vector<128x32xf32>
    %40 = arith.truncf %39 : vector<128x32xf32> to vector<128x32xbf16>
    %cst_13 = arith.constant dense<0.000000e+00> : vector<128x128xf32>
    %41 = tpu.matmul %36, %38, %cst_13 {dimension_numbers = #tpu.dot_dimension_numbers<[1], [1], [0], [0], [0, 0, 1, 0], [], []>} : vector<128x32xbf16>, vector<128x32xbf16>, vector<128x128xf32> -> vector<128x128xf32>
    %cst_14 = arith.constant 0.176776692 : f32
    %42 = vector.broadcast %cst_14 : f32 to vector<128x128xf32>
    %43 = arith.mulf %41, %42 : vector<128x128xf32>
    %cst_15 = arith.constant -1.000000e+30 : f32
    %44 = vector.broadcast %cst_15 : f32 to vector<128x128xf32>
    %45 = arith.select %34, %43, %44 : vector<128x128xi1>, vector<128x128xf32>
    %cst_16 = arith.constant dense<0xFF800000> : vector<128xf32>
    %46 = vector.multi_reduction <maximumf>, %45, %cst_16 [1] : vector<128x128xf32> to vector<128xf32>
    %47 = vector.shape_cast %46 : vector<128xf32> to vector<128x1xf32>
    %48 = vector.broadcast %47 : vector<128x1xf32> to vector<128x128xf32>
    %49 = arith.subf %45, %48 : vector<128x128xf32>
    %50 = math.exp %49 : vector<128x128xf32>
    %cst_17 = arith.constant dense<0.000000e+00> : vector<128xf32>
    %51 = vector.multi_reduction <add>, %50, %cst_17 [1] : vector<128x128xf32> to vector<128xf32>
    %52 = vector.shape_cast %51 : vector<128xf32> to vector<128x1xf32>
    %53 = tpu.reciprocal %52 {approx = true} : vector<128x1xf32> -> vector<128x1xf32>
    %54 = vector.broadcast %53 : vector<128x1xf32> to vector<128x128xf32>
    %55 = arith.mulf %50, %54 : vector<128x128xf32>
    %56 = arith.truncf %55 : vector<128x128xf32> to vector<128x128xbf16>
    %cst_18 = arith.constant dense<0.000000e+00> : vector<128x32xf32>
    %57 = tpu.matmul %56, %40, %cst_18 {dimension_numbers = #tpu.dot_dimension_numbers<[1], [0], [0], [1], [0, 0, 1, 1], [], []>} : vector<128x128xbf16>, vector<128x32xbf16>, vector<128x32xf32> -> vector<128x32xf32>
    %58 = arith.truncf %57 : vector<128x32xf32> to vector<128x32xbf16>
    %59 = vector.extract_strided_slice %29 {offsets = [0, 32], sizes = [128, 32], strides = [1, 1]} : vector<128x128xf32> to vector<128x32xf32>
    %60 = arith.truncf %59 : vector<128x32xf32> to vector<128x32xbf16>
    %61 = vector.extract_strided_slice %30 {offsets = [0, 32], sizes = [128, 32], strides = [1, 1]} : vector<128x128xf32> to vector<128x32xf32>
    %62 = arith.truncf %61 : vector<128x32xf32> to vector<128x32xbf16>
    %63 = vector.extract_strided_slice %31 {offsets = [0, 32], sizes = [128, 32], strides = [1, 1]} : vector<128x128xf32> to vector<128x32xf32>
    %64 = arith.truncf %63 : vector<128x32xf32> to vector<128x32xbf16>
    %cst_19 = arith.constant dense<0.000000e+00> : vector<128x128xf32>
    %65 = tpu.matmul %60, %62, %cst_19 {dimension_numbers = #tpu.dot_dimension_numbers<[1], [1], [0], [0], [0, 0, 1, 0], [], []>} : vector<128x32xbf16>, vector<128x32xbf16>, vector<128x128xf32> -> vector<128x128xf32>
    %cst_20 = arith.constant 0.176776692 : f32
    %66 = vector.broadcast %cst_20 : f32 to vector<128x128xf32>
    %67 = arith.mulf %65, %66 : vector<128x128xf32>
    %cst_21 = arith.constant -1.000000e+30 : f32
    %68 = vector.broadcast %cst_21 : f32 to vector<128x128xf32>
    %69 = arith.select %34, %67, %68 : vector<128x128xi1>, vector<128x128xf32>
    %cst_22 = arith.constant dense<0xFF800000> : vector<128xf32>
    %70 = vector.multi_reduction <maximumf>, %69, %cst_22 [1] : vector<128x128xf32> to vector<128xf32>
    %71 = vector.shape_cast %70 : vector<128xf32> to vector<128x1xf32>
    %72 = vector.broadcast %71 : vector<128x1xf32> to vector<128x128xf32>
    %73 = arith.subf %69, %72 : vector<128x128xf32>
    %74 = math.exp %73 : vector<128x128xf32>
    %cst_23 = arith.constant dense<0.000000e+00> : vector<128xf32>
    %75 = vector.multi_reduction <add>, %74, %cst_23 [1] : vector<128x128xf32> to vector<128xf32>
    %76 = vector.shape_cast %75 : vector<128xf32> to vector<128x1xf32>
    %77 = tpu.reciprocal %76 {approx = true} : vector<128x1xf32> -> vector<128x1xf32>
    %78 = vector.broadcast %77 : vector<128x1xf32> to vector<128x128xf32>
    %79 = arith.mulf %74, %78 : vector<128x128xf32>
    %80 = arith.truncf %79 : vector<128x128xf32> to vector<128x128xbf16>
    %cst_24 = arith.constant dense<0.000000e+00> : vector<128x32xf32>
    %81 = tpu.matmul %80, %64, %cst_24 {dimension_numbers = #tpu.dot_dimension_numbers<[1], [0], [0], [1], [0, 0, 1, 1], [], []>} : vector<128x128xbf16>, vector<128x32xbf16>, vector<128x32xf32> -> vector<128x32xf32>
    %82 = arith.truncf %81 : vector<128x32xf32> to vector<128x32xbf16>
    %83 = vector.extract_strided_slice %29 {offsets = [0, 64], sizes = [128, 32], strides = [1, 1]} : vector<128x128xf32> to vector<128x32xf32>
    %84 = arith.truncf %83 : vector<128x32xf32> to vector<128x32xbf16>
    %85 = vector.extract_strided_slice %30 {offsets = [0, 64], sizes = [128, 32], strides = [1, 1]} : vector<128x128xf32> to vector<128x32xf32>
    %86 = arith.truncf %85 : vector<128x32xf32> to vector<128x32xbf16>
    %87 = vector.extract_strided_slice %31 {offsets = [0, 64], sizes = [128, 32], strides = [1, 1]} : vector<128x128xf32> to vector<128x32xf32>
    %88 = arith.truncf %87 : vector<128x32xf32> to vector<128x32xbf16>
    %cst_25 = arith.constant dense<0.000000e+00> : vector<128x128xf32>
    %89 = tpu.matmul %84, %86, %cst_25 {dimension_numbers = #tpu.dot_dimension_numbers<[1], [1], [0], [0], [0, 0, 1, 0], [], []>} : vector<128x32xbf16>, vector<128x32xbf16>, vector<128x128xf32> -> vector<128x128xf32>
    %cst_26 = arith.constant 0.176776692 : f32
    %90 = vector.broadcast %cst_26 : f32 to vector<128x128xf32>
    %91 = arith.mulf %89, %90 : vector<128x128xf32>
    %cst_27 = arith.constant -1.000000e+30 : f32
    %92 = vector.broadcast %cst_27 : f32 to vector<128x128xf32>
    %93 = arith.select %34, %91, %92 : vector<128x128xi1>, vector<128x128xf32>
    %cst_28 = arith.constant dense<0xFF800000> : vector<128xf32>
    %94 = vector.multi_reduction <maximumf>, %93, %cst_28 [1] : vector<128x128xf32> to vector<128xf32>
    %95 = vector.shape_cast %94 : vector<128xf32> to vector<128x1xf32>
    %96 = vector.broadcast %95 : vector<128x1xf32> to vector<128x128xf32>
    %97 = arith.subf %93, %96 : vector<128x128xf32>
    %98 = math.exp %97 : vector<128x128xf32>
    %cst_29 = arith.constant dense<0.000000e+00> : vector<128xf32>
    %99 = vector.multi_reduction <add>, %98, %cst_29 [1] : vector<128x128xf32> to vector<128xf32>
    %100 = vector.shape_cast %99 : vector<128xf32> to vector<128x1xf32>
    %101 = tpu.reciprocal %100 {approx = true} : vector<128x1xf32> -> vector<128x1xf32>
    %102 = vector.broadcast %101 : vector<128x1xf32> to vector<128x128xf32>
    %103 = arith.mulf %98, %102 : vector<128x128xf32>
    %104 = arith.truncf %103 : vector<128x128xf32> to vector<128x128xbf16>
    %cst_30 = arith.constant dense<0.000000e+00> : vector<128x32xf32>
    %105 = tpu.matmul %104, %88, %cst_30 {dimension_numbers = #tpu.dot_dimension_numbers<[1], [0], [0], [1], [0, 0, 1, 1], [], []>} : vector<128x128xbf16>, vector<128x32xbf16>, vector<128x32xf32> -> vector<128x32xf32>
    %106 = arith.truncf %105 : vector<128x32xf32> to vector<128x32xbf16>
    %107 = vector.extract_strided_slice %29 {offsets = [0, 96], sizes = [128, 32], strides = [1, 1]} : vector<128x128xf32> to vector<128x32xf32>
    %108 = arith.truncf %107 : vector<128x32xf32> to vector<128x32xbf16>
    %109 = vector.extract_strided_slice %30 {offsets = [0, 96], sizes = [128, 32], strides = [1, 1]} : vector<128x128xf32> to vector<128x32xf32>
    %110 = arith.truncf %109 : vector<128x32xf32> to vector<128x32xbf16>
    %111 = vector.extract_strided_slice %31 {offsets = [0, 96], sizes = [128, 32], strides = [1, 1]} : vector<128x128xf32> to vector<128x32xf32>
    %112 = arith.truncf %111 : vector<128x32xf32> to vector<128x32xbf16>
    %cst_31 = arith.constant dense<0.000000e+00> : vector<128x128xf32>
    %113 = tpu.matmul %108, %110, %cst_31 {dimension_numbers = #tpu.dot_dimension_numbers<[1], [1], [0], [0], [0, 0, 1, 0], [], []>} : vector<128x32xbf16>, vector<128x32xbf16>, vector<128x128xf32> -> vector<128x128xf32>
    %cst_32 = arith.constant 0.176776692 : f32
    %114 = vector.broadcast %cst_32 : f32 to vector<128x128xf32>
    %115 = arith.mulf %113, %114 : vector<128x128xf32>
    %cst_33 = arith.constant -1.000000e+30 : f32
    %116 = vector.broadcast %cst_33 : f32 to vector<128x128xf32>
    %117 = arith.select %34, %115, %116 : vector<128x128xi1>, vector<128x128xf32>
    %cst_34 = arith.constant dense<0xFF800000> : vector<128xf32>
    %118 = vector.multi_reduction <maximumf>, %117, %cst_34 [1] : vector<128x128xf32> to vector<128xf32>
    %119 = vector.shape_cast %118 : vector<128xf32> to vector<128x1xf32>
    %120 = vector.broadcast %119 : vector<128x1xf32> to vector<128x128xf32>
    %121 = arith.subf %117, %120 : vector<128x128xf32>
    %122 = math.exp %121 : vector<128x128xf32>
    %cst_35 = arith.constant dense<0.000000e+00> : vector<128xf32>
    %123 = vector.multi_reduction <add>, %122, %cst_35 [1] : vector<128x128xf32> to vector<128xf32>
    %124 = vector.shape_cast %123 : vector<128xf32> to vector<128x1xf32>
    %125 = tpu.reciprocal %124 {approx = true} : vector<128x1xf32> -> vector<128x1xf32>
    %126 = vector.broadcast %125 : vector<128x1xf32> to vector<128x128xf32>
    %127 = arith.mulf %122, %126 : vector<128x128xf32>
    %128 = arith.truncf %127 : vector<128x128xf32> to vector<128x128xbf16>
    %cst_36 = arith.constant dense<0.000000e+00> : vector<128x32xf32>
    %129 = tpu.matmul %128, %112, %cst_36 {dimension_numbers = #tpu.dot_dimension_numbers<[1], [0], [0], [1], [0, 0, 1, 1], [], []>} : vector<128x128xbf16>, vector<128x32xbf16>, vector<128x32xf32> -> vector<128x32xf32>
    %130 = arith.truncf %129 : vector<128x32xf32> to vector<128x32xbf16>
    %131 = tpu.concatenate %58, %82, %106, %130 in 1 : vector<128x32xbf16>, vector<128x32xbf16>, vector<128x32xbf16>, vector<128x32xbf16> -> vector<128x128xbf16>
    %c0_37 = arith.constant 0 : index
    %c0_38 = arith.constant 0 : index
    %132 = vector.load %arg5[%c0_37, %c0_38] : memref<128x128xbf16, #tpu.memory_space<vmem>>, vector<128x128xbf16>
    %cst_39 = arith.constant dense<0.000000e+00> : vector<128x128xf32>
    %133 = tpu.matmul %131, %132, %cst_39 {dimension_numbers = #tpu.dot_dimension_numbers<[1], [0], [0], [1], [0, 0, 1, 1], [], []>} : vector<128x128xbf16>, vector<128x128xbf16>, vector<128x128xf32> -> vector<128x128xf32>
    %134 = arith.addf %1, %133 : vector<128x128xf32>
    %c0_40 = arith.constant 0 : index
    %c0_41 = arith.constant 0 : index
    %135 = vector.load %arg6[%c0_40, %c0_41] : memref<1x128xf32, #tpu.memory_space<vmem>>, vector<1x128xf32>
    %136 = vector.broadcast %135 : vector<1x128xf32> to vector<128x128xf32>
    %137 = arith.addf %134, %136 : vector<128x128xf32>
    %c0_42 = arith.constant 0 : index
    %c0_43 = arith.constant 0 : index
    %c0_44 = arith.constant 0 : index
    %138 = vector.load %arg7[%c0_42, %c0_43, %c0_44] : memref<1x128x128xf32, #tpu.memory_space<vmem>>, vector<1x128x128xf32>
    %139 = vector.shape_cast %138 : vector<1x128x128xf32> to vector<128x128xf32>
    %140 = vector.shape_cast %137 : vector<128x128xf32> to vector<1x128x128xf32>
    tpu.vector_store %arg7[%c0_42, %c0_43, %c0_44], %140 {strides = array<i32>} : memref<1x128x128xf32, #tpu.memory_space<vmem>>, vector<1x128x128xf32>,
    return
  }
  func.func @transform_0(%arg0: i32) -> (i32, i32, i32) {
    %c0_i32 = arith.constant 0 : i32
    %c0_i32_0 = arith.constant 0 : i32
    %c0_i32_1 = arith.constant 0 : i32
    return %arg0, %c0_i32, %c0_i32_0 : i32, i32, i32
  }
  func.func @transform_1(%arg0: i32) -> (i32, i32) {
    %c0_i32 = arith.constant 0 : i32
    %c0_i32_0 = arith.constant 0 : i32
    %c0_i32_1 = arith.constant 0 : i32
    return %c0_i32, %c0_i32_0 : i32, i32
  }
  func.func @transform_2(%arg0: i32) -> (i32, i32) {
    %c0_i32 = arith.constant 0 : i32
    %c0_i32_0 = arith.constant 0 : i32
    %c0_i32_1 = arith.constant 0 : i32
    return %c0_i32, %c0_i32_0 : i32, i32
  }
  func.func @transform_3(%arg0: i32) -> (i32, i32) {
    %c0_i32 = arith.constant 0 : i32
    %c0_i32_0 = arith.constant 0 : i32
    %c0_i32_1 = arith.constant 0 : i32
    return %c0_i32, %c0_i32_0 : i32, i32
  }
  func.func @transform_4(%arg0: i32) -> (i32, i32) {
    %c0_i32 = arith.constant 0 : i32
    %c0_i32_0 = arith.constant 0 : i32
    %c0_i32_1 = arith.constant 0 : i32
    return %c0_i32, %c0_i32_0 : i32, i32
  }
  func.func @transform_5(%arg0: i32) -> (i32, i32) {
    %c0_i32 = arith.constant 0 : i32
    %c0_i32_0 = arith.constant 0 : i32
    %c0_i32_1 = arith.constant 0 : i32
    return %c0_i32, %c0_i32_0 : i32, i32
  }
  func.func @transform_6(%arg0: i32) -> (i32, i32, i32) {
    %c0_i32 = arith.constant 0 : i32
    %c0_i32_0 = arith.constant 0 : i32
    %c0_i32_1 = arith.constant 0 : i32
    return %arg0, %c0_i32, %c0_i32_0 : i32, i32, i32
  }
}

</mosaic_0001>

<bundles_post_ra>
// kernel: tpu_custom_call.1
= control target key start
LH: loop header
LB: loop body
LE: loop exit
PB: predicated region body
PF: predicated region fallthrough
CT: control target
= control target key end

     0   :  { %11 = vsyncpa [#allocation3], 0  ;;  %s6447_s0 = inlined_call_operand.hbm [shape: f32[2,128,128], index: 0, kind: input, shape index: {}]   ;;  %s6448_s1 = inlined_call_operand.vmem [shape: f32[1,128], index: 1, kind: input, shape index: {}]   ;;  %s6449_s2 = inlined_call_operand.vmem [shape: f32[1,128], index: 2, kind: input, shape index: {}]   ;;  %s6450_s3 = inlined_call_operand.hbm [shape: bf16[128,384], index: 3, kind: input, shape index: {}]   ;;  %s6451_s4 = inlined_call_operand.hbm [shape: bf16[128,128], index: 4, kind: input, shape index: {}]   ;;  %s6452_s5 = inlined_call_operand.vmem [shape: f32[1,128], index: 5, kind: input, shape index: {}]   ;;  %s6453_s6 = inlined_call_operand.hbm [shape: f32[2,128,128], index: 6, kind: output, shape index: {}]  }
   0x1   :  { %13 = vsyncpa [#allocation3 + $0x1], 0 }
   0x2   :  { %14 = vsyncpa [#allocation6], 0 }
   0x3   :  { %15 = vsyncpa [#allocation4], 0 }
   0x4   :  { %17 = vsyncpa [#allocation4 + $0x1], 0  ;;  %s4604_s21 = smov 0   ;;  %s4606_s22 = smov 0  }
   0x5   :  { %s4608_s23 = smov 0   ;;  %s4610_s24 = smov 0  }
   0x6 LB: > { %s4625_s25 = sadd.s32 4294967295, %s4551_s24   ;;  %s3365_s26 = sadd.s32 4294967294, %s4551_s24   ;;  %s4551_s24 = sphi %s4610_s24, %s6668_s24   ;;  %s4547_s23 = sphi %s4608_s23, %s6667_s23   ;;  %s4543_s22 = sphi %s4606_s22, %s6666_s22   ;;  %s4539_s21 = sphi %s4604_s21, %s6665_s21  }
   0x7   : > { %p43_p0 = scmp.ne.s32.totalorder %s4543_s22, %s4539_s21  ;;  %p6454_p1 = scmp.eq.s32.totalorder %s4625_s25, 0 }
   0x8   : > { %p178_p3 = scmp.eq.s32.totalorder %s3365_s26, 1  ;;  %p3366_p5 = scmp.ge.s32.totalorder %s4551_s24, 1 }
   0x9   : > { %p4634_p4 = por %p6454_p1, %p43_p0  ;;  %p185_p7 = scmp.lt.s32.totalorder %s4551_s24, 3 }
   0xa   : > { %p4639_p6 = por %p178_p3, %p43_p0  ;;  %s4553_s30 = smov [#allocation5]  }
   0xb   : > { %s6523_s27 = scalar_select %p4634_p4, 1, 0 }
   0xc   : > { %s6524_s28 = scalar_select %p4639_p6, 1, 0 }
   0xd   : > { %p4644_p8 = pnand %p3366_p5, %p185_p7  ;;  %s203_s7 = sshll.u32 %s4553_s30, 4  ;;  %s204_s7 = int_to_ptr.vmem [resolvable:$true] %s203_s7 }
   0xe   : > { %s4554_s9 = smov [#allocation7]   ;;  %s4414_s11 = scalar_lea.vmem %s204_s7, 3072 }
   0xf   : > { %s6525_s29 = scalar_select %p4644_p8, 1, 0 }
  0x10   : > { %p3992_p9 = pneg %p4644_p8  ;;  %s216_s10 = sshll.u32 %s4554_s9, 4  ;;  %s217_s10 = int_to_ptr.vmem [resolvable:$true] %s216_s10 }
  0x11   : > { %p4415_p13 = scmp.ne.s32.totalorder %s204_s7, %s4414_s11  ;;  %p4422_p5 = scmp.lt.s32.totalorder %s204_s7, %s204_s7 }
  0x12   : > { %p4653_p11 = pnand %p3992_p9, %p6454_p1  ;;  %p4423_p7 = scmp.lt.s32.totalorder %s4414_s11, %s4414_s11 }
  0x14   : > { %p4405_p12 = pneg %p4653_p11  ;;  %p4424_p10 = por %p4423_p7, %p4422_p5 }
  0x16   : > { %p4417_p0 = pnand %p4415_p13, %p4405_p12 }
  0x18   : > { %p4418_p3 = pneg %p4417_p0 }
  0x1a   : > { %p4425_p9 = pnand %p4424_p10, %p4418_p3 }
  0x1c   : > { %4428 = shalt.err (!%p4425_p9)
}
  0x1d   : > { %s4555_s12 = smov 192   ;;  %s4556_s13 = smov 12  }
  0x1e   : > { %3995 = dma.hbm_to_vmem [thread:$0]  (!%p4653_p11), %s6450_s3, 3072, %s204_s7, [#allocation6], %s4555_s12, %s4555_s12, %s4556_s13  }
  0x1f   : > { %s4440_s16 = scalar_lea.vmem %s217_s10, 1024  ;;  %p4448_p2 = scmp.lt.s32.totalorder %s217_s10, %s217_s10 }
  0x20   : > { %p4441_p1 = scmp.ne.s32.totalorder %s217_s10, %s4440_s16  ;;  %p4449_p6 = scmp.lt.s32.totalorder %s4440_s16, %s4440_s16 }
  0x22   : > { %p4443_p13 = pnand %p4441_p1, %p4405_p12  ;;  %p4450_p5 = por %p4449_p6, %p4448_p2 }
  0x24   : > { %p4444_p0 = pneg %p4443_p13 }
  0x26   : > { %p4451_p10 = pnand %p4450_p5, %p4444_p0 }
  0x28   : > { %4454 = shalt.err (!%p4451_p10)
}
  0x29   : > { %s4557_s17 = smov 64   ;;  %s4558_s18 = smov 4  }
  0x2a   : > { %3998 = dma.hbm_to_vmem [thread:$0]  (!%p4653_p11), %s6451_s4, 1024, %s217_s10, [#allocation6], %s4557_s17, %s4557_s17, %s4558_s18  }
  0x2b   : > { %s4676_s26 = sadd.s32 1, %s4551_s24   ;;  %s30_s7 = sadd.s32 1, %s4547_s23 }
  0x2c   : > { %s27_s30 = ssub.s32 %s4551_s24, %s4676_s26  ;;  %p37_p2 = scmp.ne.s32.totalorder %s4547_s23, %s4543_s22 }
  0x2d   : > { %p28_p1 = scmp.eq.s32.totalorder %s27_s30, 0  ;;  %p38_p6 = scmp.eq.s32.totalorder %s4551_s24, 0 }
  0x2e   : > { %p6527_p3 = scmp.eq.s32.totalorder %s4625_s25, 1  ;;  %p4009_p9 = scmp.lt.s32.totalorder %s4551_s24, 2 }
  0x2f   : > { %s4685_s9 = scalar_select %p28_p1, %s4547_s23, %s30_s7  }
  0x30   : > { %p39_p12 = por %p38_p6, %p37_p2  ;;  %p4689_p7 = por %p6527_p3, %p37_p2 }
  0x31   : > { %s233_s8 = sand.u32 1, %s4547_s23   ;;  %s3450_s10 = sshll.u32 %s4551_s24, 11 }
  0x32   : > { %s6528_s11 = scalar_select %p4689_p7, 1, 0 }
  0x33   : > { %s3370_s12 = sshll.u32 %s233_s8, 7  ;;  %s4699_s15 = scalar_lea.hbm %s6447_s0, %s3450_s10 }
  0x34   : > { %s237_s16 = scalar_lea.vmem [#allocation2], %s3370_s12  ;;  %p4703_p11 = pnand %p4009_p9, %p39_p12 }
  0x35   : > { %s244_s17 = sshll.u32 %s237_s16, 4  ;;  %s4707_s19 = scalar_lea.sflag [#allocation3], %s233_s8  ;;  %s4701_s17 = int_to_ptr.vmem [resolvable:$true] %s244_s17 }
  0x36   : > { %s4455_s20 = scalar_lea.hbm %s4699_s15, 2048  ;;  %p4457_p0 = pneg %p4703_p11 }
  0x37   : > { %p4456_p13 = scmp.ne.s32.totalorder %s4699_s15, %s4455_s20  ;;  %s4460_s12 = scalar_lea.hbm %s6447_s0, 4096 }
  0x38   : > { %p4461_p1 = scmp.lt.s32.totalorder %s4699_s15, %s6447_s0  ;;  %p4462_p2 = scmp.lt.s32.totalorder %s4460_s12, %s4455_s20 }
  0x39   : > { %p4458_p5 = pnand %p4457_p0, %p4456_p13 }
  0x3a   : > { %p4463_p6 = por %p4462_p2, %p4461_p1 }
  0x3b   : > { %p4459_p10 = pneg %p4458_p5 }
  0x3d   : > { %p4464_p12 = pnand %p4463_p6, %p4459_p10 }
  0x3f   : > { %4467 = shalt.err (!%p4464_p12)
}
  0x40   : > { %s4468_s8 = scalar_lea.vmem %s4701_s17, 2048  ;;  %s4559_s14 = smov [#allocation2]  }
  0x41   : > { %p4469_p3 = scmp.ne.s32.totalorder %s4701_s17, %s4468_s8  ;;  %s4473_s16 = sshll.u32 %s4559_s14, 4  ;;  %s4474_s16 = int_to_ptr.vmem [resolvable:$false] %s4473_s16 }
  0x42   : > { %s4475_s30 = scalar_lea.vmem %s4474_s16, 4096  ;;  %p4476_p5 = scmp.lt.s32.totalorder %s4701_s17, %s4474_s16 }
  0x43   : > { %p4471_p9 = pnand %p4469_p3, %p4457_p0  ;;  %p4477_p7 = scmp.lt.s32.totalorder %s4475_s30, %s4468_s8 }
  0x45   : > { %p4472_p13 = pneg %p4471_p9  ;;  %p4478_p4 = por %p4477_p7, %p4476_p5 }
  0x47   : > { %p4479_p8 = pnand %p4478_p4, %p4472_p13 }
  0x49   : > { %4482 = shalt.err (!%p4479_p8)
}
  0x4a   : > { %s4560_s20 = smov 128   ;;  %s4561_s7 = smov 8  }
  0x4b   : > { %4002 = dma.hbm_to_vmem [thread:$0]  (!%p4703_p11), %s4699_s15, 2048, %s4701_s17, %s4707_s19, %s4560_s20, %s4560_s20, %s4561_s7  }
  0x4c   : > { %p6530_p0 = scmp.ne.s32.totalorder %s6525_s29, 0 }
  0x4e   : > { %256 = sbr.rel (%p6530_p0) target bundleno = 3681 (0xe61), region = 44 }
  0x53   : > { %s4731_s12 = sand.u32 1, %s4543_s22   ;;  %p6531_p4 = scmp.ne.s32.totalorder %s6523_s27, 0 }
  0x54   : > { %s3374_s10 = sshll.u32 %s4731_s12, 7  ;;  %s259_s13 = scalar_lea.sflag [#allocation3], %s4731_s12 }
  0x55   : > { %s4737_s8 = scalar_lea.vmem [#allocation2], %s3374_s10 }
  0x56   : > { %4526 = dma.done.wait (%p6531_p4), %s259_s13, 2048  }
  0x57   : > { %4528 = vsyncadd (%p6531_p4), %s259_s13, 4294965248  ;;  %p6532_p8 = scmp.eq.s32.totalorder %s4625_s25, 0 }
  0x59   : > { %4530 = dma.done.wait (%p6532_p8), [#allocation6], 4096   ;;  %p6533_p7 = pmov %p6532_p8 }
  0x5a   : > { %v300_v0 = vld [vmem:[%s4737_s8] sm:$0xff]  ;;  %v302_v1 = vld [vmem:[%s4737_s8 + $0x10] sm:$0xff]  ;;  %v301_v2 = vld [vmem:[%s4737_s8 + $0x8] sm:$0xff]  ;;  %vm976_vm0 = vcmask 261120   ;;  %s4563_s18 = smov 96   ;;  %s4564_s19 = smov 64  }
  0x5b   : > { %4532 = vsyncadd (%p6533_p7), [#allocation6], 4294963200  ;;  %318 = vadd.xlane.f32.xlu0 %v300_v0  ;;  %322 = vadd.xlane.f32.xlu1 %v302_v1  ;;  %v303_v3 = vld [vmem:[%s4737_s8 + $0x18] sm:$0xff]  ;;  %v304_v4 = vld [vmem:[%s4737_s8 + $0x20] sm:$0xff]  ;;  %s4565_s14 = smov 32   ;;  %s6350_s20 = scalar_lea.vmem [#allocation8], %s3374_s10 }
  0x5c   : > { %v305_v5 = vld [vmem:[%s4737_s8 + $0x28] sm:$0xff]  ;;  %v306_v6 = vld [vmem:[%s4737_s8 + $0x30] sm:$0xff]  ;;  %v307_v7 = vld [vmem:[%s4737_s8 + $0x38] sm:$0xff]  ;;  %s3451_s7 = sshll.u32 %s4625_s25, 11  ;;  %s3273_s10 = sshll.u32 %s6350_s20, 4  ;;  %s6401_s10 = int_to_ptr.vmem [resolvable:$true] %s3273_s10 }
  0x5d   : > { %v4756_v8 = vld [vmem:[%s4737_s8 + $0x40] sm:$0xff]  ;;  %v4759_v9 = vld [vmem:[%s4737_s8 + $0x48] sm:$0xff]  ;;  %v4762_v10 = vld [vmem:[%s4737_s8 + $0x50] sm:$0xff]  ;;  %s6399_s29 = scalar_lea.hbm %s6453_s6, %s3451_s7  ;;  %s3260_s25 = scalar_lea.sflag [#allocation4], %s4731_s12 }
  0x5e   : > { %v4765_v11 = vld [vmem:[%s4737_s8 + $0x58] sm:$0xff]  ;;  %v4772_v12 = vld [vmem:[%s4737_s8 + $0x60] sm:$0xff]  ;;  %v4775_v13 = vld [vmem:[%s4737_s8 + $0x68] sm:$0xff]  ;;  %s4483_s15 = scalar_lea.vmem %s6401_s10, 2048  ;;  %p6662_p10 = scmp.ne.s32.totalorder %s6528_s11, 0 }
  0x5f   : > { %320 = vadd.xlane.f32.xlu0 %v301_v2  ;;  %324 = vadd.xlane.f32.xlu1 %v303_v3  ;;  %v4780_v14 = vld [vmem:[%s4737_s8 + $0x70] sm:$0xff]  ;;  %v4783_v15 = vld [vmem:[%s4737_s8 + $0x78] sm:$0xff]  ;;  %p4484_p11 = scmp.ne.s32.totalorder %s6401_s10, %s4483_s15 }
  0x60   : > { %v4059_v16 = vld [vmem:[#allocation5 + $0xac] ss:$12 sps:$4 sm:$0xff]   ;;  %v4061_v17 = vld [vmem:[#allocation5 + $0xa8] ss:$12 sps:$4 sm:$0xff]   ;;  %v4064_v54 = vld [vmem:[#allocation5 + $0xb0] ss:$12 sps:$4 sm:$0xff]  }
  0x61   : > { %707 = vmatprep.subr.bf16.mxu0 %v4059_v16  ;;  %v4062_v53 = vld [vmem:[#allocation5 + $0x94] ss:$12 sps:$4 sm:$0xff]   ;;  %v4065_v55 = vld [vmem:[#allocation5 + $0x90] ss:$12 sps:$4 sm:$0xff]   ;;  %3612 = vmatprep.subr.bf16.mxu1 %v4064_v54  ;;  %p4485_p1 = pnand %p4484_p11, %p6662_p10 }
  0x62   : > { %708 = vmatpush1.bf16.msra.mxu0 %v4061_v17  ;;  %3613 = vmatpush3.bf16.msra.mxu1 %v4064_v54  ;;  %v4070_v17 = vld [vmem:[#allocation5 + $0x64] ss:$12 sps:$4 sm:$0xff]  }
  0x63   : > { %326 = vadd.xlane.f32.xlu0 %v304_v4  ;;  %328 = vadd.xlane.f32.xlu1 %v305_v5  ;;  %p4486_p2 = pneg %p4485_p1 }
  0x64   : > { %709 = vmatprep.subr.bf16.mxu0 %v4062_v53 }
  0x66   : > { %710 = vmatpush1.bf16.msra.mxu0 %v4065_v55 }
  0x67   : > { %330 = vadd.xlane.f32.xlu0 %v306_v6  ;;  %332 = vadd.xlane.f32.xlu1 %v307_v7 }
  0x6b   : > { %334 = vadd.xlane.f32.xlu0 %v4756_v8  ;;  %336 = vadd.xlane.f32.xlu1 %v4759_v9 }
  0x6f   : > { %338 = vadd.xlane.f32.xlu0 %v4762_v10  ;;  %340 = vadd.xlane.f32.xlu1 %v4765_v11 }
  0x73   : > { %342 = vadd.xlane.f32.xlu0 %v4772_v12  ;;  %344 = vadd.xlane.f32.xlu1 %v4775_v13 }
  0x77   : > { %346 = vadd.xlane.f32.xlu0 %v4780_v14  ;;  %348 = vadd.xlane.f32.xlu1 %v4783_v15 }
  0xe4   : > { %v319_v18 = vpop.xlane.xlu0 %318  ;;  %v323_v19 = vpop.xlane.xlu1 %322 }
  0xe5   : > { %v351_v20 = vmul.f32 0.0078125, %v319_v18  ;;  %v353_v21 = vmul.f32 0.0078125, %v323_v19  ;;  %v4072_v18 = vld [vmem:[#allocation5 + $0x80] ss:$12 sps:$4 sm:$0xff]  }
  0xe7   : > { %v4787_v22 = vsub.f32 %v300_v0, %v351_v20  ;;  %v4789_v23 = vsub.f32 %v302_v1, %v353_v21  ;;  %v4066_v0 = vld [vmem:[#allocation5 + $0x7c] ss:$12 sps:$4 sm:$0xff]   ;;  %v4068_v1 = vld [vmem:[#allocation5 + $0x98] ss:$12 sps:$4 sm:$0xff]   ;;  %v4073_v20 = vld [vmem:[#allocation5 + $0x60] ss:$12 sps:$4 sm:$0xff]  }
  0xe8   : > { %v321_v24 = vpop.xlane.xlu0 %320  ;;  %v325_v25 = vpop.xlane.xlu1 %324  ;;  %711 = vmatprep.subr.bf16.mxu0 %v4066_v0  ;;  %3614 = vmatprep.subr.bf16.mxu1 %v4068_v1 }
  0xe9   : > { %v352_v26 = vmul.f32 0.0078125, %v321_v24  ;;  %v383_v27 = vmul.f32 %v4787_v22, %v4787_v22  ;;  %v354_v28 = vmul.f32 0.0078125, %v325_v25  ;;  %v385_v29 = vmul.f32 %v4789_v23, %v4789_v23  ;;  %3615 = vmatpush3.bf16.msra.mxu1 %v4068_v1 }
  0xea   : > { %3616 = vmatprep.subr.bf16.mxu1 %v4072_v18 }
  0xeb   : > { %399 = vadd.xlane.f32.xlu0 %v383_v27  ;;  %v4795_v30 = vsub.f32 %v301_v2, %v352_v26  ;;  %v4797_v31 = vsub.f32 %v303_v3, %v354_v28  ;;  %v4074_v28 = vld [vmem:[#allocation5 + $0x4c] ss:$12 sps:$4 sm:$0xff]  }
  0xec   : > { %v327_v32 = vpop.xlane.xlu0 %326  ;;  %v329_v33 = vpop.xlane.xlu1 %328 }
  0xed   : > { %v355_v34 = vmul.f32 0.0078125, %v327_v32  ;;  %v384_v35 = vmul.f32 %v4795_v30, %v4795_v30  ;;  %v356_v36 = vmul.f32 0.0078125, %v329_v33  ;;  %v386_v37 = vmul.f32 %v4797_v31, %v4797_v31  ;;  %3617 = vmatpush3.bf16.msra.mxu1 %v4072_v18  ;;  %v4077_v33 = vld [vmem:[#allocation5 + $0x48] ss:$12 sps:$4 sm:$0xff]  }
  0xef   : > { %403 = vadd.xlane.f32.xlu0 %v385_v29  ;;  %401 = vadd.xlane.f32.xlu1 %v384_v35  ;;  %v4803_v38 = vsub.f32 %v304_v4, %v355_v34  ;;  %v4805_v39 = vsub.f32 %v305_v5, %v356_v36  ;;  %v4069_v5 = vld [vmem:[#allocation5 + $0x78] ss:$12 sps:$4 sm:$0xff]   ;;  %v4076_v29 = vld [vmem:[#allocation5 + $0x68] ss:$12 sps:$4 sm:$0xff]   ;;  %v4080_v36 = vld [vmem:[#allocation5 + $0x50] ss:$12 sps:$4 sm:$0xff]  }
  0xf0   : > { %v331_v40 = vpop.xlane.xlu0 %330  ;;  %v333_v41 = vpop.xlane.xlu1 %332  ;;  %712 = vmatpush1.bf16.msra.mxu0 %v4069_v5  ;;  %3618 = vmatprep.subr.bf16.mxu1 %v4076_v29  ;;  %v4078_v35 = vld [vmem:[#allocation5 + $0x34] ss:$12 sps:$4 sm:$0xff]  }
  0xf1   : > { %v357_v42 = vmul.f32 0.0078125, %v331_v40  ;;  %v387_v43 = vmul.f32 %v4803_v38, %v4803_v38  ;;  %v358_v44 = vmul.f32 0.0078125, %v333_v41  ;;  %v388_v45 = vmul.f32 %v4805_v39, %v4805_v39  ;;  %713 = vmatprep.subr.bf16.mxu0 %v4070_v17  ;;  %3619 = vmatpush3.bf16.msra.mxu1 %v4076_v29  ;;  %v4084_v40 = vld [vmem:[#allocation5 + $0x38] ss:$12 sps:$4 sm:$0xff]  }
  0xf2   : > { %3620 = vmatprep.subr.bf16.mxu1 %v4080_v36  ;;  %v4085_v41 = vld [vmem:[#allocation5 + $0x18] ss:$12 sps:$4 sm:$0xff]  }
  0xf3   : > { %405 = vadd.xlane.f32.xlu1 %v386_v37  ;;  %407 = vadd.xlane.f32.xlu0 %v387_v43  ;;  %v4811_v46 = vsub.f32 %v306_v6, %v357_v42  ;;  %v4813_v47 = vsub.f32 %v307_v7, %v358_v44  ;;  %v4086_v42 = vld [vmem:[#allocation5 + $0x4] ss:$12 sps:$4 sm:$0xff]   ;;  %v4088_v43 = vld [vmem:[#allocation5 + $0x20] ss:$12 sps:$4 sm:$0xff]  }
  0xf4   : > { %v335_v48 = vpop.xlane.xlu0 %334  ;;  %v337_v49 = vpop.xlane.xlu1 %336  ;;  %714 = vmatpush1.bf16.msra.mxu0 %v4073_v20  ;;  %v4089_v44 = vld [vmem:[#allocation5] ss:$12 sps:$4 sm:$0xff]  }
  0xf5   : > { %v359_v50 = vmul.f32 0.0078125, %v335_v48  ;;  %v389_v51 = vmul.f32 %v4811_v46, %v4811_v46  ;;  %v360_v52 = vmul.f32 0.0078125, %v337_v49  ;;  %v390_v56 = vmul.f32 %v4813_v47, %v4813_v47  ;;  %715 = vmatprep.subr.bf16.mxu0 %v4074_v28  ;;  %3621 = vmatpush3.bf16.msra.mxu1 %v4080_v36 }
  0xf6   : > { %3622 = vmatprep.subr.bf16.mxu1 %v4084_v40  ;;  %v4562_v48 = vmov 0  }
  0xf7   : > { %409 = vadd.xlane.f32.xlu1 %v388_v45  ;;  %411 = vadd.xlane.f32.xlu0 %v389_v51  ;;  %v4820_v57 = vsub.f32 %v4756_v8, %v359_v50  ;;  %v4823_v58 = vsub.f32 %v4759_v9, %v360_v52  ;;  %v4090_v45 = vld [vmem:[#allocation5 + $0x8] ss:$12 sps:$4 sm:$0xff]  }
  0xf8   : > { %v339_v59 = vpop.xlane.xlu0 %338  ;;  %v341_v60 = vpop.xlane.xlu1 %340  ;;  %716 = vmatpush1.bf16.msra.mxu0 %v4077_v33  ;;  %739 = vmatprep.mubr.bf16.mxu0 %v4562_v48 }
  0xf9   : > { %v361_v61 = vmul.f32 0.0078125, %v339_v59  ;;  %v391_v62 = vmul.f32 %v4820_v57, %v4820_v57  ;;  %v362_v63 = vmul.f32 0.0078125, %v341_v60  ;;  %v392_v2 = vmul.f32 %v4823_v58, %v4823_v58  ;;  %717 = vmatprep.subr.bf16.mxu0 %v4078_v35  ;;  %3623 = vmatpush3.bf16.msra.mxu1 %v4084_v40 }
  0xfa   : > { %3624 = vmatprep.subr.bf16.mxu1 %v4088_v43 }
  0xfb   : > { %413 = vadd.xlane.f32.xlu1 %v390_v56  ;;  %415 = vadd.xlane.f32.xlu0 %v391_v62  ;;  %v4830_v3 = vsub.f32 %v4762_v10, %v361_v61  ;;  %v4833_v4 = vsub.f32 %v4765_v11, %v362_v63 }
  0xfc   : > { %v343_v6 = vpop.xlane.xlu0 %342  ;;  %v345_v7 = vpop.xlane.xlu1 %344 }
  0xfd   : > { %v363_v8 = vmul.f32 0.0078125, %v343_v6  ;;  %v393_v9 = vmul.f32 %v4830_v3, %v4830_v3  ;;  %v364_v16 = vmul.f32 0.0078125, %v345_v7  ;;  %v394_v10 = vmul.f32 %v4833_v4, %v4833_v4  ;;  %3625 = vmatpush3.bf16.msra.mxu1 %v4088_v43 }
  0xfe   : > { %3626 = vmatprep.subr.bf16.mxu1 %v4090_v45 }
  0xff   : > { %417 = vadd.xlane.f32.xlu1 %v392_v2  ;;  %419 = vadd.xlane.f32.xlu0 %v393_v9  ;;  %v4840_v11 = vsub.f32 %v4772_v12, %v363_v8  ;;  %v4843_v19 = vsub.f32 %v4775_v13, %v364_v16 }
 0x100   : > { %v347_v21 = vpop.xlane.xlu0 %346  ;;  %v349_v24 = vpop.xlane.xlu1 %348 }
 0x101   : > { %v365_v25 = vmul.f32 0.0078125, %v347_v21  ;;  %v395_v26 = vmul.f32 %v4840_v11, %v4840_v11  ;;  %v366_v27 = vmul.f32 0.0078125, %v349_v24  ;;  %v396_v12 = vmul.f32 %v4843_v19, %v4843_v19  ;;  %3627 = vmatpush3.bf16.msra.mxu1 %v4090_v45 }
 0x103   : > { %421 = vadd.xlane.f32.xlu1 %v394_v10  ;;  %423 = vadd.xlane.f32.xlu0 %v395_v26  ;;  %v4850_v13 = vsub.f32 %v4780_v14, %v365_v25  ;;  %v4853_v32 = vsub.f32 %v4783_v15, %v366_v27  ;;  %v4081_v14 = vld [vmem:[#allocation5 + $0x30] ss:$12 sps:$4 sm:$0xff]   ;;  %v4863_v25 = vld [vmem:[%s6448_s1] ss:$0 sm:$0xff] }
 0x104   : > { %718 = vmatpush1.bf16.msra.mxu0 %v4081_v14  ;;  %v4082_v15 = vld [vmem:[#allocation5 + $0x1c] ss:$12 sps:$4 sm:$0xff]   ;;  %v4870_v14 = vld [vmem:[%s6449_s2] ss:$0 sm:$0xff] }
 0x105   : > { %v397_v34 = vmul.f32 %v4850_v13, %v4850_v13  ;;  %v398_v37 = vmul.f32 %v4853_v32, %v4853_v32  ;;  %719 = vmatprep.subr.bf16.mxu0 %v4082_v15 }
 0x107   : > { %425 = vadd.xlane.f32.xlu1 %v396_v12  ;;  %427 = vadd.xlane.f32.xlu0 %v397_v34 }
 0x108   : > { %720 = vmatpush1.bf16.msra.mxu0 %v4085_v41 }
 0x109   : > { %721 = vmatprep.subr.bf16.mxu0 %v4086_v42 }
 0x10b   : > { %429 = vadd.xlane.f32.xlu1 %v398_v37 }
 0x10c   : > { %722 = vmatpush1.bf16.msra.mxu0 %v4089_v44 }
 0x174   : > { %v400_v49 = vpop.xlane.xlu0 %399 }
 0x175   : > { %v431_v50 = vmul.f32 0.0078125, %v400_v49 }
 0x177   : > { %v447_v51 = vadd.f32 1e-05, %v431_v50 }
 0x178   : > { %v402_v52 = vpop.xlane.xlu1 %401  ;;  %v404_v53 = vpop.xlane.xlu0 %403 }
 0x179   : > { %4099 = vrsqrt.f32 %v447_v51  ;;  %v432_v54 = vmul.f32 0.0078125, %v402_v52  ;;  %v433_v55 = vmul.f32 0.0078125, %v404_v53 }
 0x17b   : > { %v448_v56 = vadd.f32 1e-05, %v432_v54  ;;  %v449_v59 = vadd.f32 1e-05, %v433_v55 }
 0x17c   : > { %v406_v60 = vpop.xlane.xlu1 %405  ;;  %v408_v61 = vpop.xlane.xlu0 %407 }
 0x17d   : > { %4101 = vrsqrt.f32 %v448_v56  ;;  %v434_v62 = vmul.f32 0.0078125, %v406_v60  ;;  %v435_v63 = vmul.f32 0.0078125, %v408_v61 }
 0x17e   : > { %4103 = vrsqrt.f32 %v449_v59 }
 0x17f   : > { %v450_v0 = vadd.f32 1e-05, %v434_v62  ;;  %v451_v1 = vadd.f32 1e-05, %v435_v63 }
 0x180   : > { %v410_v2 = vpop.xlane.xlu1 %409  ;;  %v412_v5 = vpop.xlane.xlu0 %411 }
 0x181   : > { %4105 = vrsqrt.f32 %v450_v0  ;;  %v436_v6 = vmul.f32 0.0078125, %v410_v2  ;;  %v437_v7 = vmul.f32 0.0078125, %v412_v5 }
 0x182   : > { %4107 = vrsqrt.f32 %v451_v1 }
 0x183   : > { %v452_v8 = vadd.f32 1e-05, %v436_v6  ;;  %v453_v9 = vadd.f32 1e-05, %v437_v7 }
 0x184   : > { %v414_v16 = vpop.xlane.xlu1 %413  ;;  %v416_v17 = vpop.xlane.xlu0 %415 }
 0x185   : > { %4109 = vrsqrt.f32 %v452_v8  ;;  %v438_v18 = vmul.f32 0.0078125, %v414_v16  ;;  %v439_v10 = vmul.f32 0.0078125, %v416_v17 }
 0x186   : > { %v4100_v20 = vpop.eup %4099  ;;  %4111 = vrsqrt.f32 %v453_v9 }
 0x187   : > { %v454_v21 = vadd.f32 1e-05, %v438_v18  ;;  %v455_v24 = vadd.f32 1e-05, %v439_v10  ;;  %v479_v26 = vmul.f32 %v4100_v20, %v4787_v22 }
 0x188   : > { %v418_v27 = vpop.xlane.xlu1 %417  ;;  %v420_v28 = vpop.xlane.xlu0 %419 }
 0x189   : > { %4113 = vrsqrt.f32 %v454_v21  ;;  %v440_v29 = vmul.f32 0.0078125, %v418_v27  ;;  %v441_v12 = vmul.f32 0.0078125, %v420_v28  ;;  %v501_v34 = vmul.f32 %v4863_v25, %v479_v26 }
 0x18a   : > { %v4102_v33 = vpop.eup %4101  ;;  %4115 = vrsqrt.f32 %v455_v24 }
 0x18b   : > { %v4104_v35 = vpop.eup %4103  ;;  %v456_v36 = vadd.f32 1e-05, %v440_v29  ;;  %v457_v37 = vadd.f32 1e-05, %v441_v12  ;;  %v480_v15 = vmul.f32 %v4102_v33, %v4795_v30  ;;  %v523_v49 = vadd.f32 %v4870_v14, %v501_v34 }
 0x18c   : > { %v422_v22 = vpop.xlane.xlu1 %421  ;;  %v424_v40 = vpop.xlane.xlu0 %423  ;;  %v481_v41 = vmul.f32 %v4104_v35, %v4789_v23 }
 0x18d   : > { %4117 = vrsqrt.f32 %v456_v36  ;;  %v442_v42 = vmul.f32 0.0078125, %v422_v22  ;;  %v443_v43 = vmul.f32 0.0078125, %v424_v40  ;;  %v502_v44 = vmul.f32 %v4863_v25, %v480_v15 }
 0x18e   : > { %v4106_v45 = vpop.eup %4105  ;;  %4119 = vrsqrt.f32 %v457_v37  ;;  %v503_v23 = vmul.f32 %v4863_v25, %v481_v41 }
 0x18f   : > { %v4108_v50 = vpop.eup %4107  ;;  %v458_v51 = vadd.f32 1e-05, %v442_v42  ;;  %v459_v52 = vadd.f32 1e-05, %v443_v43  ;;  %v524_v53 = vadd.f32 %v4870_v14, %v502_v44  ;;  %v482_v30 = vmul.f32 %v4106_v45, %v4797_v31 }
 0x190   : > { %v426_v54 = vpop.xlane.xlu1 %425  ;;  %v428_v55 = vpop.xlane.xlu0 %427  ;;  %v483_v56 = vmul.f32 %v4108_v50, %v4803_v38  ;;  %v525_v38 = vadd.f32 %v4870_v14, %v503_v23 }
 0x191   : > { %4121 = vrsqrt.f32 %v458_v51  ;;  %v444_v59 = vmul.f32 0.0078125, %v426_v54  ;;  %v445_v60 = vmul.f32 0.0078125, %v428_v55  ;;  %v539_v61 = vpack.c.bf16 %v524_v53, %v523_v49 }
 0x192   : > { %v4110_v62 = vpop.eup %4109  ;;  %4123 = vrsqrt.f32 %v459_v52  ;;  %v504_v63 = vmul.f32 %v4863_v25, %v482_v30  ;;  %v505_v5 = vmul.f32 %v4863_v25, %v483_v56 }
 0x193   : > { %v4112_v0 = vpop.eup %4111  ;;  %v460_v1 = vadd.f32 1e-05, %v444_v59  ;;  %v461_v2 = vadd.f32 1e-05, %v445_v60  ;;  %740 = vmatmul.mubr.bf16.vlgmr.msra.gmra.mxu0 %v539_v61  ;;  %3628 = vmatprep.mubr.bf16.mxu1 %v539_v61  ;;  %v484_v31 = vmul.f32 %v4110_v62, %v4805_v39 }
 0x194   : > { %v430_v6 = vpop.xlane.xlu1 %429  ;;  %v526_v7 = vadd.f32 %v4870_v14, %v504_v63  ;;  %749 = vmatprep.mubr.bf16.mxu0 %v4562_v48  ;;  %v485_v8 = vmul.f32 %v4112_v0, %v4811_v46  ;;  %v527_v21 = vadd.f32 %v4870_v14, %v505_v5 }
 0x195   : > { %4125 = vrsqrt.f32 %v460_v1  ;;  %v446_v9 = vmul.f32 0.0078125, %v430_v6  ;;  %v506_v16 = vmul.f32 %v4863_v25, %v484_v31 }
 0x196   : > { %v4114_v17 = vpop.eup %4113  ;;  %4127 = vrsqrt.f32 %v461_v2  ;;  %v540_v18 = vpack.c.bf16 %v526_v7, %v525_v38  ;;  %v507_v39 = vmul.f32 %v4863_v25, %v485_v8 }
 0x197   : > { %v4116_v10 = vpop.eup %4115  ;;  %v462_v20 = vadd.f32 1e-05, %v446_v9  ;;  %v528_v24 = vadd.f32 %v4870_v14, %v506_v16  ;;  %v486_v26 = vmul.f32 %v4114_v17, %v4813_v47 }
 0x198   : > { %3629 = vmatmul.mubr.bf16.vlgmr.msra.gmra.mxu1 %v540_v18  ;;  %v487_v46 = vmul.f32 %v4116_v10, %v4820_v57  ;;  %v529_v12 = vadd.f32 %v4870_v14, %v507_v39 }
 0x199   : > { %4129 = vrsqrt.f32 %v462_v20  ;;  %v541_v27 = vpack.c.bf16 %v528_v24, %v527_v21  ;;  %v508_v28 = vmul.f32 %v4863_v25, %v486_v26 }
 0x19a   : > { %v4118_v29 = vpop.eup %4117  ;;  %v509_v36 = vmul.f32 %v4863_v25, %v487_v46 }
 0x19b   : > { %v4120_v33 = vpop.eup %4119  ;;  %750 = vmatmul.mubr.bf16.gmra.mxu0 %v540_v18  ;;  %3632 = vmatprep.mubr.bf16.mxu1 %v541_v27  ;;  %v530_v34 = vadd.f32 %v4870_v14, %v508_v28  ;;  %v488_v35 = vmul.f32 %v4118_v29, %v4823_v58 }
 0x19c   : > { %759 = vmatprep.mubr.bf16.mxu0 %v4562_v48  ;;  %v489_v47 = vmul.f32 %v4120_v33, %v4830_v3  ;;  %v531_v41 = vadd.f32 %v4870_v14, %v509_v36 }
 0x19d   : > { %v542_v57 = vpack.c.bf16 %v530_v34, %v529_v12  ;;  %v510_v37 = vmul.f32 %v4863_v25, %v488_v35 }
 0x19e   : > { %v4122_v15 = vpop.eup %4121  ;;  %v511_v22 = vmul.f32 %v4863_v25, %v489_v47 }
 0x19f   : > { %v4124_v40 = vpop.eup %4123  ;;  %v532_v42 = vadd.f32 %v4870_v14, %v510_v37  ;;  %v490_v43 = vmul.f32 %v4122_v15, %v4833_v4 }
 0x1a0   : > { %3633 = vmatmul.mubr.bf16.gmra.mxu1 %v542_v57  ;;  %v491_v58 = vmul.f32 %v4124_v40, %v4840_v11  ;;  %v533_v49 = vadd.f32 %v4870_v14, %v511_v22 }
 0x1a1   : > { %v543_v44 = vpack.c.bf16 %v532_v42, %v531_v41  ;;  %v512_v45 = vmul.f32 %v4863_v25, %v490_v43 }
 0x1a2   : > { %v4126_v3 = vpop.eup %4125  ;;  %v513_v53 = vmul.f32 %v4863_v25, %v491_v58 }
 0x1a3   : > { %v4128_v50 = vpop.eup %4127  ;;  %760 = vmatmul.mubr.bf16.gmra.mxu0 %v541_v27  ;;  %3636 = vmatprep.mubr.bf16.mxu1 %v543_v44  ;;  %v534_v51 = vadd.f32 %v4870_v14, %v512_v45  ;;  %v492_v52 = vmul.f32 %v4126_v3, %v4843_v19 }
 0x1a4   : > { %769 = vmatprep.mubr.bf16.mxu0 %v4562_v48  ;;  %v493_v4 = vmul.f32 %v4128_v50, %v4850_v13  ;;  %v535_v55 = vadd.f32 %v4870_v14, %v513_v53 }
 0x1a5   : > { %v544_v11 = vpack.c.bf16 %v534_v51, %v533_v49  ;;  %v514_v30 = vmul.f32 %v4863_v25, %v492_v52 }
 0x1a6   : > { %v4130_v54 = vpop.eup %4129  ;;  %v515_v59 = vmul.f32 %v4863_v25, %v493_v4 }
 0x1a7   : > { %v536_v23 = vadd.f32 %v4870_v14, %v514_v30  ;;  %v494_v56 = vmul.f32 %v4130_v54, %v4853_v32 }
 0x1a8   : > { %3637 = vmatmul.mubr.bf16.gmra.mxu1 %v544_v11  ;;  %v537_v13 = vadd.f32 %v4870_v14, %v515_v59 }
 0x1a9   : > { %v545_v19 = vpack.c.bf16 %v536_v23, %v535_v55  ;;  %v516_v60 = vmul.f32 %v4863_v25, %v494_v56 }
 0x1ab   : > { %770 = vmatmul.mubr.bf16.gmra.mxu0 %v542_v57  ;;  %3640 = vmatprep.mubr.bf16.mxu1 %v545_v19  ;;  %v538_v61 = vadd.f32 %v4870_v14, %v516_v60 }
 0x1ac   : > { %779 = vmatprep.mubr.bf16.mxu0 %v4562_v48 }
 0x1ad   : > { %v546_v62 = vpack.c.bf16 %v538_v61, %v537_v13 }
 0x1b0   : > { %3641 = vmatmul.mubr.bf16.gmra.mxu1 %v546_v62 }
 0x1b3   : > { %780 = vmatmul.mubr.bf16.gmra.mxu0 %v543_v44 }
 0x1b4   : > { %789 = vmatprep.mubr.bf16.mxu0 %v4562_v48 }
 0x1bb   : > { %790 = vmatmul.mubr.bf16.gmra.mxu0 %v544_v11 }
 0x1bc   : > { %799 = vmatprep.mubr.bf16.mxu0 %v4562_v48 }
 0x1c3   : > { %800 = vmatmul.mubr.bf16.gmra.mxu0 %v545_v19 }
 0x1c4   : > { %809 = vmatprep.mubr.bf16.mxu0 %v4562_v48 }
 0x1cb   : > { %810 = vmatmul.mubr.bf16.gmra.mxu0 %v546_v62 }
 0x253   : > { %v741_v32 = vpop.f32.mrf.mxu0 }
 0x255   : > { %v743_v25 = vpop.f32.mrf.mxu0 }
 0x257   : > { %v745_v63 = vpop.f32.mrf.mxu0 }
 0x258   : > { %v4925_v0 = vpack.c.bf16 %v745_v63, %v741_v32  ;;  %v4927_v14 = vpop.f32.mrf.mxu1 }
 0x259   : > { %v747_v1 = vpop.f32.mrf.mxu0 }
 0x25a   : > { %v4929_v2 = vpack.c.bf16 %v747_v1, %v743_v25  ;;  %v4931_v31 = vpop.f32.mrf.mxu1  ;;  %3660 = vmatprep.mubr.msk.bf16.mxu0 %vm976_vm0, %v4925_v0 }
 0x25b   : > { %v751_v5 = vpop.f32.mrf.mxu0 }
 0x25c   : > { %v4935_v6 = vpop.f32.mrf.mxu1 }
 0x25d   : > { %v753_v48 = vpop.f32.mrf.mxu0  ;;  %v4986_v13 = vpack.c.bf16 %v4935_v6, %v4927_v14 }
 0x25e   : > { %v4937_v38 = vpop.f32.mrf.mxu1 }
 0x25f   : > { %v755_v7 = vpop.f32.mrf.mxu0  ;;  %6537 = vst [vmem:[#allocation15_spill] sm:$0xff] %v4986_v13  ;;  %v4994_v32 = vpack.c.bf16 %v4937_v38, %v4931_v31 }
 0x260   : > { %v4939_v8 = vpack.c.bf16 %v755_v7, %v751_v5  ;;  %v3634_v9 = vpop.f32.mrf.mxu1 }
 0x261   : > { %v757_v16 = vpop.f32.mrf.mxu0  ;;  %6538 = vst [vmem:[#allocation16_spill] sm:$0xff] %v4994_v32 }
 0x262   : > { %v4941_v17 = vpack.c.bf16 %v757_v16, %v753_v48  ;;  %v870_v18 = vpop.f32.mrf.mxu1 }
 0x263   : > { %v761_v39 = vpop.f32.mrf.mxu0 }
 0x264   : > { %v3635_v10 = vpop.f32.mrf.mxu1 }
 0x265   : > { %v763_v20 = vpop.f32.mrf.mxu0  ;;  %v4972_v30 = vpack.c.bf16 %v3635_v10, %v3634_v9  ;;  %v1002_v10 = vsel %vm976_vm0, %v4929_v2, 0 }
 0x266   : > { %v873_v21 = vpop.f32.mrf.mxu1 }
 0x267   : > { %v765_v24 = vpop.f32.mrf.mxu0  ;;  %v4976_v23 = vpack.c.bf16 %v873_v21, %v870_v18  ;;  %v917_v21 = vlaneseq }
 0x268   : > { %v4943_v26 = vpack.c.bf16 %v765_v24, %v761_v39  ;;  %v3638_v46 = vpop.f32.mrf.mxu1  ;;  %v1005_v39 = vsel %vm976_vm0, %v4941_v17, 0 }
 0x269   : > { %v767_v27 = vpop.f32.mrf.mxu0  ;;  %6535 = vst [vmem:[#allocation13_spill] sm:$0xff] %v4976_v23  ;;  %v5063_v24 = vshrl.u32 %v917_v21, 7 }
 0x26a   : > { %v4945_v28 = vpack.c.bf16 %v767_v27, %v763_v20  ;;  %v886_v29 = vpop.f32.mrf.mxu1 }
 0x26b   : > { %v771_v12 = vpop.f32.mrf.mxu0  ;;  %v5068_v27 = vadd.s32 120, %v5063_v24 }
 0x26c   : > { %6534 = vst [vmem:[#allocation12_spill] sm:$0xff] %v4945_v28  ;;  %v3639_v33 = vpop.f32.mrf.mxu1  ;;  %v1008_v18 = vsel %vm976_vm0, %v4945_v28, 0 }
 0x26d   : > { %v4947_v34 = vpop.f32.mrf.mxu0  ;;  %v4962_v49 = vpack.c.bf16 %v3639_v33, %v3638_v46  ;;  %v5065_v46 = vand.u32 127, %v917_v21  ;;  %6543 = vst [vmem:[#allocation21_spill] sm:$0xff] %v5068_v27 }
 0x26e   : > { %v889_v35 = vpop.f32.mrf.mxu1 }
 0x26f   : > { %v775_v36 = vpop.f32.mrf.mxu0  ;;  %v4966_v52 = vpack.c.bf16 %v889_v35, %v886_v29  ;;  %vm951_vm1 = vcmp.ge.s32.totalorder %v5068_v27, %v5065_v46  ;;  %v5073_v29 = vadd.s32 104, %v5063_v24  ;;  %vm936_vm4 = vcmp.ge.s32.totalorder %v5063_v24, %v5065_v46 }
 0x270   : > { %v4949_v47 = vpack.c.bf16 %v775_v36, %v771_v12  ;;  %v3642_v57 = vpop.f32.mrf.mxu1  ;;  %v5078_v12 = vadd.s32 16, %v5063_v24 }
 0x271   : > { %v4951_v37 = vpop.f32.mrf.mxu0  ;;  %6544 = vst [vmem:[#allocation22_spill] sm:$0xff] %v5073_v29  ;;  %vm949_vm2 = vcmp.ge.s32.totalorder %v5073_v29, %v5065_v46 }
 0x272   : > { %v902_v15 = vpop.f32.mrf.mxu1  ;;  %v5025_v7 = vpack.c.bf16 %v4951_v37, %v4947_v34  ;;  %vm938_vm3 = vcmp.ge.s32.totalorder %v5078_v12, %v5065_v46  ;;  %v5083_v34 = vadd.s32 24, %v5063_v24 }
 0x273   : > { %v781_v22 = vpop.f32.mrf.mxu0 }
 0x274   : > { %v3643_v40 = vpop.f32.mrf.mxu1  ;;  %6542 = vst [vmem:[#allocation20_spill] sm:$0xff] %v5025_v7  ;;  %v1011_v16 = vsel %vm976_vm0, %v5025_v7, 0  ;;  %vm939_vm5 = vcmp.ge.s32.totalorder %v5083_v34, %v5065_v46 }
 0x275   : > { %v4953_v41 = vpack.c.bf16 %v3643_v40, %v3642_v57  ;;  %v783_v42 = vpop.f32.mrf.mxu0  ;;  %v5099_v40 = vadd.s32 48, %v5063_v24 }
 0x276   : > { %v905_v43 = vpop.f32.mrf.mxu1 }
 0x277   : > { %v4955_v58 = vpack.c.bf16 %v905_v43, %v902_v15  ;;  %3676 = vmatprep.subr.bf16.mxu1 %v4953_v41  ;;  %v785_v44 = vpop.f32.mrf.mxu0  ;;  %6545 = vst [vmem:[#allocation23_spill] sm:$0xff] %v5099_v40  ;;  %vm6491_vm7 = vcmp.ge.s32.totalorder %v5099_v40, %v5065_v46 }
 0x278   : > { %v4958_v45 = vpack.c.bf16 %v785_v44, %v781_v22  ;;  %3677 = vmatpush3.bf16.msra.mxu1 %v4953_v41  ;;  %v5096_v22 = vadd.s32 8, %v5063_v24 }
 0x279   : > { %3678 = vmatprep.subr.bf16.mxu1 %v4955_v58  ;;  %v787_v3 = vpop.f32.mrf.mxu0 }
 0x27a   : > { %v5017_v48 = vpack.c.bf16 %v787_v3, %v783_v42  ;;  %vm937_vm6 = vcmp.ge.s32.totalorder %v5096_v22, %v5065_v46 }
 0x27b   : > { %v791_v50 = vpop.f32.mrf.mxu0 }
 0x27c   : > { %3679 = vmatpush3.bf16.msra.mxu1 %v4955_v58  ;;  %6541 = vst [vmem:[#allocation19_spill] sm:$0xff] %v5017_v48  ;;  %v1014_v9 = vsel %vm976_vm0, %v5017_v48, 0 }
 0x27d   : > { %3680 = vmatprep.subr.bf16.mxu1 %v4962_v49  ;;  %v793_v51 = vpop.f32.mrf.mxu0 }
 0x27f   : > { %v795_v53 = vpop.f32.mrf.mxu0 }
 0x280   : > { %v4968_v4 = vpack.c.bf16 %v795_v53, %v791_v50  ;;  %3681 = vmatpush3.bf16.msra.mxu1 %v4962_v49  ;;  %v5118_v53 = vadd.s32 32, %v5063_v24 }
 0x281   : > { %3682 = vmatprep.subr.bf16.mxu1 %v4966_v52  ;;  %v797_v11 = vpop.f32.mrf.mxu0 }
 0x282   : > { %v5011_v31 = vpack.c.bf16 %v797_v11, %v793_v51  ;;  %6546 = vst [vmem:[#allocation24_spill] sm:$0xff] %v5118_v53  ;;  %v5121_v11 = vadd.s32 56, %v5063_v24  ;;  %vm940_vm8 = vcmp.ge.s32.totalorder %v5118_v53, %v5065_v46 }
 0x283   : > { %v801_v54 = vpop.f32.mrf.mxu0 }
 0x284   : > { %3683 = vmatpush3.bf16.msra.mxu1 %v4966_v52  ;;  %6540 = vst [vmem:[#allocation18_spill] sm:$0xff] %v5011_v31  ;;  %v1017_v38 = vsel %vm976_vm0, %v5011_v31, 0  ;;  %vm943_vm9 = vcmp.ge.s32.totalorder %v5121_v11, %v5065_v46 }
 0x285   : > { %3684 = vmatprep.subr.bf16.mxu1 %v4972_v30  ;;  %v803_v55 = vpop.f32.mrf.mxu0 }
 0x287   : > { %v805_v56 = vpop.f32.mrf.mxu0 }
 0x288   : > { %v4978_v59 = vpack.c.bf16 %v805_v56, %v801_v54  ;;  %3685 = vmatpush3.bf16.msra.mxu1 %v4972_v30 }
 0x289   : > { %3686 = vmatprep.subr.bf16.mxu1 %v4976_v23  ;;  %v807_v19 = vpop.f32.mrf.mxu0 }
 0x28a   : > { %v4982_v60 = vpack.c.bf16 %v807_v19, %v803_v55 }
 0x28b   : > { %v811_v61 = vpop.f32.mrf.mxu0 }
 0x28c   : > { %6536 = vst [vmem:[#allocation14_spill] sm:$0xff] %v4982_v60  ;;  %3687 = vmatpush3.bf16.msra.mxu1 %v4976_v23  ;;  %1455 = vrot.lane.b32.xlu1 %v4982_v60, %s4563_s18  ;;  %v1020_v6 = vsel %vm976_vm0, %v4982_v60, 0 }
 0x28d   : > { %3688 = vmatprep.subr.bf16.mxu1 %v4986_v13  ;;  %v813_v62 = vpop.f32.mrf.mxu0 }
 0x28f   : > { %v815_v25 = vpop.f32.mrf.mxu0 }
 0x290   : > { %v4996_v63 = vpack.c.bf16 %v815_v25, %v811_v61  ;;  %3689 = vmatpush3.bf16.msra.mxu1 %v4986_v13  ;;  %v5140_v25 = vadd.s32 40, %v5063_v24 }
 0x291   : > { %3690 = vmatprep.subr.bf16.mxu1 %v4994_v32  ;;  %v817_v14 = vpop.f32.mrf.mxu0 }
 0x292   : > { %v5000_v1 = vpack.c.bf16 %v817_v14, %v813_v62  ;;  %v5143_v14 = vadd.s32 80, %v5063_v24  ;;  %vm941_vm10 = vcmp.ge.s32.totalorder %v5140_v25, %v5065_v46 }
 0x294   : > { %6539 = vst [vmem:[#allocation17_spill] sm:$0xff] %v5000_v1  ;;  %3691 = vmatpush3.bf16.msra.mxu1 %v4994_v32  ;;  %1457 = vrot.lane.b32.xlu0 %v5000_v1, %s4563_s18  ;;  %v1023_v5 = vsel %vm976_vm0, %v5000_v1, 0  ;;  %6547 = vst [vmem:[#allocation25_spill] sm:$0xff] %v5143_v14  ;;  %vm946_vm11 = vcmp.ge.s32.totalorder %v5143_v14, %v5065_v46 }
 0x295   : > { %3948 = vmatprep.subr.msk.bf16.mxu0 %vm976_vm0, %v5000_v1 }
 0x296   : > { %3645 = vmatpush3.bf16.xpose.msra.mxu0 %v1023_v5 }
 0x297   : > { %3949 = vmatprep.subr.msk.bf16.mxu0 %vm976_vm0, %v4982_v60 }
 0x29e   : > { %3647 = vmatpush3.bf16.xpose.msra.mxu0 %v1020_v6 }
 0x29f   : > { %3950 = vmatprep.subr.msk.bf16.mxu0 %vm976_vm0, %v5011_v31 }
 0x2a6   : > { %3649 = vmatpush3.bf16.xpose.msra.mxu0 %v1017_v38 }
 0x2a7   : > { %3951 = vmatprep.subr.msk.bf16.mxu0 %vm976_vm0, %v5017_v48 }
 0x2ae   : > { %3651 = vmatpush3.bf16.xpose.msra.mxu0 %v1014_v9 }
 0x2af   : > { %3952 = vmatprep.subr.msk.bf16.mxu0 %vm976_vm0, %v5025_v7 }
 0x2b6   : > { %3653 = vmatpush3.bf16.xpose.msra.mxu0 %v1011_v16 }
 0x2b7   : > { %3953 = vmatprep.subr.msk.bf16.mxu0 %vm976_vm0, %v4945_v28 }
 0x2be   : > { %3655 = vmatpush3.bf16.xpose.msra.mxu0 %v1008_v18 }
 0x2bf   : > { %3954 = vmatprep.subr.msk.bf16.mxu0 %vm976_vm0, %v4941_v17 }
 0x2c6   : > { %3657 = vmatpush3.bf16.xpose.msra.mxu0 %v1005_v39  ;;  %v5162_v39 = vadd.s32 64, %v5063_v24 }
 0x2c7   : > { %3955 = vmatprep.subr.msk.bf16.mxu0 %vm976_vm0, %v4929_v2 }
 0x2c8   : > { %6548 = vst [vmem:[#allocation26_spill] sm:$0xff] %v5162_v39  ;;  %vm6458_vm12 = vcmp.ge.s32.totalorder %v5162_v39, %v5065_v46 }
 0x2ce   : > { %3659 = vmatpush3.bf16.xpose.msra.mxu0 %v1002_v10  ;;  %v5165_v10 = vadd.s32 88, %v5063_v24 }
 0x2d0   : > { %vm947_vm13 = vcmp.ge.s32.totalorder %v5165_v10, %v5065_v46 }
 0x2d5   : > { %3661 = vmatmul.mubr.msk.bf16.vlgmr.msra.gmra.mxu0 %vm976_vm0, %v4939_v8 }
 0x2d6   : > { %3664 = vmatprep.mubr.msk.bf16.mxu0 %vm976_vm0, %v4943_v26 }
 0x2dd   : > { %3665 = vmatmul.mubr.msk.bf16.gmra.mxu0 %vm976_vm0, %v4949_v47 }
 0x2de   : > { %3668 = vmatprep.mubr.msk.bf16.mxu0 %vm976_vm0, %v4958_v45 }
 0x2e5   : > { %3669 = vmatmul.mubr.msk.bf16.gmra.mxu0 %vm976_vm0, %v4968_v4 }
 0x2e6   : > { %3672 = vmatprep.mubr.msk.bf16.mxu0 %vm976_vm0, %v4978_v59 }
 0x2ed   : > { %3673 = vmatmul.mubr.msk.bf16.gmra.mxu0 %vm976_vm0, %v4996_v63 }
 0x306   : > { %v5059_v20 = vpop.permute.xlu0 %1457 }
 0x307   : > { %3956 = vmatprep.subr.msk.bf16.mxu1 %vm976_vm0, %v5059_v20 }
 0x395   : > { %v3662_v33 = vpop.f32.mrf.mxu0 }
 0x396   : > { %v1124_v35 = vmul.f32 0.17677669, %v3662_v33 }
 0x397   : > { %v1059_v36 = vpop.f32.mrf.mxu0 }
 0x398   : > { %v1122_v57 = vmul.f32 0.17677669, %v1059_v36  ;;  %v5088_v37 = vsel %vm938_vm3, %v1124_v35, -1e+30 }
 0x399   : > { %1158 = vmax.xlane.f32.xlu0 %v5088_v37  ;;  %v3663_v15 = vpop.f32.mrf.mxu0 }
 0x39a   : > { %v1125_v42 = vmul.f32 0.17677669, %v3663_v15  ;;  %v5104_v3 = vsel %vm936_vm4, %v1122_v57, -1e+30 }
 0x39b   : > { %v1062_v43 = vpop.f32.mrf.mxu0 }
 0x39c   : > { %v1123_v44 = vmul.f32 0.17677669, %v1062_v43  ;;  %v5109_v50 = vsel %vm939_vm5, %v1125_v42, -1e+30  ;;  %v5184_v42 = vadd.s32 72, %v5063_v24  ;;  %v5187_v43 = vadd.s32 112, %v5063_v24 }
 0x39d   : > { %1154 = vmax.xlane.f32.xlu0 %v5104_v3  ;;  %1160 = vmax.xlane.f32.xlu1 %v5109_v50  ;;  %v3666_v51 = vpop.f32.mrf.mxu0 }
 0x39e   : > { %v1128_v54 = vmul.f32 0.17677669, %v3666_v51  ;;  %v5126_v19 = vsel %vm937_vm6, %v1123_v44, -1e+30  ;;  %6549 = vst [vmem:[#allocation27_spill] sm:$0xff] %v5187_v43  ;;  %vm945_vm14 = vcmp.ge.s32.totalorder %v5184_v42, %v5065_v46  ;;  %vm950_vm15 = vcmp.ge.s32.totalorder %v5187_v43, %v5065_v46 }
 0x39f   : > { %v1075_v55 = vpop.f32.mrf.mxu0 }
 0x3a0   : > { %v1126_v56 = vmul.f32 0.17677669, %v1075_v55  ;;  %v5131_v61 = vsel %vm6491_vm7, %v1128_v54, -1e+30 }
 0x3a1   : > { %1156 = vmax.xlane.f32.xlu1 %v5126_v19  ;;  %1166 = vmax.xlane.f32.xlu0 %v5131_v61  ;;  %v3667_v62 = vpop.f32.mrf.mxu0 }
 0x3a2   : > { %v1129_v5 = vmul.f32 0.17677669, %v3667_v62  ;;  %v5148_v9 = vsel %vm940_vm8, %v1126_v56, -1e+30 }
 0x3a3   : > { %v1078_v6 = vpop.f32.mrf.mxu0 }
 0x3a4   : > { %v1127_v38 = vmul.f32 0.17677669, %v1078_v6  ;;  %v5153_v16 = vsel %vm943_vm9, %v1129_v5, -1e+30  ;;  %v5206_v5 = vadd.s32 96, %v5063_v24 }
 0x3a5   : > { %1162 = vmax.xlane.f32.xlu0 %v5148_v9  ;;  %1168 = vmax.xlane.f32.xlu1 %v5153_v16  ;;  %v3670_v18 = vpop.f32.mrf.mxu0 }
 0x3a6   : > { %v1132_v21 = vmul.f32 0.17677669, %v3670_v18  ;;  %v5170_v36 = vsel %vm941_vm10, %v1127_v38, -1e+30  ;;  %6550 = vst [vmem:[#allocation28_spill] sm:$0xff] %v5206_v5 }
 0x3a7   : > { %v1091_v33 = vpop.f32.mrf.mxu0 }
 0x3a8   : > { %v1130_v35 = vmul.f32 0.17677669, %v1091_v33  ;;  %v5175_v57 = vsel %vm946_vm11, %v1132_v21, -1e+30 }
 0x3a9   : > { %1164 = vmax.xlane.f32.xlu1 %v5170_v36  ;;  %1174 = vmax.xlane.f32.xlu0 %v5175_v57  ;;  %v3671_v15 = vpop.f32.mrf.mxu0 }
 0x3aa   : > { %v1133_v44 = vmul.f32 0.17677669, %v3671_v15  ;;  %v5192_v55 = vsel %vm6458_vm12, %v1130_v35, -1e+30  ;;  %vm948_vm12 = vcmp.ge.s32.totalorder %v5206_v5, %v5065_v46 }
 0x3ab   : > { %v1094_v51 = vpop.f32.mrf.mxu0 }
 0x3ac   : > { %v1131_v54 = vmul.f32 0.17677669, %v1094_v51  ;;  %v5197_v56 = vsel %vm947_vm13, %v1133_v44, -1e+30 }
 0x3ad   : > { %1170 = vmax.xlane.f32.xlu0 %v5192_v55  ;;  %1176 = vmax.xlane.f32.xlu1 %v5197_v56  ;;  %v3674_v62 = vpop.f32.mrf.mxu0 }
 0x3ae   : > { %v1136_v6 = vmul.f32 0.17677669, %v3674_v62  ;;  %v5211_v21 = vsel %vm945_vm14, %v1131_v54, -1e+30 }
 0x3af   : > { %v1107_v38 = vpop.f32.mrf.mxu0 }
 0x3b0   : > { %v1134_v18 = vmul.f32 0.17677669, %v1107_v38  ;;  %v1152_v33 = vsel %vm950_vm15, %v1136_v6, -1e+30  ;;  %v5241_v38 = vpop.permute.xlu1 %1455 }
 0x3b1   : > { %1172 = vmax.xlane.f32.xlu1 %v5211_v21  ;;  %1182 = vmax.xlane.f32.xlu0 %v1152_v33  ;;  %v3675_v15 = vpop.f32.mrf.mxu0 }
 0x3b2   : > { %v5222_v35 = vsel %vm948_vm12, %v1134_v18, -1e+30  ;;  %v1137_v44 = vmul.f32 0.17677669, %v3675_v15 }
 0x3b3   : > { %v1110_v51 = vpop.f32.mrf.mxu0 }
 0x3b4   : > { %v1135_v54 = vmul.f32 0.17677669, %v1110_v51  ;;  %v5232_v62 = vsel %vm951_vm1, %v1137_v44, -1e+30 }
 0x3b5   : > { %1178 = vmax.xlane.f32.xlu0 %v5222_v35 }
 0x3b6   : > { %v5238_v6 = vsel %vm949_vm2, %v1135_v54, -1e+30 }
 0x3c2   : > { %1451 = vrot.lane.b32.xlu1 %v5017_v48, %s4563_s18 }
 0x3cb   : > { %1453 = vrot.lane.b32.xlu0 %v5011_v31, %s4563_s18 }
 0x3e6   : > { %1184 = vmax.xlane.f32.xlu1 %v5232_v62 }
 0x3ea   : > { %1180 = vmax.xlane.f32.xlu1 %v5238_v6 }
 0x422   : > { %v1159_v18 = vpop.xlane.xlu0 %1158 }
 0x423   : > { %v1188_v15 = vsub.f32 %v5088_v37, %v1159_v18 }
 0x425   : > { %v1206_v51 = vmul.f32 1.442695, %v1188_v15 }
 0x426   : > { %v1155_v31 = vpop.xlane.xlu0 %1154  ;;  %v1161_v1 = vpop.xlane.xlu1 %1160 }
 0x427   : > { %4131 = vpow2.f32 %v1206_v51  ;;  %v1186_v44 = vsub.f32 %v5104_v3, %v1155_v31  ;;  %v1189_v27 = vsub.f32 %v5109_v50, %v1161_v1 }
 0x429   : > { %v1202_v5 = vmul.f32 1.442695, %v1186_v44  ;;  %v1208_v43 = vmul.f32 1.442695, %v1189_v27 }
 0x42a   : > { %v1157_v29 = vpop.xlane.xlu1 %1156  ;;  %v1167_v31 = vpop.xlane.xlu0 %1166 }
 0x42b   : > { %4133 = vpow2.f32 %v1202_v5  ;;  %v1187_v54 = vsub.f32 %v5126_v19, %v1157_v29  ;;  %v1192_v19 = vsub.f32 %v5131_v61, %v1167_v31 }
 0x42c   : > { %4135 = vpow2.f32 %v1208_v43 }
 0x42d   : > { %v1204_v39 = vmul.f32 1.442695, %v1187_v54  ;;  %v1214_v5 = vmul.f32 1.442695, %v1192_v19 }
 0x42e   : > { %v1163_v27 = vpop.xlane.xlu0 %1162  ;;  %v1169_v3 = vpop.xlane.xlu1 %1168 }
 0x42f   : > { %4137 = vpow2.f32 %v1204_v39  ;;  %v1190_v51 = vsub.f32 %v5148_v9, %v1163_v27 }
 0x430   : > { %4139 = vpow2.f32 %v1214_v5 }
 0x431   : > { %v1210_v40 = vmul.f32 1.442695, %v1190_v51 }
 0x432   : > { %v1175_v29 = vpop.xlane.xlu0 %1174  ;;  %v1165_v39 = vpop.xlane.xlu1 %1164 }
 0x433   : > { %v1191_v15 = vsub.f32 %v5170_v36, %v1165_v39  ;;  %v1196_v31 = vsub.f32 %v5175_v57, %v1175_v29 }
 0x434   : > { %v5247_v14 = vpop.eup %4131 }
 0x435   : > { %1238 = vadd.xlane.f32.xlu0 %v5247_v14  ;;  %v1212_v54 = vmul.f32 1.442695, %v1191_v15  ;;  %v1222_v9 = vmul.f32 1.442695, %v1196_v31 }
 0x436   : > { %v1171_v50 = vpop.xlane.xlu0 %1170  ;;  %v1177_v44 = vpop.xlane.xlu1 %1176 }
 0x437   : > { %4141 = vpow2.f32 %v1212_v54  ;;  %v1194_v27 = vsub.f32 %v5192_v55, %v1171_v50 }
 0x438   : > { %v5250_v37 = vpop.eup %4133  ;;  %4143 = vpow2.f32 %v1210_v40 }
 0x439   : > { %v5252_v18 = vpop.eup %4135  ;;  %1234 = vadd.xlane.f32.xlu0 %v5250_v37 }
 0x43a   : > { %1240 = vadd.xlane.f32.xlu1 %v5252_v18  ;;  %v1183_v43 = vpop.xlane.xlu0 %1182  ;;  %v1173_v19 = vpop.xlane.xlu1 %1172 }
 0x43b   : > { %v1200_v53 = vsub.f32 %v1152_v33, %v1183_v43  ;;  %v1195_v57 = vsub.f32 %v5211_v21, %v1173_v19 }
 0x43c   : > { %v5256_v1 = vpop.eup %4137 }
 0x43e   : > { %1236 = vadd.xlane.f32.xlu1 %v5256_v1  ;;  %v1179_v48 = vpop.xlane.xlu0 %1178  ;;  %v5270_v33 = vpop.permute.xlu1 %1451 }
 0x43f   : > { %v1198_v60 = vsub.f32 %v5222_v35, %v1179_v48  ;;  %v1197_v48 = vsub.f32 %v5197_v56, %v1177_v44 }
 0x441   : > { %v1226_v36 = vmul.f32 1.442695, %v1198_v60  ;;  %v1224_v60 = vmul.f32 1.442695, %v1197_v48 }
 0x442   : > { %v1454_v54 = vpop.permute.xlu0 %1453 }
 0x44f   : > { %1447 = vrot.lane.b32.xlu1 %v4945_v28, %s4563_s18  ;;  %1449 = vrot.lane.b32.xlu0 %v5025_v7, %s4563_s18  ;;  %v1193_v28 = vsub.f32 %v5153_v16, %v1169_v3  ;;  %v1230_v7 = vmul.f32 1.442695, %v1200_v53  ;;  %v5272_v16 = vpop.eup %4139  ;;  %v1218_v53 = vmul.f32 1.442695, %v1194_v27  ;;  %v1220_v3 = vmul.f32 1.442695, %v1195_v57 }
 0x451   : > { %v1216_v61 = vmul.f32 1.442695, %v1193_v28  ;;  %4145 = vpow2.f32 %v1230_v7  ;;  %v5277_v7 = vpop.eup %4141 }
 0x452   : > { %v5280_v55 = vpop.eup %4143 }
 0x453   : > { %4147 = vpow2.f32 %v1216_v61 }
 0x454   : > { %4149 = vpow2.f32 %v1226_v36 }
 0x455   : > { %4151 = vpow2.f32 %v1222_v9 }
 0x456   : > { %4153 = vpow2.f32 %v1218_v53 }
 0x45e   : > { %v5284_v56 = vpop.eup %4145 }
 0x460   : > { %v5287_v50 = vpop.eup %4147 }
 0x461   : > { %v5291_v21 = vpop.eup %4149 }
 0x462   : > { %v5293_v43 = vpop.eup %4151 }
 0x463   : > { %v5297_v5 = vpop.eup %4153 }
 0x46e   : > { %1246 = vadd.xlane.f32.xlu0 %v5272_v16 }
 0x46f   : > { %v1185_v28 = vpop.xlane.xlu1 %1184 }
 0x470   : > { %v1201_v40 = vsub.f32 %v5232_v62, %v1185_v28 }
 0x472   : > { %v1232_v35 = vmul.f32 1.442695, %v1201_v40  ;;  %1244 = vadd.xlane.f32.xlu0 %v5277_v7 }
 0x473   : > { %1242 = vadd.xlane.f32.xlu1 %v5280_v55  ;;  %v1181_v29 = vpop.xlane.xlu1 %1180 }
 0x474   : > { %4155 = vpow2.f32 %v1232_v35  ;;  %v1199_v62 = vsub.f32 %v5238_v6, %v1181_v29 }
 0x475   : > { %4157 = vpow2.f32 %v1224_v60 }
 0x476   : > { %1262 = vadd.xlane.f32.xlu0 %v5284_v56  ;;  %4159 = vpow2.f32 %v1220_v3  ;;  %v1228_v39 = vmul.f32 1.442695, %v1199_v62  ;;  %v1505_v3 = vsel %vm976_vm0, %v5059_v20, 0  ;;  %v1496_v20 = vsel %vm976_vm0, %v5270_v33, 0 }
 0x477   : > { %1248 = vadd.xlane.f32.xlu1 %v5287_v50 }
 0x478   : > { %4161 = vpow2.f32 %v1228_v39 }
 0x47a   : > { %1258 = vadd.xlane.f32.xlu0 %v5291_v21 }
 0x47b   : > { %1254 = vadd.xlane.f32.xlu1 %v5293_v43 }
 0x47f   : > { %1250 = vadd.xlane.f32.xlu1 %v5297_v5 }
 0x481   : > { %v5300_v6 = vpop.eup %4155 }
 0x482   : > { %v5302_v15 = vpop.eup %4157  ;;  %1264 = vadd.xlane.f32.xlu0 %v5300_v6 }
 0x483   : > { %1256 = vadd.xlane.f32.xlu1 %v5302_v15  ;;  %v5306_v51 = vpop.eup %4159 }
 0x485   : > { %v5309_v44 = vpop.eup %4161 }
 0x487   : > { %1252 = vadd.xlane.f32.xlu1 %v5306_v51 }
 0x48b   : > { %1260 = vadd.xlane.f32.xlu1 %v5309_v44 }
 0x498   : > { %1445 = vrot.lane.b32.xlu0 %v4941_v17, %s4563_s18 }
 0x49c   : > { %1443 = vrot.lane.b32.xlu1 %v4929_v2, %s4563_s18  ;;  %1419 = vrot.lane.b32.xlu0 %v4925_v0, %s4563_s18 }
 0x4a0   : > { %1421 = vrot.lane.b32.xlu1 %v4939_v8, %s4563_s18  ;;  %1423 = vrot.lane.b32.xlu0 %v4943_v26, %s4563_s18 }
 0x4a4   : > { %1425 = vrot.lane.b32.xlu1 %v4949_v47, %s4563_s18  ;;  %1427 = vrot.lane.b32.xlu0 %v4958_v45, %s4563_s18 }
 0x4a8   : > { %1429 = vrot.lane.b32.xlu1 %v4968_v4, %s4563_s18  ;;  %1431 = vrot.lane.b32.xlu0 %v4978_v59, %s4563_s18 }
 0x4ac   : > { %1433 = vrot.lane.b32.xlu1 %v4996_v63, %s4563_s18  ;;  %1810 = vrot.lane.b32.xlu0 %v4953_v41, %s4563_s18 }
 0x4b0   : > { %1808 = vrot.lane.b32.xlu1 %v4955_v58, %s4563_s18  ;;  %1806 = vrot.lane.b32.xlu0 %v4962_v49, %s4563_s18 }
 0x4b4   : > { %1800 = vrot.lane.b32.xlu1 %v4976_v23, %s4563_s18  ;;  %1804 = vrot.lane.b32.xlu0 %v4966_v52, %s4563_s18 }
 0x4b8   : > { %1796 = vrot.lane.b32.xlu1 %v4994_v32, %s4563_s18  ;;  %1802 = vrot.lane.b32.xlu0 %v4972_v30, %s4563_s18 }
 0x4be   : > { %v1239_v61 = vpop.xlane.xlu0 %1238 }
 0x4c2   : > { %v1235_v31 = vpop.xlane.xlu0 %1234 }
 0x4c3   : > { %v1241_v19 = vpop.xlane.xlu1 %1240 }
 0x4c4   : > { %4163 = vrcp.f32 %v1241_v19 }
 0x4c5   : > { %4165 = vrcp.f32 %v1235_v31 }
 0x4c6   : > { %4167 = vrcp.f32 %v1239_v61 }
 0x4c7   : > { %v1237_v36 = vpop.xlane.xlu1 %1236 }
 0x4c8   : > { %4169 = vrcp.f32 %v1237_v36 }
 0x4cb   : > { %v1448_v62 = vpop.permute.xlu1 %1447 }
 0x4d1   : > { %v4164_v9 = vpop.eup %4163 }
 0x4d2   : > { %v4166_v27 = vpop.eup %4165  ;;  %v1285_v28 = vmul.f32 %v4164_v9, %v5252_v18  ;;  %v1502_v18 = vsel %vm976_vm0, %v5241_v38, 0 }
 0x4d3   : > { %v4168_v53 = vpop.eup %4167  ;;  %v1282_v40 = vmul.f32 %v4166_v27, %v5250_v37  ;;  %v1499_v37 = vsel %vm976_vm0, %v1454_v54, 0 }
 0x4d4   : > { %v1284_v57 = vmul.f32 %v4168_v53, %v5247_v14  ;;  %v1450_v14 = vpop.permute.xlu0 %1449 }
 0x4d5   : > { %v4170_v48 = vpop.eup %4169 }
 0x4d6   : > { %v1283_v60 = vmul.f32 %v4170_v48, %v5256_v1  ;;  %v1299_v29 = vpack.c.bf16 %v1285_v28, %v1284_v57 }
 0x4d8   : > { %v1298_v35 = vpack.c.bf16 %v1283_v60, %v1282_v40 }
 0x4da   : > { %3692 = vmatprep.mubr.bf16.mxu1 %v1298_v35 }
 0x4db   : > { %3693 = vmatmul.mubr.bf16.vlgmr.msra.gmra.mxu1 %v1299_v29 }
 0x4dc   : > { %3709 = vmatpush3.bf16.xpose.msra.mxu1 %v1505_v3 }
 0x4dd   : > { %3957 = vmatprep.subr.msk.bf16.mxu1 %vm976_vm0, %v5241_v38  ;;  %v1493_v38 = vsel %vm976_vm0, %v1450_v14, 0 }
 0x4e4   : > { %3711 = vmatpush3.bf16.xpose.msra.mxu1 %v1502_v18 }
 0x4e5   : > { %3958 = vmatprep.subr.msk.bf16.mxu1 %vm976_vm0, %v1454_v54 }
 0x4ec   : > { %3713 = vmatpush3.bf16.xpose.msra.mxu1 %v1499_v37 }
 0x4ed   : > { %3959 = vmatprep.subr.msk.bf16.mxu1 %vm976_vm0, %v5270_v33  ;;  %v1490_v33 = vsel %vm976_vm0, %v1448_v62, 0 }
 0x4f4   : > { %3715 = vmatpush3.bf16.xpose.msra.mxu1 %v1496_v20 }
 0x4f5   : > { %3960 = vmatprep.subr.msk.bf16.mxu1 %vm976_vm0, %v1450_v14 }
 0x4f7   : > { %v1247_v1 = vpop.xlane.xlu0 %1246 }
 0x4fb   : > { %v1245_v39 = vpop.xlane.xlu0 %1244 }
 0x4fc   : > { %3717 = vmatpush3.bf16.xpose.msra.mxu1 %v1493_v38  ;;  %4171 = vrcp.f32 %v1245_v39  ;;  %v1243_v61 = vpop.xlane.xlu1 %1242 }
 0x4fd   : > { %3961 = vmatprep.subr.msk.bf16.mxu1 %vm976_vm0, %v1448_v62  ;;  %4173 = vrcp.f32 %v1243_v61 }
 0x4fe   : > { %4175 = vrcp.f32 %v1247_v1 }
 0x4ff   : > { %v1263_v31 = vpop.xlane.xlu0 %1262 }
 0x500   : > { %v1249_v54 = vpop.xlane.xlu1 %1248 }
 0x501   : > { %4177 = vrcp.f32 %v1249_v54 }
 0x503   : > { %v1259_v36 = vpop.xlane.xlu0 %1258 }
 0x504   : > { %3719 = vmatpush3.bf16.xpose.msra.mxu1 %v1490_v33  ;;  %v1255_v19 = vpop.xlane.xlu1 %1254 }
 0x508   : > { %v1251_v9 = vpop.xlane.xlu1 %1250 }
 0x509   : > { %v4172_v27 = vpop.eup %4171 }
 0x50a   : > { %v4174_v53 = vpop.eup %4173  ;;  %v1287_v48 = vmul.f32 %v4172_v27, %v5277_v7 }
 0x50b   : > { %v1265_v28 = vpop.xlane.xlu0 %1264  ;;  %v1286_v40 = vmul.f32 %v4174_v53, %v5280_v55  ;;  %v4176_v60 = vpop.eup %4175 }
 0x50c   : > { %v1257_v57 = vpop.xlane.xlu1 %1256  ;;  %v1288_v18 = vmul.f32 %v4176_v60, %v5272_v16 }
 0x50d   : > { %v1300_v35 = vpack.c.bf16 %v1287_v48, %v1286_v40  ;;  %4179 = vrcp.f32 %v1257_v57 }
 0x50e   : > { %v4178_v29 = vpop.eup %4177  ;;  %4181 = vrcp.f32 %v1251_v9 }
 0x50f   : > { %3696 = vmatprep.mubr.bf16.mxu1 %v1300_v35  ;;  %v1446_v3 = vpop.permute.xlu0 %1445  ;;  %v1289_v37 = vmul.f32 %v4178_v29, %v5287_v50  ;;  %4183 = vrcp.f32 %v1255_v19 }
 0x510   : > { %v1253_v14 = vpop.xlane.xlu1 %1252  ;;  %3962 = vmatprep.subr.msk.bf16.mxu1 %vm976_vm0, %v1446_v3  ;;  %v1487_v7 = vsel %vm976_vm0, %v1446_v3, 0 }
 0x511   : > { %4185 = vrcp.f32 %v1253_v14  ;;  %3721 = vmatpush3.bf16.xpose.msra.mxu1 %v1487_v7  ;;  %v1301_v55 = vpack.c.bf16 %v1289_v37, %v1288_v18 }
 0x512   : > { %4187 = vrcp.f32 %v1259_v36 }
 0x513   : > { %3697 = vmatmul.mubr.bf16.gmra.mxu1 %v1301_v55  ;;  %v1420_v20 = vpop.permute.xlu0 %1419 }
 0x514   : > { %v1261_v1 = vpop.xlane.xlu1 %1260 }
 0x515   : > { %4189 = vrcp.f32 %v1261_v1 }
 0x516   : > { %4191 = vrcp.f32 %v1265_v28 }
 0x517   : > { %v1424_v62 = vpop.permute.xlu0 %1423  ;;  %4193 = vrcp.f32 %v1263_v31 }
 0x518   : > { %v1444_v16 = vpop.permute.xlu1 %1443 }
 0x519   : > { %3963 = vmatprep.subr.msk.bf16.mxu1 %vm976_vm0, %v1444_v16  ;;  %v1484_v50 = vsel %vm976_vm0, %v1444_v16, 0 }
 0x51a   : > { %3723 = vmatpush3.bf16.xpose.msra.mxu1 %v1484_v50  ;;  %v4180_v38 = vpop.eup %4179 }
 0x51b   : > { %v1428_v39 = vpop.permute.xlu0 %1427  ;;  %v4182_v61 = vpop.eup %4181  ;;  %v1293_v36 = vmul.f32 %v4180_v38, %v5302_v15 }
 0x51c   : > { %v1422_v54 = vpop.permute.xlu1 %1421  ;;  %v4184_v33 = vpop.eup %4183  ;;  %v1290_v27 = vmul.f32 %v4182_v61, %v5297_v5 }
 0x51d   : > { %v1292_v28 = vmul.f32 %v4184_v33, %v5293_v43  ;;  %v6569_v33 = vld [vmem:[#allocation23_spill] sm:$0xff] }
 0x51e   : > { %v4186_v19 = vpop.eup %4185 }
 0x51f   : > { %v1432_v9 = vpop.permute.xlu0 %1431  ;;  %v1291_v53 = vmul.f32 %v4186_v19, %v5306_v51  ;;  %v4188_v31 = vpop.eup %4187  ;;  %v1303_v57 = vpack.c.bf16 %v1293_v36, %v1292_v28 }
 0x520   : > { %v1426_v48 = vpop.permute.xlu1 %1425  ;;  %v1294_v3 = vmul.f32 %v4188_v31, %v5291_v21 }
 0x521   : > { %v1302_v40 = vpack.c.bf16 %v1291_v53, %v1290_v27 }
 0x522   : > { %v4190_v60 = vpop.eup %4189 }
 0x523   : > { %v4192_v35 = vpop.eup %4191  ;;  %3700 = vmatprep.mubr.bf16.mxu1 %v1302_v40  ;;  %v1811_v29 = vpop.permute.xlu0 %1810  ;;  %v1295_v18 = vmul.f32 %v4190_v60, %v5309_v44 }
 0x524   : > { %3701 = vmatmul.mubr.bf16.gmra.mxu1 %v1303_v57  ;;  %v1430_v15 = vpop.permute.xlu1 %1429  ;;  %3740 = vmatprep.subr.bf16.mxu0 %v1811_v29  ;;  %v4194_v5 = vpop.eup %4193  ;;  %v1297_v37 = vmul.f32 %v4192_v35, %v5300_v6 }
 0x525   : > { %3741 = vmatpush3.bf16.msra.mxu0 %v1811_v29  ;;  %v1304_v51 = vpack.c.bf16 %v1295_v18, %v1294_v3  ;;  %v1296_v14 = vmul.f32 %v4194_v5, %v5284_v56 }
 0x527   : > { %3704 = vmatprep.mubr.bf16.mxu1 %v1304_v51  ;;  %v1807_v7 = vpop.permute.xlu0 %1806  ;;  %v1305_v55 = vpack.c.bf16 %v1297_v37, %v1296_v14 }
 0x528   : > { %v1434_v43 = vpop.permute.xlu1 %1433 }
 0x52b   : > { %v1805_v21 = vpop.permute.xlu0 %1804 }
 0x52c   : > { %3705 = vmatmul.mubr.bf16.gmra.mxu1 %v1305_v55  ;;  %v1809_v1 = vpop.permute.xlu1 %1808 }
 0x52d   : > { %3724 = vmatprep.mubr.msk.bf16.mxu1 %vm976_vm0, %v1420_v20  ;;  %3742 = vmatprep.subr.bf16.mxu0 %v1809_v1 }
 0x52e   : > { %3743 = vmatpush3.bf16.msra.mxu0 %v1809_v1 }
 0x52f   : > { %3744 = vmatprep.subr.bf16.mxu0 %v1807_v7  ;;  %v1803_v6 = vpop.permute.xlu0 %1802 }
 0x530   : > { %v1801_v56 = vpop.permute.xlu1 %1800 }
 0x532   : > { %3745 = vmatpush3.bf16.msra.mxu0 %v1807_v7 }
 0x533   : > { %3746 = vmatprep.subr.bf16.mxu0 %v1805_v21 }
 0x534   : > { %3725 = vmatmul.mubr.msk.bf16.vlgmr.msra.gmra.mxu1 %vm976_vm0, %v1422_v54 }
 0x535   : > { %3728 = vmatprep.mubr.msk.bf16.mxu1 %vm976_vm0, %v1424_v62 }
 0x536   : > { %3747 = vmatpush3.bf16.msra.mxu0 %v1805_v21 }
 0x537   : > { %3748 = vmatprep.subr.bf16.mxu0 %v1803_v6 }
 0x53a   : > { %3749 = vmatpush3.bf16.msra.mxu0 %v1803_v6 }
 0x53b   : > { %3750 = vmatprep.subr.bf16.mxu0 %v1801_v56 }
 0x53c   : > { %3729 = vmatmul.mubr.msk.bf16.gmra.mxu1 %vm976_vm0, %v1426_v48 }
 0x53d   : > { %3732 = vmatprep.mubr.msk.bf16.mxu1 %vm976_vm0, %v1428_v39 }
 0x53e   : > { %3751 = vmatpush3.bf16.msra.mxu0 %v1801_v56 }
 0x544   : > { %3733 = vmatmul.mubr.msk.bf16.gmra.mxu1 %vm976_vm0, %v1430_v15 }
 0x545   : > { %3736 = vmatprep.mubr.msk.bf16.mxu1 %vm976_vm0, %v1432_v9 }
 0x54c   : > { %3737 = vmatmul.mubr.msk.bf16.gmra.mxu1 %vm976_vm0, %v1434_v43 }
 0x59b   : > { %v5390_v44 = vpop.f32.mrf.mxu1 }
 0x59c   : > { %6551 = vst [vmem:[#allocation29_spill] sm:$0xff] %v5390_v44 }
 0x59d   : > { %v5392_v20 = vpop.f32.mrf.mxu1 }
 0x59e   : > { %6552 = vst [vmem:[#allocation30_spill] sm:$0xff] %v5392_v20 }
 0x59f   : > { %v5394_v62 = vpop.f32.mrf.mxu1 }
 0x5a0   : > { %6553 = vst [vmem:[#allocation31_spill] sm:$0xff] %v5394_v62 }
 0x5a1   : > { %v5398_v50 = vpop.f32.mrf.mxu1 }
 0x5a2   : > { %6554 = vst [vmem:[#allocation32_spill] sm:$0xff] %v5398_v50 }
 0x5d3   : > { %v5402_v39 = vpop.f32.mrf.mxu1 }
 0x5d4   : > { %6555 = vst [vmem:[#allocation33_spill] sm:$0xff] %v5402_v39 }
 0x5d5   : > { %v5404_v61 = vpop.f32.mrf.mxu1 }
 0x5d6   : > { %6556 = vst [vmem:[#allocation34_spill] sm:$0xff] %v5404_v61 }
 0x5d7   : > { %v5406_v54 = vpop.f32.mrf.mxu1 }
 0x5d8   : > { %6557 = vst [vmem:[#allocation35_spill] sm:$0xff] %v5406_v54 }
 0x5d9   : > { %v5410_v19 = vpop.f32.mrf.mxu1 }
 0x5da   : > { %6558 = vst [vmem:[#allocation36_spill] sm:$0xff] %v5410_v19  ;;  %v1797_v19 = vpop.permute.xlu1 %1796 }
 0x5e4   : > { %v5414_v9 = vpop.f32.mrf.mxu1 }
 0x5e5   : > { %6559 = vst [vmem:[#allocation37_spill] sm:$0xff] %v5414_v9 }
 0x5e6   : > { %v5416_v27 = vpop.f32.mrf.mxu1 }
 0x5e7   : > { %6560 = vst [vmem:[#allocation38_spill] sm:$0xff] %v5416_v27 }
 0x5e8   : > { %v5418_v53 = vpop.f32.mrf.mxu1 }
 0x5e9   : > { %6561 = vst [vmem:[#allocation39_spill] sm:$0xff] %v5418_v53 }
 0x5ea   : > { %v5422_v48 = vpop.f32.mrf.mxu1 }
 0x5eb   : > { %6562 = vst [vmem:[#allocation40_spill] sm:$0xff] %v5422_v48 }
 0x5ec   : > { %v5426_v40 = vpop.f32.mrf.mxu1 }
 0x5ed   : > { %6563 = vst [vmem:[#allocation41_spill] sm:$0xff] %v5426_v40 }
 0x5ee   : > { %v5428_v60 = vpop.f32.mrf.mxu1 }
 0x5ef   : > { %6564 = vst [vmem:[#allocation42_spill] sm:$0xff] %v5428_v60 }
 0x5f0   : > { %v5430_v57 = vpop.f32.mrf.mxu1 }
 0x5f1   : > { %6565 = vst [vmem:[#allocation43_spill] sm:$0xff] %v5430_v57 }
 0x5f2   : > { %v5434_v29 = vpop.f32.mrf.mxu1 }
 0x5f3   : > { %6566 = vst [vmem:[#allocation44_spill] sm:$0xff] %v5434_v29  ;;  %v6572_v29 = vld [vmem:[#allocation26_spill] sm:$0xff] }
 0x5f4   : > { %v3726_v18 = vpop.f32.mrf.mxu1 }
 0x5f5   : > { %v1606_v15 = vmul.f32 0.17677669, %v3726_v18 }
 0x5f6   : > { %v1541_v5 = vpop.f32.mrf.mxu1 }
 0x5f7   : > { %v1604_v51 = vmul.f32 0.17677669, %v1541_v5  ;;  %v5441_v37 = vsel %vm938_vm3, %v1606_v15, -1e+30 }
 0x5f8   : > { %1640 = vmax.xlane.f32.xlu0 %v5441_v37  ;;  %v3727_v43 = vpop.f32.mrf.mxu1 }
 0x5f9   : > { %v1607_v7 = vmul.f32 0.17677669, %v3727_v43  ;;  %v5447_v1 = vsel %vm936_vm4, %v1604_v51, -1e+30 }
 0x5fa   : > { %v1544_v14 = vpop.f32.mrf.mxu1 }
 0x5fb   : > { %v1605_v55 = vmul.f32 0.17677669, %v1544_v14  ;;  %v5459_v18 = vsel %vm939_vm5, %v1607_v7, -1e+30 }
 0x5fc   : > { %1636 = vmax.xlane.f32.xlu0 %v5447_v1  ;;  %v3730_v21 = vpop.f32.mrf.mxu1 }
 0x5fd   : > { %v5453_v6 = vsel %vm937_vm6, %v1605_v55, -1e+30 }
 0x5fe   : > { %1638 = vmax.xlane.f32.xlu1 %v5453_v6  ;;  %v1557_v56 = vpop.f32.mrf.mxu1 }
 0x600   : > { %1642 = vmax.xlane.f32.xlu0 %v5459_v18  ;;  %v3731_v15 = vpop.f32.mrf.mxu1 }
 0x601   : > { %v1611_v5 = vmul.f32 0.17677669, %v3731_v15 }
 0x602   : > { %v1560_v51 = vpop.f32.mrf.mxu1 }
 0x603   : > { %v1609_v43 = vmul.f32 0.17677669, %v1560_v51  ;;  %v5465_v14 = vsel %vm943_vm9, %v1611_v5, -1e+30 }
 0x604   : > { %1650 = vmax.xlane.f32.xlu1 %v5465_v14  ;;  %v3734_v55 = vpop.f32.mrf.mxu1 }
 0x605   : > { %v5471_v7 = vsel %vm941_vm10, %v1609_v43, -1e+30  ;;  %v1610_v43 = vmul.f32 0.17677669, %v3730_v21 }
 0x606   : > { %v1573_v35 = vpop.f32.mrf.mxu1 }
 0x607   : > { %v5495_v36 = vsel %vm6491_vm7, %v1610_v43, -1e+30  ;;  %v1612_v57 = vmul.f32 0.17677669, %v1573_v35  ;;  %vm6573_vm7 = vcmp.ge.s32.totalorder %v6572_v29, %v5065_v46 }
 0x608   : > { %1646 = vmax.xlane.f32.xlu1 %v5471_v7  ;;  %v3735_v3 = vpop.f32.mrf.mxu1 }
 0x609   : > { %v1615_v15 = vmul.f32 0.17677669, %v3735_v3  ;;  %v6568_v3 = vld [vmem:[#allocation19_spill] sm:$0xff] }
 0x60a   : > { %v1576_v31 = vpop.f32.mrf.mxu1 }
 0x60b   : > { %v1613_v51 = vmul.f32 0.17677669, %v1576_v31  ;;  %v5477_v5 = vsel %vm947_vm13, %v1615_v15, -1e+30  ;;  %v6567_v31 = vld [vmem:[#allocation14_spill] sm:$0xff] }
 0x60c   : > { %1658 = vmax.xlane.f32.xlu1 %v5477_v5  ;;  %v1608_v15 = vmul.f32 0.17677669, %v1557_v56  ;;  %v3738_v40 = vpop.f32.mrf.mxu1 }
 0x60d   : > { %v5483_v28 = vsel %vm945_vm14, %v1613_v51, -1e+30  ;;  %v1614_v51 = vmul.f32 0.17677669, %v3734_v55  ;;  %v1618_v43 = vmul.f32 0.17677669, %v3738_v40 }
 0x60e   : > { %v5501_v38 = vsel %vm940_vm8, %v1608_v15, -1e+30  ;;  %v1589_v56 = vpop.f32.mrf.mxu1  ;;  %v5513_v55 = vsel %vm6573_vm7, %v1612_v57, -1e+30  ;;  %vm6598_vm7 = vcmp.ge.s32.totalorder %v6569_v33, %v5065_v46 }
 0x60f   : > { %v5507_v21 = vsel %vm946_vm11, %v1614_v51, -1e+30  ;;  %v1616_v9 = vmul.f32 0.17677669, %v1589_v56  ;;  %v5519_v27 = vsel %vm950_vm15, %v1618_v43, -1e+30 }
 0x610   : > { %1654 = vmax.xlane.f32.xlu1 %v5483_v28  ;;  %v3739_v15 = vpop.f32.mrf.mxu1 }
 0x611   : > { %v1619_v53 = vmul.f32 0.17677669, %v3739_v15  ;;  %v5525_v39 = vsel %vm948_vm12, %v1616_v9, -1e+30  ;;  %v6578_v15 = vld [vmem:[#allocation17_spill] sm:$0xff]  ;;  %v6579_v9 = vld [vmem:[#allocation18_spill] sm:$0xff] }
 0x612   : > { %v1592_v51 = vpop.f32.mrf.mxu1 }
 0x613   : > { %v1617_v48 = vmul.f32 0.17677669, %v1592_v51  ;;  %v5530_v54 = vsel %vm951_vm1, %v1619_v53, -1e+30  ;;  %v6580_v53 = vld [vmem:[#allocation20_spill] sm:$0xff] }
 0x615   : > { %v5537_v43 = vsel %vm949_vm2, %v1617_v48, -1e+30 }
 0x616   : > { %1798 = vrot.lane.b32.xlu0 %v4986_v13, %s4563_s18 }
 0x621   : > { %1953 = vrot.lane.b32.xlu1 %v6567_v31, %s4564_s19 }
 0x625   : > { %1949 = vrot.lane.b32.xlu1 %v6568_v3, %s4564_s19 }
 0x635   : > { %1648 = vmax.xlane.f32.xlu0 %v5495_v36 }
 0x639   : > { %1644 = vmax.xlane.f32.xlu0 %v5501_v38 }
 0x63d   : > { %1656 = vmax.xlane.f32.xlu0 %v5507_v21 }
 0x641   : > { %1652 = vmax.xlane.f32.xlu0 %v5513_v55 }
 0x645   : > { %1664 = vmax.xlane.f32.xlu0 %v5519_v27 }
 0x649   : > { %1660 = vmax.xlane.f32.xlu0 %v5525_v39  ;;  %1666 = vmax.xlane.f32.xlu1 %v5530_v54 }
 0x64d   : > { %1662 = vmax.xlane.f32.xlu1 %v5537_v43 }
 0x65f   : > { %1955 = vrot.lane.b32.xlu0 %v6578_v15, %s4564_s19 }
 0x663   : > { %1951 = vrot.lane.b32.xlu0 %v6579_v9, %s4564_s19 }
 0x667   : > { %1947 = vrot.lane.b32.xlu0 %v6580_v53, %s4564_s19 }
 0x681   : > { %v1641_v51 = vpop.xlane.xlu0 %1640 }
 0x682   : > { %v1670_v61 = vsub.f32 %v5441_v37, %v1641_v51  ;;  %v6581_v37 = vld [vmem:[#allocation12_spill] sm:$0xff] }
 0x684   : > { %v1688_v44 = vmul.f32 1.442695, %v1670_v61 }
 0x685   : > { %v1637_v62 = vpop.xlane.xlu0 %1636 }
 0x686   : > { %4195 = vpow2.f32 %v1688_v44  ;;  %v1668_v48 = vsub.f32 %v5447_v1, %v1637_v62 }
 0x687   : > { %v1639_v20 = vpop.xlane.xlu1 %1638 }
 0x688   : > { %v1684_v50 = vmul.f32 1.442695, %v1668_v48  ;;  %v1669_v15 = vsub.f32 %v5453_v6, %v1639_v20 }
 0x689   : > { %v1643_v56 = vpop.xlane.xlu0 %1642 }
 0x68a   : > { %4197 = vpow2.f32 %v1684_v50  ;;  %v1671_v9 = vsub.f32 %v5459_v18, %v1643_v56  ;;  %v1686_v53 = vmul.f32 1.442695, %v1669_v15 }
 0x68c   : > { %v1690_v57 = vmul.f32 1.442695, %v1671_v9 }
 0x68d   : > { %v1799_v40 = vpop.permute.xlu0 %1798  ;;  %v1651_v50 = vpop.xlane.xlu1 %1650 }
 0x68e   : > { %4199 = vpow2.f32 %v1690_v57  ;;  %3752 = vmatprep.subr.bf16.mxu0 %v1799_v40  ;;  %v1675_v56 = vsub.f32 %v5465_v14, %v1651_v50 }
 0x68f   : > { %3753 = vmatpush3.bf16.msra.mxu0 %v1799_v40  ;;  %4201 = vpow2.f32 %v1686_v53 }
 0x690   : > { %3754 = vmatprep.subr.bf16.mxu0 %v1797_v19  ;;  %v1698_v35 = vmul.f32 1.442695, %v1675_v56 }
 0x691   : > { %v1647_v1 = vpop.xlane.xlu1 %1646 }
 0x692   : > { %v1673_v6 = vsub.f32 %v5471_v7, %v1647_v1 }
 0x693   : > { %v5550_v61 = vpop.eup %4195  ;;  %3755 = vmatpush3.bf16.msra.mxu0 %v1797_v19 }
 0x694   : > { %1720 = vadd.xlane.f32.xlu1 %v5550_v61  ;;  %v1694_v15 = vmul.f32 1.442695, %v1673_v6 }
 0x695   : > { %v1659_v19 = vpop.xlane.xlu1 %1658 }
 0x697   : > { %v5553_v44 = vpop.eup %4197 }
 0x698   : > { %1716 = vadd.xlane.f32.xlu1 %v5553_v44 }
 0x699   : > { %v1655_v9 = vpop.xlane.xlu1 %1654 }
 0x69b   : > { %v5556_v20 = vpop.eup %4199 }
 0x69c   : > { %1722 = vadd.xlane.f32.xlu1 %v5556_v20  ;;  %v5559_v62 = vpop.eup %4201 }
 0x69d   : > { %v5569_v7 = vpop.permute.xlu1 %1953 }
 0x6a0   : > { %1718 = vadd.xlane.f32.xlu1 %v5559_v62 }
 0x6b1   : > { %1945 = vrot.lane.b32.xlu1 %v6581_v37, %s4564_s19 }
 0x6be   : > { %v1649_v18 = vpop.xlane.xlu0 %1648 }
 0x6bf   : > { %v1674_v40 = vsub.f32 %v5495_v36, %v1649_v18  ;;  %v1679_v36 = vsub.f32 %v5477_v5, %v1659_v19 }
 0x6c1   : > { %v1696_v57 = vmul.f32 1.442695, %v1674_v40  ;;  %v1706_v18 = vmul.f32 1.442695, %v1679_v36  ;;  %v5574_v40 = vpop.permute.xlu1 %1949 }
 0x6c2   : > { %v1645_v53 = vpop.xlane.xlu0 %1644 }
 0x6c3   : > { %4203 = vpow2.f32 %v1696_v57  ;;  %v1672_v51 = vsub.f32 %v5501_v38, %v1645_v53  ;;  %v1677_v38 = vsub.f32 %v5483_v28, %v1655_v9 }
 0x6c4   : > { %4205 = vpow2.f32 %v1694_v15 }
 0x6c5   : > { %v1692_v48 = vmul.f32 1.442695, %v1672_v51  ;;  %v1702_v5 = vmul.f32 1.442695, %v1677_v38 }
 0x6c6   : > { %v1657_v37 = vpop.xlane.xlu0 %1656 }
 0x6c7   : > { %4207 = vpow2.f32 %v1692_v48  ;;  %v1678_v29 = vsub.f32 %v5507_v21, %v1657_v37 }
 0x6c8   : > { %4209 = vpow2.f32 %v1698_v35 }
 0x6c9   : > { %v1704_v1 = vmul.f32 1.442695, %v1678_v29 }
 0x6ca   : > { %v1653_v14 = vpop.xlane.xlu0 %1652 }
 0x6cb   : > { %4211 = vpow2.f32 %v1704_v1  ;;  %v1676_v50 = vsub.f32 %v5513_v55, %v1653_v14 }
 0x6cd   : > { %v1700_v6 = vmul.f32 1.442695, %v1676_v50 }
 0x6ce   : > { %v1665_v57 = vpop.xlane.xlu0 %1664 }
 0x6cf   : > { %4213 = vpow2.f32 %v1700_v6  ;;  %v1682_v21 = vsub.f32 %v5519_v27, %v1665_v57 }
 0x6d0   : > { %v5577_v37 = vpop.eup %4203  ;;  %4215 = vpow2.f32 %v1706_v18 }
 0x6d1   : > { %v1712_v29 = vmul.f32 1.442695, %v1682_v21  ;;  %1728 = vadd.xlane.f32.xlu0 %v5577_v37  ;;  %v5580_v55 = vpop.eup %4205 }
 0x6d2   : > { %v1661_v35 = vpop.xlane.xlu0 %1660  ;;  %v1667_v19 = vpop.xlane.xlu1 %1666 }
 0x6d3   : > { %4217 = vpow2.f32 %v1712_v29  ;;  %v1680_v28 = vsub.f32 %v5525_v39, %v1661_v35  ;;  %v1683_v56 = vsub.f32 %v5530_v54, %v1667_v19 }
 0x6d4   : > { %v5584_v15 = vpop.eup %4207  ;;  %4219 = vpow2.f32 %v1702_v5 }
 0x6d5   : > { %v1708_v9 = vmul.f32 1.442695, %v1680_v28  ;;  %1724 = vadd.xlane.f32.xlu0 %v5584_v15  ;;  %1726 = vadd.xlane.f32.xlu1 %v5580_v55  ;;  %v1714_v27 = vmul.f32 1.442695, %v1683_v56  ;;  %v5590_v48 = vpop.eup %4209 }
 0x6d6   : > { %v5588_v53 = vpop.permute.xlu0 %1955  ;;  %v1663_v51 = vpop.xlane.xlu1 %1662 }
 0x6d7   : > { %4221 = vpow2.f32 %v1708_v9  ;;  %v1681_v1 = vsub.f32 %v5537_v43, %v1663_v51  ;;  %3964 = vmatprep.subr.msk.bf16.mxu0 %vm976_vm0, %v5588_v53 }
 0x6d8   : > { %v5595_v39 = vpop.eup %4211  ;;  %4223 = vpow2.f32 %v1714_v27 }
 0x6d9   : > { %v1710_v54 = vmul.f32 1.442695, %v1681_v1  ;;  %1730 = vadd.xlane.f32.xlu0 %v5590_v48  ;;  %1736 = vadd.xlane.f32.xlu1 %v5595_v39 }
 0x6db   : > { %4225 = vpow2.f32 %v1710_v54 }
 0x6dc   : > { %v5599_v36 = vpop.eup %4213 }
 0x6dd   : > { %1732 = vadd.xlane.f32.xlu1 %v5599_v36  ;;  %v5602_v14 = vpop.eup %4215 }
 0x6e0   : > { %v5604_v50 = vpop.eup %4217 }
 0x6e1   : > { %1744 = vadd.xlane.f32.xlu0 %v5604_v50  ;;  %1738 = vadd.xlane.f32.xlu1 %v5602_v14  ;;  %v5608_v43 = vpop.eup %4219 }
 0x6e4   : > { %v5610_v6 = vpop.eup %4221 }
 0x6e5   : > { %1740 = vadd.xlane.f32.xlu0 %v5610_v6  ;;  %1734 = vadd.xlane.f32.xlu1 %v5608_v43  ;;  %v5614_v18 = vpop.eup %4223 }
 0x6e8   : > { %v5616_v38 = vpop.eup %4225 }
 0x6e9   : > { %1746 = vadd.xlane.f32.xlu0 %v5614_v18  ;;  %1742 = vadd.xlane.f32.xlu1 %v5616_v38 }
 0x6fa   : > { %1941 = vrot.lane.b32.xlu1 %v4929_v2, %s4564_s19 }
 0x6fe   : > { %1927 = vrot.lane.b32.xlu1 %v4939_v8, %s4564_s19 }
 0x6ff   : > { %1943 = vrot.lane.b32.xlu0 %v4941_v17, %s4564_s19 }
 0x702   : > { %1931 = vrot.lane.b32.xlu1 %v4949_v47, %s4564_s19 }
 0x703   : > { %1925 = vrot.lane.b32.xlu0 %v4925_v0, %s4564_s19 }
 0x706   : > { %1935 = vrot.lane.b32.xlu1 %v4968_v4, %s4564_s19 }
 0x707   : > { %1929 = vrot.lane.b32.xlu0 %v4943_v26, %s4564_s19 }
 0x70a   : > { %1939 = vrot.lane.b32.xlu1 %v4996_v63, %s4564_s19 }
 0x70b   : > { %1933 = vrot.lane.b32.xlu0 %v4958_v45, %s4564_s19 }
 0x70e   : > { %2298 = vrot.lane.b32.xlu1 %v4955_v58, %s4564_s19 }
 0x70f   : > { %1937 = vrot.lane.b32.xlu0 %v4978_v59, %s4564_s19 }
 0x712   : > { %2290 = vrot.lane.b32.xlu1 %v4976_v23, %s4564_s19 }
 0x713   : > { %2300 = vrot.lane.b32.xlu0 %v4953_v41, %s4564_s19 }
 0x716   : > { %2286 = vrot.lane.b32.xlu1 %v4994_v32, %s4564_s19 }
 0x717   : > { %2296 = vrot.lane.b32.xlu0 %v4962_v49, %s4564_s19 }
 0x71b   : > { %2294 = vrot.lane.b32.xlu0 %v4966_v52, %s4564_s19 }
 0x71d   : > { %v1721_v57 = vpop.xlane.xlu1 %1720 }
 0x71f   : > { %2292 = vrot.lane.b32.xlu0 %v4972_v30, %s4564_s19 }
 0x721   : > { %v1717_v21 = vpop.xlane.xlu1 %1716 }
 0x725   : > { %v1723_v29 = vpop.xlane.xlu1 %1722 }
 0x726   : > { %4227 = vrcp.f32 %v1723_v29 }
 0x727   : > { %4229 = vrcp.f32 %v1717_v21  ;;  %v1952_v21 = vpop.permute.xlu0 %1951 }
 0x728   : > { %4231 = vrcp.f32 %v1721_v57  ;;  %v2003_v57 = vsel %vm976_vm0, %v5588_v53, 0 }
 0x729   : > { %v1719_v5 = vpop.xlane.xlu1 %1718 }
 0x72a   : > { %4233 = vrcp.f32 %v1719_v5 }
 0x733   : > { %v4228_v35 = vpop.eup %4227 }
 0x734   : > { %v4230_v19 = vpop.eup %4229  ;;  %v1767_v9 = vmul.f32 %v4228_v35, %v5556_v20  ;;  %v2000_v20 = vsel %vm976_vm0, %v5569_v7, 0 }
 0x735   : > { %v4232_v28 = vpop.eup %4231  ;;  %v1764_v27 = vmul.f32 %v4230_v19, %v5553_v44  ;;  %v1948_v44 = vpop.permute.xlu0 %1947 }
 0x736   : > { %v1766_v1 = vmul.f32 %v4232_v28, %v5550_v61  ;;  %v1997_v61 = vsel %vm976_vm0, %v1952_v21, 0 }
 0x737   : > { %v4234_v56 = vpop.eup %4233 }
 0x738   : > { %v1765_v51 = vmul.f32 %v4234_v56, %v5559_v62  ;;  %v1781_v32 = vpack.c.bf16 %v1767_v9, %v1766_v1  ;;  %v1946_v62 = vpop.permute.xlu1 %1945 }
 0x73a   : > { %v1780_v54 = vpack.c.bf16 %v1765_v51, %v1764_v27 }
 0x73c   : > { %3756 = vmatprep.mubr.bf16.mxu0 %v1780_v54 }
 0x73d   : > { %3757 = vmatmul.mubr.bf16.vlgmr.msra.gmra.mxu0 %v1781_v32  ;;  %v1994_v32 = vsel %vm976_vm0, %v5574_v40, 0 }
 0x73e   : > { %3773 = vmatpush3.bf16.xpose.msra.mxu0 %v2003_v57 }
 0x73f   : > { %3965 = vmatprep.subr.msk.bf16.mxu0 %vm976_vm0, %v5569_v7  ;;  %v1991_v7 = vsel %vm976_vm0, %v1948_v44, 0 }
 0x746   : > { %3775 = vmatpush3.bf16.xpose.msra.mxu0 %v2000_v20 }
 0x747   : > { %3966 = vmatprep.subr.msk.bf16.mxu0 %vm976_vm0, %v1952_v21 }
 0x74e   : > { %3777 = vmatpush3.bf16.xpose.msra.mxu0 %v1997_v61 }
 0x74f   : > { %3967 = vmatprep.subr.msk.bf16.mxu0 %vm976_vm0, %v5574_v40  ;;  %v1988_v40 = vsel %vm976_vm0, %v1946_v62, 0 }
 0x756   : > { %3779 = vmatpush3.bf16.xpose.msra.mxu0 %v1994_v32 }
 0x757   : > { %3968 = vmatprep.subr.msk.bf16.mxu0 %vm976_vm0, %v1948_v44 }
 0x75a   : > { %v1729_v53 = vpop.xlane.xlu0 %1728 }
 0x75e   : > { %3781 = vmatpush3.bf16.xpose.msra.mxu0 %v1991_v7  ;;  %v1725_v29 = vpop.xlane.xlu0 %1724  ;;  %v1727_v5 = vpop.xlane.xlu1 %1726 }
 0x75f   : > { %4235 = vrcp.f32 %v1725_v29  ;;  %3969 = vmatprep.subr.msk.bf16.mxu0 %vm976_vm0, %v1946_v62 }
 0x760   : > { %4237 = vrcp.f32 %v1727_v5 }
 0x761   : > { %4239 = vrcp.f32 %v1729_v53 }
 0x762   : > { %v1731_v35 = vpop.xlane.xlu0 %1730  ;;  %v1737_v19 = vpop.xlane.xlu1 %1736 }
 0x763   : > { %4241 = vrcp.f32 %v1731_v35 }
 0x766   : > { %3783 = vmatpush3.bf16.xpose.msra.mxu0 %v1988_v40  ;;  %v1733_v28 = vpop.xlane.xlu1 %1732 }
 0x76a   : > { %v1745_v56 = vpop.xlane.xlu0 %1744  ;;  %v1739_v9 = vpop.xlane.xlu1 %1738 }
 0x76b   : > { %4243 = vrcp.f32 %v1739_v9 }
 0x76c   : > { %v4236_v27 = vpop.eup %4235  ;;  %4245 = vrcp.f32 %v1733_v28 }
 0x76d   : > { %v4238_v51 = vpop.eup %4237  ;;  %v1768_v1 = vmul.f32 %v4236_v27, %v5584_v15  ;;  %4247 = vrcp.f32 %v1737_v19 }
 0x76e   : > { %v4240_v54 = vpop.eup %4239  ;;  %v1741_v57 = vpop.xlane.xlu0 %1740  ;;  %v1769_v21 = vmul.f32 %v4238_v51, %v5580_v55 }
 0x76f   : > { %v1735_v20 = vpop.xlane.xlu1 %1734  ;;  %v1770_v44 = vmul.f32 %v4240_v54, %v5577_v37 }
 0x770   : > { %v4242_v61 = vpop.eup %4241  ;;  %4249 = vrcp.f32 %v1735_v20  ;;  %v1782_v32 = vpack.c.bf16 %v1769_v21, %v1768_v1 }
 0x771   : > { %v1771_v62 = vmul.f32 %v4242_v61, %v5590_v48  ;;  %4251 = vrcp.f32 %v1741_v57 }
 0x772   : > { %3760 = vmatprep.mubr.bf16.mxu0 %v1782_v32  ;;  %v1747_v53 = vpop.xlane.xlu0 %1746 }
 0x773   : > { %v1743_v7 = vpop.xlane.xlu1 %1742  ;;  %v1783_v29 = vpack.c.bf16 %v1771_v62, %v1770_v44 }
 0x774   : > { %4253 = vrcp.f32 %v1743_v7 }
 0x775   : > { %4255 = vrcp.f32 %v1747_v53  ;;  %3761 = vmatmul.mubr.bf16.gmra.mxu0 %v1783_v29 }
 0x776   : > { %v1944_v15 = vpop.permute.xlu0 %1943  ;;  %4257 = vrcp.f32 %v1745_v56 }
 0x777   : > { %v1942_v5 = vpop.permute.xlu1 %1941  ;;  %3970 = vmatprep.subr.msk.bf16.mxu0 %vm976_vm0, %v1944_v15  ;;  %v1985_v55 = vsel %vm976_vm0, %v1944_v15, 0 }
 0x778   : > { %3785 = vmatpush3.bf16.xpose.msra.mxu0 %v1985_v55  ;;  %v4244_v37 = vpop.eup %4243  ;;  %v1982_v57 = vsel %vm976_vm0, %v1942_v5, 0 }
 0x779   : > { %3971 = vmatprep.subr.msk.bf16.mxu0 %vm976_vm0, %v1942_v5  ;;  %v4246_v19 = vpop.eup %4245  ;;  %v1775_v9 = vmul.f32 %v4244_v37, %v5602_v14 }
 0x77a   : > { %v1926_v48 = vpop.permute.xlu0 %1925  ;;  %v4248_v40 = vpop.eup %4247  ;;  %v1772_v1 = vmul.f32 %v4246_v19, %v5599_v36 }
 0x77b   : > { %v1928_v35 = vpop.permute.xlu1 %1927  ;;  %v1774_v20 = vmul.f32 %v4248_v40, %v5595_v39 }
 0x77d   : > { %v4250_v28 = vpop.eup %4249  ;;  %v1785_v32 = vpack.c.bf16 %v1775_v9, %v1774_v20 }
 0x77e   : > { %v1930_v27 = vpop.permute.xlu0 %1929  ;;  %v1773_v56 = vmul.f32 %v4250_v28, %v5608_v43  ;;  %v4252_v54 = vpop.eup %4251 }
 0x77f   : > { %v1932_v51 = vpop.permute.xlu1 %1931  ;;  %v1776_v14 = vmul.f32 %v4252_v54, %v5610_v6 }
 0x780   : > { %3787 = vmatpush3.bf16.xpose.msra.mxu0 %v1982_v57  ;;  %v1784_v21 = vpack.c.bf16 %v1773_v56, %v1772_v1 }
 0x781   : > { %v4254_v61 = vpop.eup %4253 }
 0x782   : > { %v4256_v44 = vpop.eup %4255  ;;  %3764 = vmatprep.mubr.bf16.mxu0 %v1784_v21  ;;  %v1934_v62 = vpop.permute.xlu0 %1933  ;;  %v1777_v7 = vmul.f32 %v4254_v61, %v5616_v38 }
 0x783   : > { %v1936_v53 = vpop.permute.xlu1 %1935  ;;  %3765 = vmatmul.mubr.bf16.gmra.mxu0 %v1785_v32  ;;  %v4258_v36 = vpop.eup %4257  ;;  %v1779_v29 = vmul.f32 %v4256_v44, %v5614_v18 }
 0x784   : > { %v1786_v43 = vpack.c.bf16 %v1777_v7, %v1776_v14  ;;  %v1778_v5 = vmul.f32 %v4258_v36, %v5604_v50 }
 0x786   : > { %3768 = vmatprep.mubr.bf16.mxu0 %v1786_v43  ;;  %v1938_v15 = vpop.permute.xlu0 %1937  ;;  %v1787_v55 = vpack.c.bf16 %v1779_v29, %v1778_v5 }
 0x787   : > { %v1940_v39 = vpop.permute.xlu1 %1939 }
 0x78a   : > { %v2301_v37 = vpop.permute.xlu0 %2300 }
 0x78b   : > { %3769 = vmatmul.mubr.bf16.gmra.mxu0 %v1787_v55  ;;  %3804 = vmatprep.subr.bf16.mxu1 %v2301_v37  ;;  %v2299_v19 = vpop.permute.xlu1 %2298 }
 0x78c   : > { %3788 = vmatprep.mubr.msk.bf16.mxu0 %vm976_vm0, %v1926_v48  ;;  %3805 = vmatpush3.bf16.msra.mxu1 %v2301_v37 }
 0x78d   : > { %3806 = vmatprep.subr.bf16.mxu1 %v2299_v19 }
 0x78e   : > { %v2297_v6 = vpop.permute.xlu0 %2296 }
 0x78f   : > { %v2291_v18 = vpop.permute.xlu1 %2290 }
 0x790   : > { %3807 = vmatpush3.bf16.msra.mxu1 %v2299_v19 }
 0x791   : > { %3808 = vmatprep.subr.bf16.mxu1 %v2297_v6 }
 0x792   : > { %v2295_v38 = vpop.permute.xlu0 %2294 }
 0x793   : > { %3789 = vmatmul.mubr.msk.bf16.vlgmr.msra.gmra.mxu0 %vm976_vm0, %v1928_v35 }
 0x794   : > { %3792 = vmatprep.mubr.msk.bf16.mxu0 %vm976_vm0, %v1930_v27  ;;  %3809 = vmatpush3.bf16.msra.mxu1 %v2297_v6 }
 0x795   : > { %3810 = vmatprep.subr.bf16.mxu1 %v2295_v38 }
 0x796   : > { %v2293_v50 = vpop.permute.xlu0 %2292 }
 0x798   : > { %3811 = vmatpush3.bf16.msra.mxu1 %v2295_v38 }
 0x799   : > { %3812 = vmatprep.subr.bf16.mxu1 %v2293_v50 }
 0x79b   : > { %3793 = vmatmul.mubr.msk.bf16.gmra.mxu0 %vm976_vm0, %v1932_v51 }
 0x79c   : > { %3796 = vmatprep.mubr.msk.bf16.mxu0 %vm976_vm0, %v1934_v62  ;;  %3813 = vmatpush3.bf16.msra.mxu1 %v2293_v50 }
 0x79d   : > { %3814 = vmatprep.subr.bf16.mxu1 %v2291_v18 }
 0x7a0   : > { %3815 = vmatpush3.bf16.msra.mxu1 %v2291_v18 }
 0x7a3   : > { %3797 = vmatmul.mubr.msk.bf16.gmra.mxu0 %vm976_vm0, %v1936_v53 }
 0x7a4   : > { %3800 = vmatprep.mubr.msk.bf16.mxu0 %vm976_vm0, %v1938_v15 }
 0x7ab   : > { %3801 = vmatmul.mubr.msk.bf16.gmra.mxu0 %vm976_vm0, %v1940_v39 }
 0x7fd   : > { %v5698_v48 = vpop.f32.mrf.mxu0 }
 0x7fe   : > { %6582 = vst [vmem:[#allocation14_spill] sm:$0xff] %v5698_v48 }
 0x7ff   : > { %v5700_v35 = vpop.f32.mrf.mxu0 }
 0x800   : > { %6583 = vst [vmem:[#allocation19_spill] sm:$0xff] %v5700_v35 }
 0x801   : > { %v5702_v40 = vpop.f32.mrf.mxu0 }
 0x802   : > { %6584 = vst [vmem:[#allocation23_spill] sm:$0xff] %v5702_v40 }
 0x803   : > { %v5706_v9 = vpop.f32.mrf.mxu0 }
 0x804   : > { %6585 = vst [vmem:[#allocation24_spill] sm:$0xff] %v5706_v9 }
 0x835   : > { %v5710_v51 = vpop.f32.mrf.mxu0 }
 0x836   : > { %6586 = vst [vmem:[#allocation25_spill] sm:$0xff] %v5710_v51 }
 0x837   : > { %v5712_v1 = vpop.f32.mrf.mxu0 }
 0x838   : > { %6587 = vst [vmem:[#allocation45_spill] sm:$0xff] %v5712_v1 }
 0x839   : > { %v5714_v56 = vpop.f32.mrf.mxu0 }
 0x83a   : > { %6588 = vst [vmem:[#allocation46_spill] sm:$0xff] %v5714_v56 }
 0x83b   : > { %v5718_v57 = vpop.f32.mrf.mxu0 }
 0x83c   : > { %6589 = vst [vmem:[#allocation47_spill] sm:$0xff] %v5718_v57 }
 0x843   : > { %v5722_v21 = vpop.f32.mrf.mxu0 }
 0x844   : > { %6590 = vst [vmem:[#allocation48_spill] sm:$0xff] %v5722_v21 }
 0x845   : > { %v5724_v61 = vpop.f32.mrf.mxu0 }
 0x846   : > { %6591 = vst [vmem:[#allocation49_spill] sm:$0xff] %v5724_v61 }
 0x847   : > { %v5726_v32 = vpop.f32.mrf.mxu0 }
 0x848   : > { %6592 = vst [vmem:[#allocation50_spill] sm:$0xff] %v5726_v32 }
 0x849   : > { %v5730_v62 = vpop.f32.mrf.mxu0 }
 0x84a   : > { %6593 = vst [vmem:[#allocation51_spill] sm:$0xff] %v5730_v62 }
 0x84b   : > { %v5734_v14 = vpop.f32.mrf.mxu0 }
 0x84c   : > { %6594 = vst [vmem:[#allocation52_spill] sm:$0xff] %v5734_v14 }
 0x84d   : > { %v5736_v7 = vpop.f32.mrf.mxu0 }
 0x84e   : > { %6595 = vst [vmem:[#allocation53_spill] sm:$0xff] %v5736_v7  ;;  %v2287_v7 = vpop.permute.xlu1 %2286 }
 0x84f   : > { %v5738_v36 = vpop.f32.mrf.mxu0 }
 0x850   : > { %6596 = vst [vmem:[#allocation54_spill] sm:$0xff] %v5738_v36 }
 0x851   : > { %v5742_v29 = vpop.f32.mrf.mxu0 }
 0x852   : > { %6597 = vst [vmem:[#allocation55_spill] sm:$0xff] %v5742_v29 }
 0x853   : > { %v3790_v39 = vpop.f32.mrf.mxu0 }
 0x854   : > { %v2104_v5 = vmul.f32 0.17677669, %v3790_v39 }
 0x855   : > { %v2039_v55 = vpop.f32.mrf.mxu0 }
 0x856   : > { %v2102_v37 = vmul.f32 0.17677669, %v2039_v55  ;;  %v5749_v19 = vsel %vm938_vm3, %v2104_v5, -1e+30 }
 0x857   : > { %2138 = vmax.xlane.f32.xlu0 %v5749_v19  ;;  %v3791_v6 = vpop.f32.mrf.mxu0 }
 0x858   : > { %v2105_v50 = vmul.f32 0.17677669, %v3791_v6  ;;  %v5755_v54 = vsel %vm936_vm4, %v2102_v37, -1e+30 }
 0x859   : > { %v2042_v38 = vpop.f32.mrf.mxu0 }
 0x85a   : > { %v2103_v18 = vmul.f32 0.17677669, %v2042_v38  ;;  %v5767_v6 = vsel %vm939_vm5, %v2105_v50, -1e+30 }
 0x85b   : > { %2134 = vmax.xlane.f32.xlu0 %v5755_v54  ;;  %v3794_v39 = vpop.f32.mrf.mxu0 }
 0x85c   : > { %v5761_v55 = vsel %vm937_vm6, %v2103_v18, -1e+30 }
 0x85d   : > { %2136 = vmax.xlane.f32.xlu1 %v5761_v55  ;;  %v2055_v5 = vpop.f32.mrf.mxu0 }
 0x85f   : > { %2140 = vmax.xlane.f32.xlu0 %v5767_v6  ;;  %v3795_v37 = vpop.f32.mrf.mxu0 }
 0x860   : > { %v2109_v38 = vmul.f32 0.17677669, %v3795_v37 }
 0x861   : > { %v2058_v20 = vpop.f32.mrf.mxu0 }
 0x862   : > { %v2107_v27 = vmul.f32 0.17677669, %v2058_v20  ;;  %v5773_v43 = vsel %vm943_vm9, %v2109_v38, -1e+30 }
 0x863   : > { %2148 = vmax.xlane.f32.xlu1 %v5773_v43  ;;  %v3798_v18 = vpop.f32.mrf.mxu0 }
 0x864   : > { %v5779_v50 = vsel %vm941_vm10, %v2107_v27, -1e+30  ;;  %v2106_v27 = vmul.f32 0.17677669, %v2055_v5 }
 0x865   : > { %v2071_v15 = vpop.f32.mrf.mxu0 }
 0x867   : > { %2144 = vmax.xlane.f32.xlu1 %v5779_v50  ;;  %v3799_v44 = vpop.f32.mrf.mxu0 }
 0x868   : > { %v2113_v37 = vmul.f32 0.17677669, %v3799_v44 }
 0x869   : > { %v2074_v28 = vpop.f32.mrf.mxu0 }
 0x86a   : > { %v2111_v20 = vmul.f32 0.17677669, %v2074_v28  ;;  %v5785_v38 = vsel %vm947_vm13, %v2113_v37, -1e+30  ;;  %v2108_v28 = vmul.f32 0.17677669, %v3794_v39 }
 0x86b   : > { %2156 = vmax.xlane.f32.xlu1 %v5785_v38  ;;  %v2112_v37 = vmul.f32 0.17677669, %v3798_v18  ;;  %v3802_v51 = vpop.f32.mrf.mxu0 }
 0x86c   : > { %v5791_v53 = vsel %vm945_vm14, %v2111_v20, -1e+30  ;;  %v5803_v44 = vsel %vm6598_vm7, %v2108_v28, -1e+30  ;;  %v5809_v20 = vsel %vm940_vm8, %v2106_v27, -1e+30 }
 0x86d   : > { %v2087_v39 = vpop.f32.mrf.mxu0  ;;  %v2116_v5 = vmul.f32 0.17677669, %v3802_v51  ;;  %v6599_v28 = vld [vmem:[#allocation26_spill] sm:$0xff] }
 0x86e   : > { %vm6600_vm7 = vcmp.ge.s32.totalorder %v6599_v28, %v5065_v46  ;;  %v2114_v56 = vmul.f32 0.17677669, %v2087_v39 }
 0x86f   : > { %2152 = vmax.xlane.f32.xlu1 %v5791_v53  ;;  %v3803_v27 = vpop.f32.mrf.mxu0  ;;  %v5827_v57 = vsel %vm950_vm15, %v2116_v5, -1e+30 }
 0x870   : > { %v2117_v1 = vmul.f32 0.17677669, %v3803_v27  ;;  %v5833_v9 = vsel %vm948_vm12, %v2114_v56, -1e+30  ;;  %v6605_v27 = vld [vmem:[#allocation17_spill] sm:$0xff]  ;;  %v6606_v56 = vld [vmem:[#allocation18_spill] sm:$0xff] }
 0x872   : > { %v5838_v14 = vsel %vm951_vm1, %v2117_v1, -1e+30  ;;  %v6607_v1 = vld [vmem:[#allocation20_spill] sm:$0xff] }
 0x875   : > { %2288 = vrot.lane.b32.xlu0 %v4986_v13, %s4564_s19 }
 0x880   : > { %2443 = vrot.lane.b32.xlu1 %v6567_v31, %s4565_s14  ;;  %v2110_v31 = vmul.f32 0.17677669, %v2071_v15 }
 0x882   : > { %v5821_v18 = vsel %vm6600_vm7, %v2110_v31, -1e+30 }
 0x884   : > { %2439 = vrot.lane.b32.xlu1 %v6568_v3, %s4565_s14  ;;  %v5815_v3 = vsel %vm946_vm11, %v2112_v37, -1e+30  ;;  %v2090_v37 = vpop.f32.mrf.mxu0 }
 0x885   : > { %v2115_v35 = vmul.f32 0.17677669, %v2090_v37 }
 0x887   : > { %v5845_v5 = vsel %vm949_vm2, %v2115_v35, -1e+30 }
 0x894   : > { %2146 = vmax.xlane.f32.xlu0 %v5803_v44 }
 0x898   : > { %2142 = vmax.xlane.f32.xlu0 %v5809_v20 }
 0x89c   : > { %2154 = vmax.xlane.f32.xlu0 %v5815_v3 }
 0x8a0   : > { %2150 = vmax.xlane.f32.xlu0 %v5821_v18 }
 0x8a4   : > { %2162 = vmax.xlane.f32.xlu0 %v5827_v57 }
 0x8a8   : > { %2158 = vmax.xlane.f32.xlu0 %v5833_v9  ;;  %2164 = vmax.xlane.f32.xlu1 %v5838_v14 }
 0x8ac   : > { %2160 = vmax.xlane.f32.xlu1 %v5845_v5 }
 0x8be   : > { %2445 = vrot.lane.b32.xlu0 %v6605_v27, %s4565_s14 }
 0x8c2   : > { %2441 = vrot.lane.b32.xlu0 %v6606_v56, %s4565_s14 }
 0x8c6   : > { %2437 = vrot.lane.b32.xlu0 %v6607_v1, %s4565_s14 }
 0x8e0   : > { %v2139_v37 = vpop.xlane.xlu0 %2138 }
 0x8e1   : > { %v2168_v36 = vsub.f32 %v5749_v19, %v2139_v37 }
 0x8e3   : > { %v2186_v29 = vmul.f32 1.442695, %v2168_v36 }
 0x8e4   : > { %v2135_v21 = vpop.xlane.xlu0 %2134 }
 0x8e5   : > { %4259 = vpow2.f32 %v2186_v29  ;;  %v2166_v35 = vsub.f32 %v5755_v54, %v2135_v21  ;;  %v6608_v21 = vld [vmem:[#allocation12_spill] sm:$0xff] }
 0x8e6   : > { %v2137_v32 = vpop.xlane.xlu1 %2136 }
 0x8e7   : > { %v2182_v48 = vmul.f32 1.442695, %v2166_v35  ;;  %v2167_v27 = vsub.f32 %v5761_v55, %v2137_v32 }
 0x8e8   : > { %v2141_v40 = vpop.xlane.xlu0 %2140 }
 0x8e9   : > { %4261 = vpow2.f32 %v2182_v48  ;;  %v2169_v56 = vsub.f32 %v5767_v6, %v2141_v40  ;;  %v2184_v1 = vmul.f32 1.442695, %v2167_v27 }
 0x8eb   : > { %v2188_v13 = vmul.f32 1.442695, %v2169_v56 }
 0x8ec   : > { %v2289_v61 = vpop.permute.xlu0 %2288 }
 0x8ed   : > { %4263 = vpow2.f32 %v2188_v13  ;;  %3816 = vmatprep.subr.bf16.mxu1 %v2289_v61  ;;  %v2149_v13 = vpop.xlane.xlu1 %2148 }
 0x8ee   : > { %3817 = vmatpush3.bf16.msra.mxu1 %v2289_v61  ;;  %4265 = vpow2.f32 %v2184_v1  ;;  %v2173_v6 = vsub.f32 %v5773_v43, %v2149_v13 }
 0x8ef   : > { %3818 = vmatprep.subr.bf16.mxu1 %v2287_v7 }
 0x8f0   : > { %v2196_v62 = vmul.f32 1.442695, %v2173_v6 }
 0x8f1   : > { %v2145_v61 = vpop.xlane.xlu1 %2144 }
 0x8f2   : > { %v5858_v36 = vpop.eup %4259  ;;  %3819 = vmatpush3.bf16.msra.mxu1 %v2287_v7  ;;  %v2171_v7 = vsub.f32 %v5779_v50, %v2145_v61 }
 0x8f3   : > { %2218 = vadd.xlane.f32.xlu1 %v5858_v36 }
 0x8f4   : > { %v2192_v37 = vmul.f32 1.442695, %v2171_v7 }
 0x8f5   : > { %v2157_v32 = vpop.xlane.xlu1 %2156 }
 0x8f6   : > { %v5861_v54 = vpop.eup %4261 }
 0x8f7   : > { %2214 = vadd.xlane.f32.xlu1 %v5861_v54 }
 0x8f9   : > { %v2153_v35 = vpop.xlane.xlu1 %2152 }
 0x8fa   : > { %v5864_v48 = vpop.eup %4263 }
 0x8fb   : > { %2220 = vadd.xlane.f32.xlu1 %v5864_v48  ;;  %v5867_v40 = vpop.eup %4265 }
 0x8fd   : > { %v5877_v50 = vpop.permute.xlu1 %2443 }
 0x8ff   : > { %2216 = vadd.xlane.f32.xlu1 %v5867_v40 }
 0x910   : > { %2435 = vrot.lane.b32.xlu1 %v6608_v21, %s4565_s14 }
 0x91d   : > { %v2147_v29 = vpop.xlane.xlu0 %2146 }
 0x91e   : > { %v2172_v19 = vsub.f32 %v5803_v44, %v2147_v29  ;;  %v2177_v44 = vsub.f32 %v5785_v38, %v2157_v32 }
 0x920   : > { %v2194_v55 = vmul.f32 1.442695, %v2172_v19  ;;  %v2204_v29 = vmul.f32 1.442695, %v2177_v44  ;;  %v5882_v19 = vpop.permute.xlu1 %2439 }
 0x921   : > { %v2143_v27 = vpop.xlane.xlu0 %2142 }
 0x922   : > { %4267 = vpow2.f32 %v2194_v55  ;;  %v2170_v56 = vsub.f32 %v5809_v20, %v2143_v27  ;;  %v2175_v20 = vsub.f32 %v5791_v53, %v2153_v35 }
 0x923   : > { %4269 = vpow2.f32 %v2192_v37 }
 0x924   : > { %v2190_v1 = vmul.f32 1.442695, %v2170_v56 }
 0x925   : > { %v2155_v21 = vpop.xlane.xlu0 %2154 }
 0x926   : > { %4271 = vpow2.f32 %v2190_v1  ;;  %v2176_v23 = vsub.f32 %v5815_v3, %v2155_v21 }
 0x927   : > { %4273 = vpow2.f32 %v2196_v62  ;;  %v2200_v62 = vmul.f32 1.442695, %v2175_v20 }
 0x928   : > { %v2202_v61 = vmul.f32 1.442695, %v2176_v23 }
 0x929   : > { %v2151_v43 = vpop.xlane.xlu0 %2150 }
 0x92a   : > { %4275 = vpow2.f32 %v2202_v61  ;;  %v2174_v13 = vsub.f32 %v5821_v18, %v2151_v43 }
 0x92c   : > { %v2198_v7 = vmul.f32 1.442695, %v2174_v13 }
 0x92d   : > { %v2163_v55 = vpop.xlane.xlu0 %2162 }
 0x92e   : > { %4277 = vpow2.f32 %v2198_v7  ;;  %v2180_v3 = vsub.f32 %v5827_v57, %v2163_v55 }
 0x92f   : > { %v5885_v6 = vpop.eup %4267  ;;  %4279 = vpow2.f32 %v2204_v29 }
 0x930   : > { %v2210_v23 = vmul.f32 1.442695, %v2180_v3  ;;  %2226 = vadd.xlane.f32.xlu0 %v5885_v6  ;;  %v5888_v18 = vpop.eup %4269 }
 0x931   : > { %v2159_v38 = vpop.xlane.xlu0 %2158  ;;  %v2165_v32 = vpop.xlane.xlu1 %2164 }
 0x932   : > { %4281 = vpow2.f32 %v2210_v23  ;;  %v2178_v53 = vsub.f32 %v5833_v9, %v2159_v38  ;;  %v2181_v37 = vsub.f32 %v5838_v14, %v2165_v32  ;;  %v2490_v23 = vsel %vm976_vm0, %v5877_v50, 0 }
 0x933   : > { %v5892_v35 = vpop.eup %4271  ;;  %4283 = vpow2.f32 %v2200_v62 }
 0x934   : > { %v2206_v27 = vmul.f32 1.442695, %v2178_v53  ;;  %2222 = vadd.xlane.f32.xlu0 %v5892_v35  ;;  %2224 = vadd.xlane.f32.xlu1 %v5888_v18  ;;  %v2212_v57 = vmul.f32 1.442695, %v2181_v37  ;;  %v5896_v21 = vpop.eup %4273 }
 0x935   : > { %v2446_v56 = vpop.permute.xlu0 %2445  ;;  %v2161_v1 = vpop.xlane.xlu1 %2160 }
 0x936   : > { %4285 = vpow2.f32 %v2206_v27  ;;  %v2179_v61 = vsub.f32 %v5845_v5, %v2161_v1  ;;  %3972 = vmatprep.subr.msk.bf16.mxu1 %vm976_vm0, %v2446_v56  ;;  %v2493_v3 = vsel %vm976_vm0, %v2446_v56, 0 }
 0x937   : > { %v5900_v9 = vpop.eup %4275  ;;  %4287 = vpow2.f32 %v2212_v57 }
 0x938   : > { %v2208_v14 = vmul.f32 1.442695, %v2179_v61  ;;  %2228 = vadd.xlane.f32.xlu0 %v5896_v21  ;;  %2234 = vadd.xlane.f32.xlu1 %v5900_v9 }
 0x93a   : > { %4289 = vpow2.f32 %v2208_v14 }
 0x93b   : > { %v5904_v44 = vpop.eup %4277 }
 0x93c   : > { %2230 = vadd.xlane.f32.xlu1 %v5904_v44  ;;  %v5907_v43 = vpop.eup %4279 }
 0x93f   : > { %v5909_v13 = vpop.eup %4281 }
 0x940   : > { %2242 = vadd.xlane.f32.xlu0 %v5909_v13  ;;  %2236 = vadd.xlane.f32.xlu1 %v5907_v43  ;;  %v5913_v5 = vpop.eup %4283 }
 0x943   : > { %v5915_v7 = vpop.eup %4285 }
 0x944   : > { %2238 = vadd.xlane.f32.xlu0 %v5915_v7  ;;  %2232 = vadd.xlane.f32.xlu1 %v5913_v5  ;;  %v5919_v29 = vpop.eup %4287 }
 0x947   : > { %v5921_v20 = vpop.eup %4289 }
 0x948   : > { %2244 = vadd.xlane.f32.xlu0 %v5919_v29  ;;  %2240 = vadd.xlane.f32.xlu1 %v5921_v20 }
 0x959   : > { %2431 = vrot.lane.b32.xlu1 %v4929_v2, %s4565_s14 }
 0x95d   : > { %2417 = vrot.lane.b32.xlu1 %v4939_v8, %s4565_s14 }
 0x95e   : > { %2433 = vrot.lane.b32.xlu0 %v4941_v17, %s4565_s14 }
 0x961   : > { %2421 = vrot.lane.b32.xlu1 %v4949_v47, %s4565_s14 }
 0x962   : > { %2415 = vrot.lane.b32.xlu0 %v4925_v0, %s4565_s14 }
 0x965   : > { %2425 = vrot.lane.b32.xlu1 %v4968_v4, %s4565_s14 }
 0x966   : > { %2419 = vrot.lane.b32.xlu0 %v4943_v26, %s4565_s14 }
 0x969   : > { %2429 = vrot.lane.b32.xlu1 %v4996_v63, %s4565_s14 }
 0x96a   : > { %2423 = vrot.lane.b32.xlu0 %v4958_v45, %s4565_s14 }
 0x96d   : > { %2788 = vrot.lane.b32.xlu1 %v4955_v58, %s4565_s14 }
 0x96e   : > { %2427 = vrot.lane.b32.xlu0 %v4978_v59, %s4565_s14 }
 0x972   : > { %2790 = vrot.lane.b32.xlu0 %v4953_v41, %s4565_s14 }
 0x976   : > { %2786 = vrot.lane.b32.xlu0 %v4962_v49, %s4565_s14 }
 0x97c   : > { %v2219_v0 = vpop.xlane.xlu1 %2218 }
 0x980   : > { %v2215_v2 = vpop.xlane.xlu1 %2214 }
 0x984   : > { %v2221_v8 = vpop.xlane.xlu1 %2220 }
 0x985   : > { %4291 = vrcp.f32 %v2221_v8 }
 0x986   : > { %4293 = vrcp.f32 %v2215_v2 }
 0x987   : > { %4295 = vrcp.f32 %v2219_v0 }
 0x988   : > { %v2217_v17 = vpop.xlane.xlu1 %2216 }
 0x989   : > { %4297 = vrcp.f32 %v2217_v17 }
 0x98c   : > { %v2436_v62 = vpop.permute.xlu1 %2435 }
 0x992   : > { %v4292_v26 = vpop.eup %4291 }
 0x993   : > { %v4294_v47 = vpop.eup %4293  ;;  %v2265_v4 = vmul.f32 %v4292_v26, %v5864_v48  ;;  %v2442_v48 = vpop.permute.xlu0 %2441 }
 0x994   : > { %v4296_v58 = vpop.eup %4295  ;;  %v2262_v59 = vmul.f32 %v4294_v47, %v5861_v54  ;;  %v2487_v54 = vsel %vm976_vm0, %v2442_v48, 0 }
 0x995   : > { %v2264_v49 = vmul.f32 %v4296_v58, %v5858_v36  ;;  %v2484_v36 = vsel %vm976_vm0, %v5882_v19, 0 }
 0x996   : > { %v4298_v45 = vpop.eup %4297 }
 0x997   : > { %v2263_v41 = vmul.f32 %v4298_v45, %v5867_v40  ;;  %v2279_v55 = vpack.c.bf16 %v2265_v4, %v2264_v49  ;;  %v2438_v40 = vpop.permute.xlu0 %2437 }
 0x999   : > { %v2278_v63 = vpack.c.bf16 %v2263_v41, %v2262_v59 }
 0x99b   : > { %3820 = vmatprep.mubr.bf16.mxu1 %v2278_v63 }
 0x99c   : > { %3821 = vmatmul.mubr.bf16.vlgmr.msra.gmra.mxu1 %v2279_v55 }
 0x99d   : > { %3837 = vmatpush3.bf16.xpose.msra.mxu1 %v2493_v3 }
 0x99e   : > { %3973 = vmatprep.subr.msk.bf16.mxu1 %vm976_vm0, %v5877_v50  ;;  %v2481_v50 = vsel %vm976_vm0, %v2438_v40, 0 }
 0x9a5   : > { %3839 = vmatpush3.bf16.xpose.msra.mxu1 %v2490_v23 }
 0x9a6   : > { %3974 = vmatprep.subr.msk.bf16.mxu1 %vm976_vm0, %v2442_v48 }
 0x9ad   : > { %3841 = vmatpush3.bf16.xpose.msra.mxu1 %v2487_v54 }
 0x9ae   : > { %3975 = vmatprep.subr.msk.bf16.mxu1 %vm976_vm0, %v5882_v19  ;;  %v2478_v19 = vsel %vm976_vm0, %v2436_v62, 0 }
 0x9b5   : > { %3843 = vmatpush3.bf16.xpose.msra.mxu1 %v2484_v36 }
 0x9b6   : > { %3976 = vmatprep.subr.msk.bf16.mxu1 %vm976_vm0, %v2438_v40 }
 0x9b9   : > { %v2227_v38 = vpop.xlane.xlu0 %2226 }
 0x9bd   : > { %3845 = vmatpush3.bf16.xpose.msra.mxu1 %v2481_v50  ;;  %v2223_v32 = vpop.xlane.xlu0 %2222  ;;  %v2225_v53 = vpop.xlane.xlu1 %2224 }
 0x9be   : > { %4299 = vrcp.f32 %v2223_v32  ;;  %3977 = vmatprep.subr.msk.bf16.mxu1 %vm976_vm0, %v2436_v62 }
 0x9bf   : > { %4301 = vrcp.f32 %v2225_v53 }
 0x9c0   : > { %4303 = vrcp.f32 %v2227_v38 }
 0x9c1   : > { %v2229_v37 = vpop.xlane.xlu0 %2228  ;;  %v2235_v27 = vpop.xlane.xlu1 %2234 }
 0x9c2   : > { %4305 = vrcp.f32 %v2229_v37 }
 0x9c5   : > { %3847 = vmatpush3.bf16.xpose.msra.mxu1 %v2478_v19  ;;  %v2231_v57 = vpop.xlane.xlu1 %2230 }
 0x9c9   : > { %v2243_v56 = vpop.xlane.xlu0 %2242  ;;  %v2237_v1 = vpop.xlane.xlu1 %2236 }
 0x9ca   : > { %4307 = vrcp.f32 %v2237_v1 }
 0x9cb   : > { %v4300_v61 = vpop.eup %4299  ;;  %4309 = vrcp.f32 %v2231_v57 }
 0x9cc   : > { %v4302_v14 = vpop.eup %4301  ;;  %v2266_v0 = vmul.f32 %v4300_v61, %v5892_v35  ;;  %4311 = vrcp.f32 %v2235_v27 }
 0x9cd   : > { %v4304_v2 = vpop.eup %4303  ;;  %v2239_v8 = vpop.xlane.xlu0 %2238  ;;  %v2267_v26 = vmul.f32 %v4302_v14, %v5888_v18 }
 0x9ce   : > { %v2233_v17 = vpop.xlane.xlu1 %2232  ;;  %v2268_v45 = vmul.f32 %v4304_v2, %v5885_v6 }
 0x9cf   : > { %v4306_v47 = vpop.eup %4305  ;;  %4313 = vrcp.f32 %v2233_v17  ;;  %v2280_v58 = vpack.c.bf16 %v2267_v26, %v2266_v0 }
 0x9d0   : > { %v2269_v4 = vmul.f32 %v4306_v47, %v5896_v21  ;;  %4315 = vrcp.f32 %v2239_v8 }
 0x9d1   : > { %3824 = vmatprep.mubr.bf16.mxu1 %v2280_v58  ;;  %v2245_v59 = vpop.xlane.xlu0 %2244 }
 0x9d2   : > { %v2241_v41 = vpop.xlane.xlu1 %2240  ;;  %v2281_v49 = vpack.c.bf16 %v2269_v4, %v2268_v45 }
 0x9d3   : > { %4317 = vrcp.f32 %v2241_v41 }
 0x9d4   : > { %4319 = vrcp.f32 %v2245_v59  ;;  %3825 = vmatmul.mubr.bf16.gmra.mxu1 %v2281_v49 }
 0x9d5   : > { %v2434_v35 = vpop.permute.xlu0 %2433  ;;  %4321 = vrcp.f32 %v2243_v56 }
 0x9d6   : > { %v2432_v63 = vpop.permute.xlu1 %2431  ;;  %v2475_v18 = vsel %vm976_vm0, %v2434_v35, 0  ;;  %3978 = vmatprep.subr.msk.bf16.mxu1 %vm976_vm0, %v2434_v35 }
 0x9d7   : > { %3849 = vmatpush3.bf16.xpose.msra.mxu1 %v2475_v18  ;;  %v4308_v6 = vpop.eup %4307  ;;  %v2472_v32 = vsel %vm976_vm0, %v2432_v63, 0 }
 0x9d8   : > { %3979 = vmatprep.subr.msk.bf16.mxu1 %vm976_vm0, %v2432_v63  ;;  %v4310_v3 = vpop.eup %4309  ;;  %v2273_v54 = vmul.f32 %v4308_v6, %v5907_v43 }
 0x9d9   : > { %v2416_v21 = vpop.permute.xlu0 %2415  ;;  %v4312_v23 = vpop.eup %4311  ;;  %v2270_v62 = vmul.f32 %v4310_v3, %v5904_v44 }
 0x9da   : > { %v2418_v55 = vpop.permute.xlu1 %2417  ;;  %v2272_v53 = vmul.f32 %v4312_v23, %v5900_v9 }
 0x9dc   : > { %v4314_v48 = vpop.eup %4313  ;;  %v2283_v19 = vpack.c.bf16 %v2273_v54, %v2272_v53 }
 0x9dd   : > { %v2420_v36 = vpop.permute.xlu0 %2419  ;;  %v2271_v38 = vmul.f32 %v4314_v48, %v5913_v5  ;;  %v4316_v50 = vpop.eup %4315 }
 0x9de   : > { %v2422_v40 = vpop.permute.xlu1 %2421  ;;  %v2274_v43 = vmul.f32 %v4316_v50, %v5915_v7 }
 0x9df   : > { %3851 = vmatpush3.bf16.xpose.msra.mxu1 %v2472_v32  ;;  %v2282_v37 = vpack.c.bf16 %v2271_v38, %v2270_v62 }
 0x9e0   : > { %v4318_v27 = vpop.eup %4317 }
 0x9e1   : > { %v4320_v57 = vpop.eup %4319  ;;  %3828 = vmatprep.mubr.bf16.mxu1 %v2282_v37  ;;  %v2424_v56 = vpop.permute.xlu0 %2423  ;;  %v2275_v61 = vmul.f32 %v4318_v27, %v5921_v20 }
 0x9e2   : > { %v2426_v1 = vpop.permute.xlu1 %2425  ;;  %3829 = vmatmul.mubr.bf16.gmra.mxu1 %v2283_v19  ;;  %v4322_v44 = vpop.eup %4321  ;;  %v2277_v14 = vmul.f32 %v4320_v57, %v5919_v29 }
 0x9e3   : > { %v2284_v5 = vpack.c.bf16 %v2275_v61, %v2274_v43  ;;  %v2276_v2 = vmul.f32 %v4322_v44, %v5909_v13 }
 0x9e5   : > { %3832 = vmatprep.mubr.bf16.mxu1 %v2284_v5  ;;  %v2428_v0 = vpop.permute.xlu0 %2427  ;;  %v2285_v8 = vpack.c.bf16 %v2277_v14, %v2276_v2 }
 0x9e6   : > { %v2430_v9 = vpop.permute.xlu1 %2429 }
 0x9e9   : > { %v2791_v17 = vpop.permute.xlu0 %2790 }
 0x9ea   : > { %3833 = vmatmul.mubr.bf16.gmra.mxu1 %v2285_v8  ;;  %3868 = vmatprep.subr.bf16.mxu0 %v2791_v17  ;;  %v2789_v26 = vpop.permute.xlu1 %2788 }
 0x9eb   : > { %3852 = vmatprep.mubr.msk.bf16.mxu1 %vm976_vm0, %v2416_v21  ;;  %3869 = vmatpush3.bf16.msra.mxu0 %v2791_v17 }
 0x9ec   : > { %3870 = vmatprep.subr.bf16.mxu0 %v2789_v26 }
 0x9ed   : > { %v2787_v7 = vpop.permute.xlu0 %2786 }
 0x9ef   : > { %3871 = vmatpush3.bf16.msra.mxu0 %v2789_v26 }
 0x9f0   : > { %3872 = vmatprep.subr.bf16.mxu0 %v2787_v7 }
 0x9f2   : > { %3853 = vmatmul.mubr.msk.bf16.vlgmr.msra.gmra.mxu1 %vm976_vm0, %v2418_v55 }
 0x9f3   : > { %3856 = vmatprep.mubr.msk.bf16.mxu1 %vm976_vm0, %v2420_v36  ;;  %3873 = vmatpush3.bf16.msra.mxu0 %v2787_v7 }
 0x9fa   : > { %3857 = vmatmul.mubr.msk.bf16.gmra.mxu1 %vm976_vm0, %v2422_v40 }
 0x9fb   : > { %3860 = vmatprep.mubr.msk.bf16.mxu1 %vm976_vm0, %v2424_v56 }
 0xa02   : > { %3861 = vmatmul.mubr.msk.bf16.gmra.mxu1 %vm976_vm0, %v2426_v1 }
 0xa03   : > { %3864 = vmatprep.mubr.msk.bf16.mxu1 %vm976_vm0, %v2428_v0 }
 0xa0a   : > { %3865 = vmatmul.mubr.msk.bf16.gmra.mxu1 %vm976_vm0, %v2430_v9 }
 0xa5c   : > { %v5994_v13 = vpop.f32.mrf.mxu1 }
 0xa5e   : > { %v5996_v29 = vpop.f32.mrf.mxu1 }
 0xa60   : > { %v5998_v20 = vpop.f32.mrf.mxu1 }
 0xa61   : > { %v2408_v47 = vpack.c.bf16 %v5998_v20, %v5994_v13 }
 0xa62   : > { %v6002_v58 = vpop.f32.mrf.mxu1 }
 0xa63   : > { %v2407_v45 = vpack.c.bf16 %v6002_v58, %v5996_v29 }
 0xa94   : > { %v6006_v4 = vpop.f32.mrf.mxu1 }
 0xa96   : > { %v6008_v59 = vpop.f32.mrf.mxu1 }
 0xa98   : > { %v6010_v41 = vpop.f32.mrf.mxu1 }
 0xa99   : > { %v2410_v49 = vpack.c.bf16 %v6010_v41, %v6006_v4 }
 0xa9a   : > { %v6014_v35 = vpop.f32.mrf.mxu1 }
 0xa9b   : > { %v2409_v63 = vpack.c.bf16 %v6014_v35, %v6008_v59 }
 0xaa2   : > { %v6018_v18 = vpop.f32.mrf.mxu1 }
 0xaa4   : > { %v6020_v6 = vpop.f32.mrf.mxu1 }
 0xaa6   : > { %v6022_v21 = vpop.f32.mrf.mxu1 }
 0xaa7   : > { %v2412_v55 = vpack.c.bf16 %v6022_v21, %v6018_v18 }
 0xaa8   : > { %v6026_v3 = vpop.f32.mrf.mxu1 }
 0xaa9   : > { %v2411_v23 = vpack.c.bf16 %v6026_v3, %v6020_v6  ;;  %v6626_v6 = vld [vmem:[#allocation54_spill] sm:$0xff]  ;;  %v6627_v3 = vld [vmem:[#allocation52_spill] sm:$0xff] }
 0xaaa   : > { %v6030_v48 = vpop.f32.mrf.mxu1 }
 0xaac   : > { %v6032_v54 = vpop.f32.mrf.mxu1 }
 0xaae   : > { %v6034_v36 = vpop.f32.mrf.mxu1 }
 0xaaf   : > { %v2414_v40 = vpack.c.bf16 %v6034_v36, %v6030_v48 }
 0xab0   : > { %v6038_v62 = vpop.f32.mrf.mxu1 }
 0xab1   : > { %v2413_v38 = vpack.c.bf16 %v6038_v62, %v6032_v54  ;;  %v6632_v54 = vld [vmem:[#allocation47_spill] sm:$0xff]  ;;  %v6633_v62 = vld [vmem:[#allocation45_spill] sm:$0xff] }
 0xab2   : > { %v3854_v50 = vpop.f32.mrf.mxu1 }
 0xab3   : > { %v2594_v32 = vmul.f32 0.17677669, %v3854_v50 }
 0xab4   : > { %v2529_v53 = vpop.f32.mrf.mxu1 }
 0xab5   : > { %v2592_v37 = vmul.f32 0.17677669, %v2529_v53  ;;  %v6045_v27 = vsel %vm938_vm3, %v2594_v32, -1e+30  ;;  %vm6609_vm3 = vcmp.ge.s32.totalorder %v6569_v33, %v5065_v46 }
 0xab6   : > { %2628 = vmax.xlane.f32.xlu0 %v6045_v27  ;;  %v3855_v19 = vpop.f32.mrf.mxu1 }
 0xab7   : > { %v2595_v56 = vmul.f32 0.17677669, %v3855_v19  ;;  %v6051_v43 = vsel %vm936_vm4, %v2592_v37, -1e+30  ;;  %vm6610_vm4 = vmmov %vm6600_vm7 }
 0xab8   : > { %v2532_v57 = vpop.f32.mrf.mxu1 }
 0xab9   : > { %v2593_v1 = vmul.f32 0.17677669, %v2532_v57  ;;  %v2611_v14 = vsel %vm939_vm5, %v2595_v56, -1e+30 }
 0xaba   : > { %2624 = vmax.xlane.f32.xlu0 %v6051_v43  ;;  %v3858_v61 = vpop.f32.mrf.mxu1 }
 0xabb   : > { %v6057_v12 = vsel %vm937_vm6, %v2593_v1, -1e+30  ;;  %v2598_v5 = vmul.f32 0.17677669, %v3858_v61 }
 0xabc   : > { %2626 = vmax.xlane.f32.xlu1 %v6057_v12  ;;  %v2545_v44 = vpop.f32.mrf.mxu1 }
 0xabd   : > { %v2596_v9 = vmul.f32 0.17677669, %v2545_v44  ;;  %v2614_v22 = vsel %vm6609_vm3, %v2598_v5, -1e+30 }
 0xabe   : > { %2630 = vmax.xlane.f32.xlu0 %v2611_v14  ;;  %v3859_v24 = vpop.f32.mrf.mxu1 }
 0xabf   : > { %v2599_v0 = vmul.f32 0.17677669, %v3859_v24  ;;  %v6075_v50 = vsel %vm940_vm8, %v2596_v9, -1e+30 }
 0xac0   : > { %v2548_v2 = vpop.f32.mrf.mxu1 }
 0xac1   : > { %v2597_v8 = vmul.f32 0.17677669, %v2548_v2  ;;  %v6069_v17 = vsel %vm943_vm9, %v2599_v0, -1e+30 }
 0xac2   : > { %2636 = vmax.xlane.f32.xlu0 %v2614_v22  ;;  %2638 = vmax.xlane.f32.xlu1 %v6069_v17  ;;  %v3862_v34 = vpop.f32.mrf.mxu1 }
 0xac3   : > { %v2602_v7 = vmul.f32 0.17677669, %v3862_v34  ;;  %v6080_v33 = vsel %vm941_vm10, %v2597_v8, -1e+30 }
 0xac4   : > { %v2561_v26 = vpop.f32.mrf.mxu1 }
 0xac5   : > { %v2600_v53 = vmul.f32 0.17677669, %v2561_v26  ;;  %v6087_v16 = vsel %vm946_vm11, %v2602_v7, -1e+30 }
 0xac6   : > { %2632 = vmax.xlane.f32.xlu0 %v6075_v50  ;;  %2634 = vmax.xlane.f32.xlu1 %v6080_v33  ;;  %v3863_v11 = vpop.f32.mrf.mxu1 }
 0xac7   : > { %v2603_v32 = vmul.f32 0.17677669, %v3863_v11  ;;  %v6099_v1 = vsel %vm6610_vm4, %v2600_v53, -1e+30 }
 0xac8   : > { %v2564_v37 = vpop.f32.mrf.mxu1 }
 0xac9   : > { %v2601_v19 = vmul.f32 0.17677669, %v2564_v37  ;;  %v6092_v25 = vsel %vm947_vm13, %v2603_v32, -1e+30 }
 0xaca   : > { %2644 = vmax.xlane.f32.xlu0 %v6087_v16  ;;  %2646 = vmax.xlane.f32.xlu1 %v6092_v25  ;;  %v3866_v57 = vpop.f32.mrf.mxu1 }
 0xacb   : > { %v2606_v56 = vmul.f32 0.17677669, %v3866_v57  ;;  %v6104_v60 = vsel %vm945_vm14, %v2601_v19, -1e+30 }
 0xacc   : > { %v2577_v61 = vpop.f32.mrf.mxu1 }
 0xacd   : > { %v2604_v10 = vmul.f32 0.17677669, %v2577_v61  ;;  %v6111_v44 = vsel %vm950_vm15, %v2606_v56, -1e+30 }
 0xace   : > { %2640 = vmax.xlane.f32.xlu0 %v6099_v1  ;;  %2642 = vmax.xlane.f32.xlu1 %v6104_v60  ;;  %v3867_v42 = vpop.f32.mrf.mxu1 }
 0xacf   : > { %v6117_v28 = vsel %vm948_vm12, %v2604_v10, -1e+30  ;;  %v2607_v5 = vmul.f32 0.17677669, %v3867_v42 }
 0xad0   : > { %v2580_v15 = vpop.f32.mrf.mxu1 }
 0xad1   : > { %v2605_v24 = vmul.f32 0.17677669, %v2580_v15  ;;  %v6127_v0 = vsel %vm951_vm1, %v2607_v5, -1e+30  ;;  %vm3001_vm1 = vcmask 523264  }
 0xad2   : > { %2652 = vmax.xlane.f32.xlu0 %v6111_v44 }
 0xad3   : > { %v6133_v51 = vsel %vm949_vm2, %v2605_v24, -1e+30  ;;  %vm3018_vm2 = vcmask 785408  }
 0xad6   : > { %2648 = vmax.xlane.f32.xlu0 %v6117_v28 }
 0xadf   : > { %2782 = vrot.lane.b32.xlu1 %v4972_v30, %s4565_s14 }
 0xaec   : > { %2784 = vrot.lane.b32.xlu0 %v4966_v52, %s4565_s14  ;;  %v6611_v52 = vld [vmem:[#allocation13_spill] sm:$0xff] }
 0xb03   : > { %2654 = vmax.xlane.f32.xlu1 %v6127_v0 }
 0xb07   : > { %2650 = vmax.xlane.f32.xlu1 %v6133_v51 }
 0xb18   : > { %2780 = vrot.lane.b32.xlu1 %v6611_v52, %s4565_s14 }
 0xb3f   : > { %v2629_v30 = vpop.xlane.xlu0 %2628 }
 0xb40   : > { %v2658_v9 = vsub.f32 %v6045_v27, %v2629_v30 }
 0xb42   : > { %v2676_v2 = vmul.f32 1.442695, %v2658_v9 }
 0xb43   : > { %v2625_v8 = vpop.xlane.xlu0 %2624 }
 0xb44   : > { %4323 = vpow2.f32 %v2676_v2  ;;  %v2656_v31 = vsub.f32 %v6051_v43, %v2625_v8 }
 0xb45   : > { %v2627_v34 = vpop.xlane.xlu1 %2626 }
 0xb46   : > { %v2672_v26 = vmul.f32 1.442695, %v2656_v31  ;;  %v2657_v7 = vsub.f32 %v6057_v12, %v2627_v34 }
 0xb47   : > { %v2631_v46 = vpop.xlane.xlu0 %2630 }
 0xb48   : > { %4325 = vpow2.f32 %v2672_v26  ;;  %v2659_v39 = vsub.f32 %v2611_v14, %v2631_v46  ;;  %v2674_v32 = vmul.f32 1.442695, %v2657_v7 }
 0xb4a   : > { %v2678_v11 = vmul.f32 1.442695, %v2659_v39 }
 0xb4b   : > { %v2637_v53 = vpop.xlane.xlu0 %2636  ;;  %v2639_v37 = vpop.xlane.xlu1 %2638 }
 0xb4c   : > { %4327 = vpow2.f32 %v2678_v11  ;;  %v2662_v19 = vsub.f32 %v2614_v22, %v2637_v53  ;;  %v2663_v43 = vsub.f32 %v6069_v17, %v2639_v37 }
 0xb4d   : > { %4329 = vpow2.f32 %v2674_v32 }
 0xb4e   : > { %v2684_v57 = vmul.f32 1.442695, %v2662_v19  ;;  %v2686_v22 = vmul.f32 1.442695, %v2663_v43 }
 0xb4f   : > { %v2633_v27 = vpop.xlane.xlu0 %2632  ;;  %v2635_v56 = vpop.xlane.xlu1 %2634 }
 0xb50   : > { %4331 = vpow2.f32 %v2684_v57  ;;  %v2660_v61 = vsub.f32 %v6075_v50, %v2633_v27  ;;  %v2661_v12 = vsub.f32 %v6080_v33, %v2635_v56 }
 0xb51   : > { %v6144_v10 = vpop.eup %4323 }
 0xb52   : > { %v2680_v14 = vmul.f32 1.442695, %v2660_v61  ;;  %v2682_v42 = vmul.f32 1.442695, %v2661_v12  ;;  %2708 = vadd.xlane.f32.xlu1 %v6144_v10  ;;  %v6612_v12 = vld [vmem:[#allocation16_spill] sm:$0xff] }
 0xb53   : > { %v2645_v5 = vpop.xlane.xlu0 %2644  ;;  %v2647_v15 = vpop.xlane.xlu1 %2646 }
 0xb54   : > { %4333 = vpow2.f32 %v2680_v14  ;;  %v2666_v24 = vsub.f32 %v6087_v16, %v2645_v5  ;;  %v2667_v50 = vsub.f32 %v6092_v25, %v2647_v15  ;;  %v6613_v14 = vld [vmem:[#allocation51_spill] sm:$0xff] }
 0xb55   : > { %v6148_v52 = vpop.eup %4325  ;;  %4335 = vpow2.f32 %v2682_v42  ;;  %v6614_v42 = vld [vmem:[#allocation49_spill] sm:$0xff]  ;;  %v6616_v15 = vld [vmem:[#allocation15_spill] sm:$0xff] }
 0xb56   : > { %2704 = vadd.xlane.f32.xlu1 %v6148_v52  ;;  %v2692_v17 = vmul.f32 1.442695, %v2666_v24  ;;  %4337 = vpow2.f32 %v2686_v22  ;;  %v2694_v16 = vmul.f32 1.442695, %v2667_v50  ;;  %v6615_v5 = vpack.c.bf16 %v6613_v14, %v6614_v42  ;;  %v6617_v22 = vld [vmem:[#allocation23_spill] sm:$0xff]  ;;  %v6618_v24 = vld [vmem:[#allocation14_spill] sm:$0xff] }
 0xb57   : > { %v2641_v33 = vpop.xlane.xlu0 %2640  ;;  %v2643_v9 = vpop.xlane.xlu1 %2642 }
 0xb58   : > { %v2664_v30 = vsub.f32 %v6099_v1, %v2641_v33  ;;  %4339 = vpow2.f32 %v2692_v17  ;;  %v2665_v31 = vsub.f32 %v6104_v60, %v2643_v9  ;;  %v6619_v17 = vpack.c.bf16 %v6617_v22, %v6618_v24  ;;  %v6620_v33 = vld [vmem:[#allocation50_spill] sm:$0xff] }
 0xb59   : > { %v6153_v2 = vpop.eup %4327 }
 0xb5a   : > { %v2688_v8 = vmul.f32 1.442695, %v2664_v30  ;;  %2710 = vadd.xlane.f32.xlu1 %v6153_v2  ;;  %v6157_v26 = vpop.eup %4329  ;;  %v2690_v1 = vmul.f32 1.442695, %v2665_v31  ;;  %v6621_v30 = vld [vmem:[#allocation48_spill] sm:$0xff] }
 0xb5b   : > { %v2653_v34 = vpop.xlane.xlu0 %2652  ;;  %v2783_v19 = vpop.permute.xlu1 %2782  ;;  %v6622_v9 = vpack.c.bf16 %v6620_v33, %v6621_v30 }
 0xb5c   : > { %4341 = vpow2.f32 %v2688_v8  ;;  %v2670_v25 = vsub.f32 %v6111_v44, %v2653_v34 }
 0xb5d   : > { %v6160_v7 = vpop.eup %4331  ;;  %4343 = vpow2.f32 %v2694_v16 }
 0xb5e   : > { %v2700_v46 = vmul.f32 1.442695, %v2670_v25  ;;  %2716 = vadd.xlane.f32.xlu0 %v6160_v7  ;;  %2706 = vadd.xlane.f32.xlu1 %v6157_v26 }
 0xb5f   : > { %v2649_v39 = vpop.xlane.xlu0 %2648 }
 0xb60   : > { %4345 = vpow2.f32 %v2700_v46  ;;  %v2668_v11 = vsub.f32 %v6117_v28, %v2649_v39 }
 0xb61   : > { %v6165_v60 = vpop.eup %4333  ;;  %4347 = vpow2.f32 %v2690_v1  ;;  %v6624_v1 = vld [vmem:[#allocation53_spill] sm:$0xff] }
 0xb62   : > { %v6167_v32 = vpop.eup %4335  ;;  %v2696_v53 = vmul.f32 1.442695, %v2668_v11  ;;  %2712 = vadd.xlane.f32.xlu0 %v6165_v60 }
 0xb63   : > { %2714 = vadd.xlane.f32.xlu1 %v6167_v32  ;;  %v2785_v44 = vpop.permute.xlu0 %2784  ;;  %v6171_v37 = vpop.eup %4337 }
 0xb64   : > { %4349 = vpow2.f32 %v2696_v53  ;;  %3874 = vmatprep.subr.bf16.mxu0 %v2785_v44  ;;  %v6635_v53 = vld [vmem:[#allocation46_spill] sm:$0xff] }
 0xb65   : > { %3875 = vmatpush3.bf16.msra.mxu0 %v2785_v44  ;;  %v6174_v28 = vpop.eup %4339  ;;  %v6636_v44 = vld [vmem:[#allocation25_spill] sm:$0xff] }
 0xb66   : > { %2718 = vadd.xlane.f32.xlu0 %v6171_v37  ;;  %3876 = vmatprep.subr.bf16.mxu0 %v2783_v19 }
 0xb69   : > { %v6176_v57 = vpop.eup %4341  ;;  %3877 = vmatpush3.bf16.msra.mxu0 %v2783_v19  ;;  %v6637_v19 = vpack.c.bf16 %v6635_v53, %v6636_v44 }
 0xb6a   : > { %2724 = vadd.xlane.f32.xlu0 %v6174_v28  ;;  %2720 = vadd.xlane.f32.xlu1 %v6176_v57  ;;  %v6180_v27 = vpop.eup %4343 }
 0xb6d   : > { %v6182_v56 = vpop.eup %4345 }
 0xb6e   : > { %2732 = vadd.xlane.f32.xlu1 %v6182_v56  ;;  %2726 = vadd.xlane.f32.xlu0 %v6180_v27  ;;  %v6186_v43 = vpop.eup %4347 }
 0xb71   : > { %v6188_v61 = vpop.eup %4349 }
 0xb72   : > { %2728 = vadd.xlane.f32.xlu1 %v6188_v61  ;;  %2722 = vadd.xlane.f32.xlu0 %v6186_v43 }
 0xb83   : > { %2776 = vrot.lane.b32.xlu1 %v6612_v12, %s4565_s14 }
 0xb87   : > { %2921 = vrot.lane.b32.xlu1 %v6615_v5, %s4565_s14 }
 0xb88   : > { %2778 = vrot.lane.b32.xlu0 %v6616_v15, %s4565_s14 }
 0xb8b   : > { %2915 = vrot.lane.b32.xlu1 %v6619_v17, %s4565_s14 }
 0xb8c   : > { %v2655_v50 = vpop.xlane.xlu1 %2654 }
 0xb8d   : > { %v2671_v34 = vsub.f32 %v6127_v0, %v2655_v50  ;;  %v6630_v0 = vld [vmem:[#allocation19_spill] sm:$0xff] }
 0xb8f   : > { %2923 = vrot.lane.b32.xlu1 %v6622_v9, %s4565_s14  ;;  %v2702_v46 = vmul.f32 1.442695, %v2671_v34 }
 0xb90   : > { %v2651_v8 = vpop.xlane.xlu1 %2650 }
 0xb91   : > { %v2669_v16 = vsub.f32 %v6133_v51, %v2651_v8  ;;  %v6623_v51 = vld [vmem:[#allocation55_spill] sm:$0xff] }
 0xb92   : > { %v6625_v39 = vpack.c.bf16 %v6623_v51, %v6624_v1 }
 0xb93   : > { %2945 = vrot.lane.b32.xlu1 %v2411_v23, %s4564_s19  ;;  %v2698_v25 = vmul.f32 1.442695, %v2669_v16  ;;  %v6628_v23 = vpack.c.bf16 %v6626_v6, %v6627_v3 }
 0xb94   : > { %v2781_v31 = vpop.permute.xlu1 %2780 }
 0xb95   : > { %3878 = vmatprep.subr.bf16.mxu0 %v2781_v31  ;;  %4351 = vpow2.f32 %v2698_v25 }
 0xb96   : > { %3879 = vmatpush3.bf16.msra.mxu0 %v2781_v31  ;;  %4353 = vpow2.f32 %v2702_v46 }
 0xb97   : > { %2947 = vrot.lane.b32.xlu1 %v2412_v55, %s4564_s19  ;;  %v6629_v55 = vld [vmem:[#allocation24_spill] sm:$0xff] }
 0xb98   : > { %v6631_v11 = vpack.c.bf16 %v6629_v55, %v6630_v0 }
 0xb9b   : > { %2925 = vrot.lane.b32.xlu1 %v6625_v39, %s4565_s14 }
 0xb9f   : > { %2927 = vrot.lane.b32.xlu1 %v6628_v23, %s4565_s14 }
 0xba2   : > { %v6230_v18 = vpop.eup %4351 }
 0xba3   : > { %2949 = vrot.lane.b32.xlu1 %v2413_v38, %s4564_s19  ;;  %v6233_v21 = vpop.eup %4353  ;;  %v6634_v38 = vpack.c.bf16 %v6632_v54, %v6633_v62 }
 0xba7   : > { %2730 = vadd.xlane.f32.xlu0 %v6230_v18 }
 0xbab   : > { %2734 = vadd.xlane.f32.xlu0 %v6233_v21 }
 0xbc1   : > { %2913 = vrot.lane.b32.xlu0 %v6631_v11, %s4565_s14 }
 0xbc5   : > { %2937 = vrot.lane.b32.xlu0 %v2407_v45, %s4564_s19 }
 0xbc9   : > { %2939 = vrot.lane.b32.xlu0 %v2408_v47, %s4564_s19 }
 0xbcd   : > { %2917 = vrot.lane.b32.xlu0 %v6634_v38, %s4565_s14 }
 0xbd1   : > { %2919 = vrot.lane.b32.xlu0 %v6637_v19, %s4565_s14 }
 0xbd5   : > { %2941 = vrot.lane.b32.xlu0 %v2409_v63, %s4564_s19 }
 0xbdb   : > { %v2709_v29 = vpop.xlane.xlu1 %2708 }
 0xbdf   : > { %v2705_v58 = vpop.xlane.xlu1 %2704 }
 0xbe0   : > { %4355 = vrcp.f32 %v2705_v58 }
 0xbe3   : > { %v2711_v45 = vpop.xlane.xlu1 %2710 }
 0xbe7   : > { %v2717_v13 = vpop.xlane.xlu0 %2716  ;;  %v2707_v20 = vpop.xlane.xlu1 %2706 }
 0xbe8   : > { %4357 = vrcp.f32 %v2707_v20  ;;  %v4091_v20 = vld [vmem:[#allocation7 + $0x38] sm:$0xff]  }
 0xbe9   : > { %4359 = vrcp.f32 %v2711_v45  ;;  %3932 = vmatprep.subr.bf16.mxu1 %v4091_v20 }
 0xbea   : > { %3940 = vmatpush3.bf16.msra.mxu1 %v4091_v20 }
 0xbeb   : > { %v2713_v47 = vpop.xlane.xlu0 %2712 }
 0xbec   : > { %v2715_v12 = vpop.xlane.xlu1 %2714  ;;  %4361 = vrcp.f32 %v2713_v47  ;;  %v4092_v47 = vld [vmem:[#allocation7 + $0x30] sm:$0xff]  }
 0xbed   : > { %4363 = vrcp.f32 %v2715_v12  ;;  %v4356_v15 = vpop.eup %4355  ;;  %3933 = vmatprep.subr.bf16.mxu1 %v4092_v47  ;;  %v4097_v12 = vld [vmem:[#allocation7 + $0x8] sm:$0xff]  }
 0xbee   : > { %4365 = vrcp.f32 %v2709_v29  ;;  %v2752_v63 = vmul.f32 %v4356_v15, %v6148_v52  ;;  %3941 = vmatpush3.bf16.msra.mxu1 %v4092_v47 }
 0xbef   : > { %v2719_v14 = vpop.xlane.xlu0 %2718 }
 0xbf0   : > { %4367 = vrcp.f32 %v2719_v14  ;;  %v4098_v14 = vld [vmem:[#allocation7] sm:$0xff]  }
 0xbf1   : > { %4369 = vrcp.f32 %v2717_v13 }
 0xbf3   : > { %v2725_v42 = vpop.xlane.xlu0 %2724  ;;  %v2721_v5 = vpop.xlane.xlu1 %2720 }
 0xbf5   : > { %v4358_v22 = vpop.eup %4357 }
 0xbf6   : > { %v2753_v24 = vmul.f32 %v4358_v22, %v6157_v26  ;;  %v4360_v30 = vpop.eup %4359 }
 0xbf7   : > { %v2727_v59 = vpop.xlane.xlu0 %2726  ;;  %v2733_v35 = vpop.xlane.xlu1 %2732  ;;  %v2755_v52 = vmul.f32 %v4360_v30, %v6153_v2 }
 0xbf8   : > { %v2768_v17 = vpack.c.bf16 %v2753_v24, %v2752_v63 }
 0xbf9   : > { %v4362_v9 = vpop.eup %4361 }
 0xbfa   : > { %3884 = vmatprep.mubr.bf16.mxu0 %v2768_v17  ;;  %v4364_v16 = vpop.eup %4363  ;;  %v2756_v26 = vmul.f32 %v4362_v9, %v6165_v60 }
 0xbfb   : > { %v2723_v50 = vpop.xlane.xlu0 %2722  ;;  %v2729_v33 = vpop.xlane.xlu1 %2728  ;;  %v2757_v25 = vmul.f32 %v4364_v16, %v6167_v32 }
 0xbfc   : > { %4371 = vrcp.f32 %v2723_v50  ;;  %v4366_v31 = vpop.eup %4365 }
 0xbfd   : > { %4373 = vrcp.f32 %v2721_v5  ;;  %v2754_v46 = vmul.f32 %v4366_v31, %v6144_v10  ;;  %v4368_v1 = vpop.eup %4367  ;;  %v2770_v39 = vpack.c.bf16 %v2757_v25, %v2756_v26 }
 0xbfe   : > { %4375 = vrcp.f32 %v2727_v59  ;;  %v4370_v6 = vpop.eup %4369  ;;  %v2759_v55 = vmul.f32 %v4368_v1, %v6171_v37 }
 0xbff   : > { %v2779_v8 = vpop.permute.xlu0 %2778  ;;  %v2777_v34 = vpop.permute.xlu1 %2776  ;;  %4377 = vrcp.f32 %v2725_v42  ;;  %v2769_v51 = vpack.c.bf16 %v2755_v52, %v2754_v46  ;;  %v2758_v60 = vmul.f32 %v4370_v6, %v6160_v7 }
 0xc00   : > { %3880 = vmatprep.subr.bf16.mxu0 %v2779_v8  ;;  %4379 = vrcp.f32 %v2729_v33 }
 0xc01   : > { %3881 = vmatpush3.bf16.msra.mxu0 %v2779_v8  ;;  %v2771_v0 = vpack.c.bf16 %v2759_v55, %v2758_v60 }
 0xc02   : > { %3882 = vmatprep.subr.bf16.mxu0 %v2777_v34 }
 0xc03   : > { %v2922_v1 = vpop.permute.xlu1 %2921 }
 0xc05   : > { %3883 = vmatpush3.bf16.msra.mxu0 %v2777_v34 }
 0xc06   : > { %3900 = vmatprep.subr.bf16.mxu0 %v4091_v20 }
 0xc07   : > { %v2916_v6 = vpop.permute.xlu1 %2915 }
 0xc08   : > { %3885 = vmatmul.mubr.bf16.vlgmr.msra.gmra.mxu0 %v2769_v51 }
 0xc09   : > { %v4372_v3 = vpop.eup %4371  ;;  %3888 = vmatprep.mubr.bf16.mxu0 %v2770_v39  ;;  %3901 = vmatpush3.bf16.msra.mxu0 %v4091_v20 }
 0xc0a   : > { %v4374_v23 = vpop.eup %4373  ;;  %v2761_v2 = vmul.f32 %v4372_v3, %v6186_v43  ;;  %3902 = vmatprep.subr.bf16.mxu0 %v4092_v47 }
 0xc0b   : > { %v2760_v32 = vmul.f32 %v4374_v23, %v6176_v57  ;;  %v4376_v11 = vpop.eup %4375  ;;  %v2924_v23 = vpop.permute.xlu1 %2923 }
 0xc0c   : > { %v4378_v54 = vpop.eup %4377  ;;  %v2763_v62 = vmul.f32 %v4376_v11, %v6180_v27  ;;  %v6639_v11 = vld [vmem:[#allocation30_spill] sm:$0xff] }
 0xc0d   : > { %v2772_v10 = vpack.c.bf16 %v2761_v2, %v2760_v32  ;;  %v2762_v38 = vmul.f32 %v4378_v54, %v6174_v28  ;;  %v4380_v7 = vpop.eup %4379  ;;  %3903 = vmatpush3.bf16.msra.mxu0 %v4092_v47 }
 0xc0e   : > { %v2764_v44 = vmul.f32 %v4380_v7, %v6188_v61  ;;  %v4093_v61 = vld [vmem:[#allocation7 + $0x28] sm:$0xff]  }
 0xc0f   : > { %v2773_v53 = vpack.c.bf16 %v2763_v62, %v2762_v38  ;;  %3904 = vmatprep.subr.bf16.mxu0 %v4093_v61  ;;  %3934 = vmatprep.subr.bf16.mxu1 %v4093_v61  ;;  %v2946_v2 = vpop.permute.xlu1 %2945  ;;  %v6641_v62 = vld [vmem:[#allocation31_spill] sm:$0xff]  ;;  %v6642_v38 = vld [vmem:[#allocation29_spill] sm:$0xff] }
 0xc10   : > { %3889 = vmatmul.mubr.bf16.gmra.mxu0 %v2771_v0  ;;  %3942 = vmatpush3.bf16.msra.mxu1 %v4093_v61  ;;  %v6638_v0 = vld [vmem:[#allocation32_spill] sm:$0xff] }
 0xc11   : > { %3892 = vmatprep.mubr.bf16.mxu0 %v2772_v10  ;;  %3905 = vmatpush3.bf16.msra.mxu0 %v4093_v61  ;;  %v6640_v10 = vpack.c.bf16 %v6638_v0, %v6639_v11  ;;  %v4388_v11 = vld [vmem:[%s4737_s8] sm:$0xff] }
 0xc13   : > { %v2948_v36 = vpop.permute.xlu1 %2947 }
 0xc17   : > { %v2926_v60 = vpop.permute.xlu1 %2925 }
 0xc18   : > { %3893 = vmatmul.mubr.bf16.gmra.mxu0 %v2773_v53  ;;  %v6643_v53 = vpack.c.bf16 %v6641_v62, %v6642_v38  ;;  %v4389_v38 = vld [vmem:[%s4737_s8 + $0x18] sm:$0xff] }
 0xc30   : > { %v2731_v37 = vpop.xlane.xlu0 %2730 }
 0xc31   : > { %4381 = vrcp.f32 %v2731_v37  ;;  %v2982_v37 = vsel %vm976_vm0, %v6643_v53, %v2916_v6 }
 0xc32   : > { %4383 = vrcp.f32 %v2733_v35 }
 0xc34   : > { %v2735_v43 = vpop.xlane.xlu0 %2734 }
 0xc35   : > { %4385 = vrcp.f32 %v2735_v43 }
 0xc38   : > { %v2914_v51 = vpop.permute.xlu0 %2913 }
 0xc39   : > { %v2979_v54 = vsel %vm976_vm0, %v6640_v10, %v2914_v51 }
 0xc3c   : > { %v2938_v39 = vpop.permute.xlu0 %2937 }
 0xc3d   : > { %v3003_v43 = vsel %vm3001_vm1, %v2979_v54, %v2938_v39  ;;  %v6660_v39 = vld [vmem:[#allocation41_spill] sm:$0xff] }
 0xc3e   : > { %v4382_v57 = vpop.eup %4381 }
 0xc3f   : > { %v2765_v19 = vmul.f32 %v4382_v57, %v6230_v18  ;;  %v4384_v29 = vpop.eup %4383  ;;  %v4094_v18 = vld [vmem:[#allocation7 + $0x20] sm:$0xff]  }
 0xc40   : > { %v2766_v28 = vmul.f32 %v4384_v29, %v6182_v56  ;;  %3906 = vmatprep.subr.bf16.mxu0 %v4094_v18  ;;  %v4095_v56 = vld [vmem:[#allocation7 + $0x18] sm:$0xff]   ;;  %3935 = vmatprep.subr.bf16.mxu1 %v4094_v18  ;;  %v2940_v3 = vpop.permute.xlu0 %2939 }
 0xc41   : > { %v2774_v58 = vpack.c.bf16 %v2765_v19, %v2764_v44  ;;  %3907 = vmatpush3.bf16.msra.mxu0 %v4094_v18  ;;  %3943 = vmatpush3.bf16.msra.mxu1 %v4094_v18  ;;  %v3005_v57 = vsel %vm3001_vm1, %v2982_v37, %v2940_v3  ;;  %v2928_v19 = vpop.permute.xlu1 %2927 }
 0xc42   : > { %v4386_v45 = vpop.eup %4385  ;;  %3908 = vmatprep.subr.bf16.mxu0 %v4095_v56  ;;  %3936 = vmatprep.subr.bf16.mxu1 %v4095_v56 }
 0xc43   : > { %3896 = vmatprep.mubr.bf16.mxu0 %v2774_v58  ;;  %v2767_v27 = vmul.f32 %v4386_v45, %v6233_v21  ;;  %v4096_v21 = vld [vmem:[#allocation7 + $0x10] sm:$0xff]   ;;  %v6644_v45 = vld [vmem:[#allocation36_spill] sm:$0xff] }
 0xc44   : > { %v2918_v55 = vpop.permute.xlu0 %2917 }
 0xc45   : > { %v2775_v13 = vpack.c.bf16 %v2767_v27, %v2766_v28  ;;  %3909 = vmatpush3.bf16.msra.mxu0 %v4095_v56  ;;  %3944 = vmatpush3.bf16.msra.mxu1 %v4095_v56  ;;  %v6645_v28 = vld [vmem:[#allocation34_spill] sm:$0xff]  ;;  %v2950_v20 = vpop.permute.xlu1 %2949  ;;  %v6647_v56 = vld [vmem:[#allocation35_spill] sm:$0xff] }
 0xc46   : > { %3910 = vmatprep.subr.bf16.mxu0 %v4096_v21  ;;  %3937 = vmatprep.subr.bf16.mxu1 %v4096_v21  ;;  %v6646_v27 = vpack.c.bf16 %v6644_v45, %v6645_v28 }
 0xc47   : > { %3897 = vmatmul.mubr.bf16.gmra.mxu0 %v2775_v13 }
 0xc48   : > { %v2920_v48 = vpop.permute.xlu0 %2919  ;;  %v2985_v13 = vsel %vm976_vm0, %v6646_v27, %v2918_v55  ;;  %v4392_v27 = vld [vmem:[%s4737_s8 + $0x20] sm:$0xff] }
 0xc49   : > { %3911 = vmatpush3.bf16.msra.mxu0 %v4096_v21  ;;  %3945 = vmatpush3.bf16.msra.mxu1 %v4096_v21  ;;  %v6648_v21 = vld [vmem:[#allocation33_spill] sm:$0xff] }
 0xc4a   : > { %3912 = vmatprep.subr.bf16.mxu0 %v4097_v12  ;;  %3938 = vmatprep.subr.bf16.mxu1 %v4097_v12 }
 0xc4d   : > { %3913 = vmatpush3.bf16.msra.mxu0 %v4097_v12  ;;  %3946 = vmatpush3.bf16.msra.mxu1 %v4097_v12  ;;  %v6649_v12 = vpack.c.bf16 %v6647_v56, %v6648_v21  ;;  %v4394_v21 = vld [vmem:[%s4737_s8 + $0x50] sm:$0xff] }
 0xc4e   : > { %3914 = vmatprep.subr.bf16.mxu0 %v4098_v14  ;;  %3939 = vmatprep.subr.bf16.mxu1 %v4098_v14 }
 0xc51   : > { %3915 = vmatpush3.bf16.msra.mxu0 %v4098_v14  ;;  %3947 = vmatpush3.bf16.msra.mxu1 %v4098_v14  ;;  %v2988_v14 = vsel %vm976_vm0, %v6649_v12, %v2920_v48 }
 0xcc8   : > { %v3886_v42 = vpop.f32.mrf.mxu0 }
 0xcca   : > { %v2834_v5 = vpop.f32.mrf.mxu0 }
 0xccc   : > { %v3887_v15 = vpop.f32.mrf.mxu0 }
 0xccd   : > { %v2898_v22 = vpack.c.bf16 %v3887_v15, %v3886_v42 }
 0xcce   : > { %v2837_v59 = vpop.f32.mrf.mxu0 }
 0xccf   : > { %2963 = vrot.lane.b32.xlu0 %v2898_v22, %s4563_s18  ;;  %v2897_v63 = vpack.c.bf16 %v2837_v59, %v2834_v5  ;;  %v6650_v59 = vld [vmem:[#allocation40_spill] sm:$0xff] }
 0xcd0   : > { %v3890_v35 = vpop.f32.mrf.mxu0 }
 0xcd2   : > { %v2850_v24 = vpop.f32.mrf.mxu0 }
 0xcd3   : > { %2961 = vrot.lane.b32.xlu0 %v2897_v63, %s4563_s18 }
 0xcd4   : > { %v3891_v17 = vpop.f32.mrf.mxu0 }
 0xcd5   : > { %v2900_v16 = vpack.c.bf16 %v3891_v17, %v3890_v35  ;;  %v6651_v35 = vld [vmem:[#allocation38_spill] sm:$0xff]  ;;  %v6653_v17 = vld [vmem:[#allocation39_spill] sm:$0xff] }
 0xcd6   : > { %v2853_v50 = vpop.f32.mrf.mxu0  ;;  %v6652_v63 = vpack.c.bf16 %v6650_v59, %v6651_v35  ;;  %v4396_v35 = vld [vmem:[%s4737_s8 + $0x40] sm:$0xff] }
 0xcd7   : > { %2943 = vrot.lane.b32.xlu0 %v2410_v49, %s4564_s19  ;;  %v2899_v30 = vpack.c.bf16 %v2853_v50, %v2850_v24  ;;  %v6654_v50 = vld [vmem:[#allocation37_spill] sm:$0xff] }
 0xcd8   : > { %v3894_v33 = vpop.f32.mrf.mxu0  ;;  %v2991_v24 = vsel %vm976_vm0, %v6652_v63, %v2922_v1  ;;  %v6659_v1 = vld [vmem:[#allocation43_spill] sm:$0xff] }
 0xcd9   : > { %v6661_v6 = vpack.c.bf16 %v6659_v1, %v6660_v39  ;;  %v4401_v39 = vld [vmem:[%s4737_s8 + $0x78] sm:$0xff] }
 0xcda   : > { %v2866_v9 = vpop.f32.mrf.mxu0 }
 0xcdb   : > { %2965 = vrot.lane.b32.xlu0 %v2899_v30, %s4563_s18  ;;  %v3000_v3 = vsel %vm976_vm0, %v6661_v6, %v2928_v19 }
 0xcdc   : > { %v3895_v8 = vpop.f32.mrf.mxu0 }
 0xcdd   : > { %v2902_v31 = vpack.c.bf16 %v3895_v8, %v3894_v33  ;;  %v6655_v33 = vpack.c.bf16 %v6653_v17, %v6654_v50 }
 0xcde   : > { %v2869_v34 = vpop.f32.mrf.mxu0 }
 0xcdf   : > { %2967 = vrot.lane.b32.xlu0 %v2900_v16, %s4563_s18  ;;  %2971 = vrot.lane.b32.xlu1 %v2902_v31, %s4563_s18  ;;  %v2901_v52 = vpack.c.bf16 %v2869_v34, %v2866_v9  ;;  %v2994_v30 = vsel %vm976_vm0, %v6655_v33, %v2924_v23  ;;  %v3011_v9 = vsel %vm3001_vm1, %v2991_v24, %v2946_v2  ;;  %v4397_v33 = vld [vmem:[%s4737_s8 + $0x58] sm:$0xff] }
 0xce0   : > { %v3013_v16 = vsel %vm3001_vm1, %v2994_v30, %v2948_v36  ;;  %v6343_v36 = vld [vmem:[%s6452_s5] ss:$0 sm:$0xff] }
 0xce3   : > { %2969 = vrot.lane.b32.xlu1 %v2901_v52, %s4563_s18 }
 0xce7   : > { %2951 = vrot.lane.b32.xlu1 %v2414_v40, %s4564_s19  ;;  %v2942_v40 = vpop.permute.xlu0 %2941 }
 0xce8   : > { %v3007_v47 = vsel %vm3001_vm1, %v2985_v13, %v2942_v40  ;;  %v4387_v40 = vld [vmem:[%s4737_s8 + $0x10] sm:$0xff] }
 0xd07   : > { %v3898_v4 = vpop.f32.mrf.mxu0 }
 0xd09   : > { %v2882_v41 = vpop.f32.mrf.mxu0 }
 0xd0b   : > { %v3899_v49 = vpop.f32.mrf.mxu0 }
 0xd0c   : > { %v2904_v46 = vpack.c.bf16 %v3899_v49, %v3898_v4  ;;  %v6656_v4 = vld [vmem:[#allocation44_spill] sm:$0xff] }
 0xd0d   : > { %v2885_v26 = vpop.f32.mrf.mxu0 }
 0xd0e   : > { %v2903_v25 = vpack.c.bf16 %v2885_v26, %v2882_v41  ;;  %v6657_v41 = vld [vmem:[#allocation42_spill] sm:$0xff] }
 0xd0f   : > { %v6658_v49 = vpack.c.bf16 %v6656_v4, %v6657_v41  ;;  %v4399_v4 = vld [vmem:[%s4737_s8 + $0x70] sm:$0xff] }
 0xd10   : > { %2973 = vrot.lane.b32.xlu1 %v2903_v25, %s4563_s18 }
 0xd11   : > { %v2997_v26 = vsel %vm976_vm0, %v6658_v49, %v2926_v60 }
 0xd12   : > { %v3015_v25 = vsel %vm3001_vm1, %v2997_v26, %v2950_v20 }
 0xd14   : > { %2975 = vrot.lane.b32.xlu1 %v2904_v46, %s4563_s18 }
 0xd41   : > { %v2964_v32 = vpop.permute.xlu0 %2963 }
 0xd42   : > { %v3023_v29 = vsel %vm3018_vm2, %v3005_v57, %v2964_v32 }
 0xd45   : > { %v2962_v7 = vpop.permute.xlu0 %2961 }
 0xd46   : > { %v3020_v44 = vsel %vm3018_vm2, %v3003_v43, %v2962_v7  ;;  %v4390_v7 = vld [vmem:[%s4737_s8 + $0x8] sm:$0xff] }
 0xd47   : > { %3916 = vmatprep.mubr.bf16.mxu0 %v3020_v44 }
 0xd48   : > { %3917 = vmatmul.mubr.bf16.vlgmr.msra.gmra.mxu0 %v3023_v29  ;;  %v4391_v29 = vld [vmem:[%s4737_s8 + $0x30] sm:$0xff] }
 0xd49   : > { %v2944_v58 = vpop.permute.xlu0 %2943 }
 0xd4a   : > { %v3009_v42 = vsel %vm3001_vm1, %v2988_v14, %v2944_v58 }
 0xd4d   : > { %v2966_v61 = vpop.permute.xlu0 %2965 }
 0xd4e   : > { %v3026_v18 = vsel %vm3018_vm2, %v3007_v47, %v2966_v61  ;;  %v4393_v61 = vld [vmem:[%s4737_s8 + $0x38] sm:$0xff] }
 0xd4f   : > { %3920 = vmatprep.mubr.bf16.mxu0 %v3026_v18 }
 0xd51   : > { %v2968_v5 = vpop.permute.xlu0 %2967  ;;  %v2972_v15 = vpop.permute.xlu1 %2971 }
 0xd52   : > { %v3029_v22 = vsel %vm3018_vm2, %v3009_v42, %v2968_v5  ;;  %v3035_v34 = vsel %vm3018_vm2, %v3013_v16, %v2972_v15  ;;  %v4395_v5 = vld [vmem:[%s4737_s8 + $0x28] sm:$0xff] }
 0xd53   : > { %3921 = vmatmul.mubr.bf16.gmra.mxu0 %v3029_v22  ;;  %v4398_v16 = vld [vmem:[%s4737_s8 + $0x48] sm:$0xff] }
 0xd55   : > { %v2970_v8 = vpop.permute.xlu1 %2969 }
 0xd56   : > { %v3032_v31 = vsel %vm3018_vm2, %v3011_v9, %v2970_v8 }
 0xd57   : > { %3924 = vmatprep.mubr.bf16.mxu1 %v3032_v31 }
 0xd58   : > { %3925 = vmatmul.mubr.bf16.vlgmr.msra.gmra.mxu1 %v3035_v34 }
 0xd59   : > { %v2952_v52 = vpop.permute.xlu1 %2951 }
 0xd5a   : > { %v3017_v23 = vsel %vm3001_vm1, %v3000_v3, %v2952_v52 }
 0xd82   : > { %v2974_v46 = vpop.permute.xlu1 %2973 }
 0xd83   : > { %v3038_v51 = vsel %vm3018_vm2, %v3015_v25, %v2974_v46  ;;  %v4400_v25 = vld [vmem:[%s4737_s8 + $0x60] sm:$0xff] }
 0xd84   : > { %3928 = vmatprep.mubr.bf16.mxu1 %v3038_v51 }
 0xd86   : > { %v2976_v55 = vpop.permute.xlu1 %2975 }
 0xd87   : > { %v3041_v2 = vsel %vm3018_vm2, %v3017_v23, %v2976_v55  ;;  %v4402_v55 = vld [vmem:[%s4737_s8 + $0x68] sm:$0xff]  ;;  %s4566_s8 = smov [#allocation8]  }
 0xd88   : > { %3929 = vmatmul.mubr.bf16.gmra.mxu1 %v3041_v2  ;;  %s4487_s17 = sshll.u32 %s4566_s8, 4  ;;  %s4488_s17 = int_to_ptr.vmem [resolvable:$false] %s4487_s17 }
 0xd89   : > { %s4489_s18 = scalar_lea.vmem %s4488_s17, 4096  ;;  %p4490_p6 = scmp.lt.s32.totalorder %s6401_s10, %s4488_s17 }
 0xd8a   : > { %p4491_p12 = scmp.lt.s32.totalorder %s4489_s18, %s4483_s15 }
 0xd8c   : > { %p4492_p3 = por %p4491_p12, %p4490_p6 }
 0xd8e   : > { %p4493_p9 = pnand %p4492_p3, %p4486_p2 }
 0xe08   : > { %v3918_v48 = vpop.f32.mrf.mxu0 }
 0xe09   : > { %v3206_v60 = vadd.f32 %v4387_v40, %v3918_v48 }
 0xe0a   : > { %v3141_v32 = vpop.f32.mrf.mxu0 }
 0xe0b   : > { %v3229_v0 = vadd.f32 %v6343_v36, %v3206_v60  ;;  %v3204_v10 = vadd.f32 %v4388_v11, %v3141_v32 }
 0xe0c   : > { %v3919_v54 = vpop.f32.mrf.mxu0 }
 0xe0d   : > { %3245 = vst [vmem:[%s6350_s20 + $0x10] sm:$0xff] %v3229_v0  ;;  %v3227_v62 = vadd.f32 %v6343_v36, %v3204_v10  ;;  %v3207_v53 = vadd.f32 %v4389_v38, %v3919_v54 }
 0xe0e   : > { %v3144_v37 = vpop.f32.mrf.mxu0 }
 0xe0f   : > { %3243 = vst [vmem:[%s6350_s20] sm:$0xff] %v3227_v62  ;;  %v3230_v43 = vadd.f32 %v6343_v36, %v3207_v53  ;;  %v3205_v57 = vadd.f32 %v4390_v7, %v3144_v37 }
 0xe11   : > { %3246 = vst [vmem:[%s6350_s20 + $0x18] sm:$0xff] %v3230_v43  ;;  %v3228_v44 = vadd.f32 %v6343_v36, %v3205_v57 }
 0xe13   : > { %3244 = vst [vmem:[%s6350_s20 + $0x8] sm:$0xff] %v3228_v44  ;;  %v3922_v19 = vpop.f32.mrf.mxu0 }
 0xe14   : > { %v3210_v58 = vadd.f32 %v4391_v29, %v3922_v19 }
 0xe15   : > { %v3157_v45 = vpop.f32.mrf.mxu0 }
 0xe16   : > { %v3233_v28 = vadd.f32 %v6343_v36, %v3210_v58  ;;  %v3208_v13 = vadd.f32 %v4392_v27, %v3157_v45 }
 0xe17   : > { %v3923_v20 = vpop.f32.mrf.mxu0 }
 0xe18   : > { %3249 = vst [vmem:[%s6350_s20 + $0x30] sm:$0xff] %v3233_v28  ;;  %v3231_v47 = vadd.f32 %v6343_v36, %v3208_v13  ;;  %v3211_v18 = vadd.f32 %v4393_v61, %v3923_v20  ;;  %v3926_v56 = vpop.f32.mrf.mxu1 }
 0xe19   : > { %v3214_v12 = vadd.f32 %v4394_v21, %v3926_v56  ;;  %v3160_v14 = vpop.f32.mrf.mxu0 }
 0xe1a   : > { %3247 = vst [vmem:[%s6350_s20 + $0x20] sm:$0xff] %v3231_v47  ;;  %v3234_v42 = vadd.f32 %v6343_v36, %v3211_v18  ;;  %v3209_v15 = vadd.f32 %v4395_v5, %v3160_v14  ;;  %v3173_v22 = vpop.f32.mrf.mxu1 }
 0xe1b   : > { %v3237_v59 = vadd.f32 %v6343_v36, %v3214_v12  ;;  %v3212_v63 = vadd.f32 %v4396_v35, %v3173_v22 }
 0xe1c   : > { %3250 = vst [vmem:[%s6350_s20 + $0x38] sm:$0xff] %v3234_v42  ;;  %v3232_v24 = vadd.f32 %v6343_v36, %v3209_v15  ;;  %v3927_v17 = vpop.f32.mrf.mxu1 }
 0xe1d   : > { %3253 = vst [vmem:[%s6350_s20 + $0x50] sm:$0xff] %v3237_v59  ;;  %v3235_v50 = vadd.f32 %v6343_v36, %v3212_v63  ;;  %v3215_v30 = vadd.f32 %v4397_v33, %v3927_v17 }
 0xe1e   : > { %3248 = vst [vmem:[%s6350_s20 + $0x28] sm:$0xff] %v3232_v24  ;;  %v3176_v9 = vpop.f32.mrf.mxu1 }
 0xe1f   : > { %3251 = vst [vmem:[%s6350_s20 + $0x40] sm:$0xff] %v3235_v50  ;;  %v3238_v8 = vadd.f32 %v6343_v36, %v3215_v30  ;;  %v3213_v31 = vadd.f32 %v4398_v16, %v3176_v9 }
 0xe21   : > { %3254 = vst [vmem:[%s6350_s20 + $0x58] sm:$0xff] %v3238_v8  ;;  %v3236_v34 = vadd.f32 %v6343_v36, %v3213_v31 }
 0xe23   : > { %3252 = vst [vmem:[%s6350_s20 + $0x48] sm:$0xff] %v3236_v34 }
 0xe48   : > { %v3930_v52 = vpop.f32.mrf.mxu1 }
 0xe49   : > { %v3218_v41 = vadd.f32 %v4399_v4, %v3930_v52 }
 0xe4a   : > { %v3189_v49 = vpop.f32.mrf.mxu1 }
 0xe4b   : > { %v3241_v26 = vadd.f32 %v6343_v36, %v3218_v41  ;;  %v3216_v46 = vadd.f32 %v4400_v25, %v3189_v49 }
 0xe4c   : > { %v3931_v51 = vpop.f32.mrf.mxu1 }
 0xe4d   : > { %3257 = vst [vmem:[%s6350_s20 + $0x70] sm:$0xff] %v3241_v26  ;;  %v3239_v1 = vadd.f32 %v6343_v36, %v3216_v46  ;;  %v3219_v6 = vadd.f32 %v4401_v39, %v3931_v51 }
 0xe4e   : > { %v3192_v3 = vpop.f32.mrf.mxu1 }
 0xe4f   : > { %3255 = vst [vmem:[%s6350_s20 + $0x60] sm:$0xff] %v3239_v1  ;;  %v3242_v23 = vadd.f32 %v6343_v36, %v3219_v6  ;;  %v3217_v2 = vadd.f32 %v4402_v55, %v3192_v3 }
 0xe51   : > { %3258 = vst [vmem:[%s6350_s20 + $0x78] sm:$0xff] %v3242_v23  ;;  %v3240_v48 = vadd.f32 %v6343_v36, %v3217_v2 }
 0xe53   : > { %3256 = vst [vmem:[%s6350_s20 + $0x68] sm:$0xff] %v3240_v48 }
 0xe54   : > { %4496 = shalt.err (!%p4493_p9)
}
 0xe55   : > { %s4497_s19 = scalar_lea.hbm %s6399_s29, 2048  ;;  %s4501_s30 = scalar_lea.hbm %s6453_s6, 4096 }
 0xe56   : > { %p4498_p13 = scmp.ne.s32.totalorder %s6399_s29, %s4497_s19  ;;  %p4502_p4 = scmp.lt.s32.totalorder %s6399_s29, %s6453_s6 }
 0xe57   : > { %p4503_p8 = scmp.lt.s32.totalorder %s4501_s30, %s4497_s19 }
 0xe58   : > { %p4499_p5 = pnand %p4498_p13, %p6662_p10 }
 0xe59   : > { %p4504_p7 = por %p4503_p8, %p4502_p4 }
 0xe5a   : > { %p4500_p0 = pneg %p4499_p5 }
 0xe5c   : > { %p4505_p11 = pnand %p4504_p7, %p4500_p0 }
 0xe5e   : > { %4508 = shalt.err (!%p4505_p11)
}
 0xe5f   : > { %s4567_s13 = smov 128   ;;  %s4568_s27 = smov 8  }
 0xe60   : > { %3990 = dma.vmem_to_hbm [thread:$0]  (%p6662_p10), %s6401_s10, 2048, %s6399_s29, %s3260_s25, %s4567_s13, %s4567_s13, %s4568_s27  }
 0xe61 PF: > { %s3288_s15 = sand.u32 1, %s4539_s21   ;;  %p6663_p1 = scmp.ne.s32.totalorder %s6524_s28, 0 }
 0xe62   : > { %p6664_p2 = scmp.ge.s32.totalorder %s4551_s24, 2  ;;  %s3289_s8 = scalar_lea.sflag [#allocation4], %s3288_s15 }
 0xe64   : > { %p4004_p6 = pnand %p6664_p2, %p6663_p1 }
 0xe66   : > { %p4005_p12 = pneg %p4004_p6 }
 0xe68   : > { %4534 = dma.done.wait (%p4005_p12), %s3289_s8, 2048  }
 0xe69   : > { %4536 = vsyncadd (%p4005_p12), %s3289_s8, 4294965248  ;;  %p20_p3 = scmp.ge.s32.totalorder %s4676_s26, 4   ;;  %s6665_s21 = smov %s4543_s22 }
 0xe6a   : > { %s6666_s22 = smov %s4547_s23  ;;  %s6667_s23 = smov %s4685_s9 }
 0xe6b   : > { %s6668_s24 = smov %s4676_s26  ;;  %22 = sbr.rel (!%p20_p3) target bundleno = 6 (0x6), region = 97 }
 0xe70   :  { %3294 = vsyncpa [#allocation3], 1 }
 0xe71   :  { %3296 = vsyncpa [#allocation3 + $0x1], 1 }
 0xe72   :  { %3297 = vsyncpa [#allocation6], 1 }
 0xe73   :  { %3298 = vsyncpa [#allocation4], 1 }
 0xe74   :  { %3300 = vsyncpa [#allocation4 + $0x1], 1 }

</bundles_post_ra>
